<compile_context>
chip_gen: v7x
topology: tpu7x:2x2x1
jax: 0.10.0
libtpu: 0.0.40
codegen_flags: <defaults>
</compile_context>

<pallas_src>
import jax
import jax.numpy as jnp
from jax.experimental import pallas as pl
from jax.experimental.pallas import tpu as pltpu

MID = 16   # middle_channel
KW = 3     # conv kernel width (1x3)
EPS = 1e-5


def _attention_kernel(facc_ref, fgyr_ref, w1_ref, b1_ref, wa_ref, ba_ref,
                      wg_ref, bg_ref,
                      acc_out_ref, gyr_out_ref, att_acc_ref, att_gyr_ref):
    C, H, W = facc_ref.shape

    # channel-mean squeeze (torch.mean(dim=1, keepdim=True))
    sq_acc = jnp.mean(facc_ref[...], axis=0)   # (H, W)
    sq_gyr = jnp.mean(fgyr_ref[...], axis=0)   # (H, W)

    # Boundary masks for the 1x3 conv (padding=1 along W) — hoisted once.
    lane = jax.lax.broadcasted_iota(jnp.int32, (H, W), 1)
    mask_lo = lane > 0          # reading w-1 is in-bounds
    mask_hi = lane < (W - 1)    # reading w+1 is in-bounds

    def shift_w(x, d):
        # out[..., w] = x[..., w + d], zero-padded outside [0, W).
        if d == 0:
            return x
        rolled = pltpu.roll(x, (-d) % W, axis=1)      # XLU lane rotation
        return jnp.where(mask_lo if d < 0 else mask_hi, rolled, 0.0)

    # Shifted views of the two squeezed channels (taps k=0..2 -> d=k-1).
    sq_sh = [[shift_w(sq_acc, k - 1) for k in range(KW)],
             [shift_w(sq_gyr, k - 1) for k in range(KW)]]

    # conv_combination1 (2->16, folded BN, ReLU) fused with conv_acc/conv_gyr
    # heads (16->1, folded BN): each mid channel is consumed immediately.
    att_acc = None
    att_gyr = None
    for m in range(MID):
        e = None
        for ci in range(2):
            for k in range(KW):
                t = w1_ref[(m * 2 + ci) * KW + k] * sq_sh[ci][k]
                e = t if e is None else e + t
        e = jnp.maximum(e + b1_ref[m], 0.0)           # ReLU(conv1_m)
        for k in range(KW):
            e_k = shift_w(e, k - 1)
            ta = wa_ref[m * KW + k] * e_k
            tg = wg_ref[m * KW + k] * e_k
            att_acc = ta if att_acc is None else att_acc + ta
            att_gyr = tg if att_gyr is None else att_gyr + tg

    att_acc = jax.nn.sigmoid(att_acc + ba_ref[0])     # (H, W)
    att_gyr = jax.nn.sigmoid(att_gyr + bg_ref[0])

    att_acc_ref[...] = att_acc[None, :, :]
    att_gyr_ref[...] = att_gyr[None, :, :]

    # BasicBlock residual: out = f * att + f == f * (1 + att)
    acc_out_ref[...] = facc_ref[...] * (1.0 + att_acc)[None, :, :]
    gyr_out_ref[...] = fgyr_ref[...] * (1.0 + att_gyr)[None, :, :]


def basic_block(x_acc, x_gyr, folded, *, vmem_limit_bytes=32 * 1024 * 1024):
    """CA_C_s forward. x_acc/x_gyr: (B, C, H, W) NCHW, folded BN params."""
    B, C, H, W = x_acc.shape
    assert x_gyr.shape == (B, C, H, W)

    act_spec = pl.BlockSpec((None, C, H, W), lambda b: (b, 0, 0, 0))
    att_spec = pl.BlockSpec((None, 1, H, W), lambda b: (b, 0, 0, 0))
    smem = pl.BlockSpec(memory_space=pltpu.MemorySpace.SMEM)

    out_shapes = (
        jax.ShapeDtypeStruct((B, C, H, W), x_acc.dtype),
        jax.ShapeDtypeStruct((B, C, H, W), x_gyr.dtype),
        jax.ShapeDtypeStruct((B, 1, H, W), jnp.float32),
        jax.ShapeDtypeStruct((B, 1, H, W), jnp.float32),
    )
    return pl.pallas_call(
        _attention_kernel,
        grid=(B,),
        out_shape=out_shapes,
        in_specs=[act_spec, act_spec, smem, smem, smem, smem, smem, smem],
        out_specs=(act_spec, act_spec, att_spec, att_spec),
        compiler_params=pltpu.CompilerParams(
            dimension_semantics=("parallel",),      # megacore split on v7x
            vmem_limit_bytes=vmem_limit_bytes),     # safe on v7x's 64 MiB VMEM
    )(x_acc, x_gyr,
      folded['w1'], folded['b1'],
      folded['wa'], folded['ba'],
      folded['wg'], folded['bg'])


# ---------------- parameter construction (deterministic, synthetic) ----------


def init_raw_params(key):
    ks = jax.random.split(key, 9)

    def conv_p(k, out_c, in_c):
        k1, k2 = jax.random.split(k)
        w = 0.2 * jax.random.normal(k1, (out_c, in_c, 1, KW), jnp.float32)
        b = 0.1 * jax.random.normal(k2, (out_c,), jnp.float32)
        return w, b

    def bn_p(k, c):
        k1, k2, k3, k4 = jax.random.split(k, 4)
        gamma = 1.0 + 0.1 * jax.random.normal(k1, (c,), jnp.float32)
        beta = 0.1 * jax.random.normal(k2, (c,), jnp.float32)
        mean = 0.1 * jax.random.normal(k3, (c,), jnp.float32)
        var = 1.0 + 0.5 * jax.random.uniform(k4, (c,), jnp.float32)
        return gamma, beta, mean, var

    w1, b1 = conv_p(ks[0], MID, 2)
    wa, ba = conv_p(ks[1], 1, MID)
    wg, bg = conv_p(ks[2], 1, MID)
    return dict(w1=w1, b1=b1, bn1=bn_p(ks[3], MID),
                wa=wa, ba=ba, bna=bn_p(ks[4], 1),
                wg=wg, bg=bg, bng=bn_p(ks[5], 1))


def fold_bn(w, b, bn):
    gamma, beta, mean, var = bn
    scale = gamma / jnp.sqrt(var + EPS)
    w_eff = w * scale[:, None, None, None]
    b_eff = (b - mean) * scale + beta
    return w_eff, b_eff


def fold_params(raw):
    w1, b1 = fold_bn(raw['w1'], raw['b1'], raw['bn1'])
    wa, ba = fold_bn(raw['wa'], raw['ba'], raw['bna'])
    wg, bg = fold_bn(raw['wg'], raw['bg'], raw['bng'])
    # flatten (out, in, 1, kw) conv weights to 1D for cheap SMEM scalar reads
    return dict(w1=w1.reshape(-1), b1=b1,
                wa=wa.reshape(-1), ba=ba,
                wg=wg.reshape(-1), bg=bg)


# ---------------- pure-JAX reference (for correctness check) -----------------


def ref_forward(x_acc, x_gyr, raw):
    def conv(x, w, b):
        y = jax.lax.conv_general_dilated(
            x, w, window_strides=(1, 1), padding=((0, 0), (1, 1)),
            dimension_numbers=('NCHW', 'OIHW', 'NCHW'))
        return y + b[None, :, None, None]

    def bn(x, p):
        g, bta, m, v = p
        return ((x - m[None, :, None, None])
                / jnp.sqrt(v[None, :, None, None] + EPS)
                * g[None, :, None, None] + bta[None, :, None, None])

    sq = jnp.concatenate([x_acc.mean(1, keepdims=True),
                          x_gyr.mean(1, keepdims=True)], axis=1)
    exc = jax.nn.relu(bn(conv(sq, raw['w1'], raw['b1']), raw['bn1']))
    att_acc = jax.nn.sigmoid(bn(conv(exc, raw['wa'], raw['ba']), raw['bna']))
    att_gyr = jax.nn.sigmoid(bn(conv(exc, raw['wg'], raw['bg']), raw['bng']))
    return (x_acc * att_acc + x_acc, x_gyr * att_gyr + x_gyr, att_acc, att_gyr)


if __name__ == "__main__":
    key = jax.random.PRNGKey(0)
    k1, k2, k3 = jax.random.split(key, 3)

    # Shapes consistent with CaNet at the CA_C_s stage: (B, 64, 3, T/8).
    # W = 128 keeps the lane (last) axis dense.
    B, C, H, W = 2, 64, 3, 128
    x_acc = jax.random.normal(k1, (B, C, H, W), jnp.float32)
    x_gyr = jax.random.normal(k2, (B, C, H, W), jnp.float32)

    raw = init_raw_params(k3)
    folded = fold_params(raw)

    outs = jax.block_until_ready(basic_block(x_acc, x_gyr, folded))

    refs = ref_forward(x_acc, x_gyr, raw)
    for got, want in zip(outs, refs):
        assert got.shape == want.shape, (got.shape, want.shape)
        assert jnp.allclose(got, want, rtol=1e-4, atol=1e-5), (
            float(jnp.max(jnp.abs(got - want))))

    print("KERNEL_OK")
</pallas_src>

<mosaic_0001>
module attributes {stable_mosaic.version = 11 : i64} {
  func.func @_attention_kernel(%arg0: i32, %arg1: memref<1x64x3x128xf32, #tpu.memory_space<vmem>>, %arg2: memref<1x64x3x128xf32, #tpu.memory_space<vmem>>, %arg3: memref<96xf32, #tpu.memory_space<smem>>, %arg4: memref<16xf32, #tpu.memory_space<smem>>, %arg5: memref<48xf32, #tpu.memory_space<smem>>, %arg6: memref<1xf32, #tpu.memory_space<smem>>, %arg7: memref<48xf32, #tpu.memory_space<smem>>, %arg8: memref<1xf32, #tpu.memory_space<smem>>, %arg9: memref<1x64x3x128xf32, #tpu.memory_space<vmem>>, %arg10: memref<1x64x3x128xf32, #tpu.memory_space<vmem>>, %arg11: memref<1x1x3x128xf32, #tpu.memory_space<vmem>>, %arg12: memref<1x1x3x128xf32, #tpu.memory_space<vmem>>) attributes {dimension_semantics = [#tpu.dimension_semantics<parallel>], iteration_bounds = array<i64: 2>, scalar_prefetch = 0 : i64, scratch_operands = 0 : i64, tpu.core_type = #tpu.core_type<tc>, window_params = [{transform_indices = @transform_0, window_bounds = array<i64: 1, 64, 3, 128>}, {transform_indices = @transform_1, window_bounds = array<i64: 1, 64, 3, 128>}, {transform_indices = @transform_2, window_bounds = array<i64: 96>}, {transform_indices = @transform_3, window_bounds = array<i64: 16>}, {transform_indices = @transform_4, window_bounds = array<i64: 48>}, {transform_indices = @transform_5, window_bounds = array<i64: 1>}, {transform_indices = @transform_6, window_bounds = array<i64: 48>}, {transform_indices = @transform_7, window_bounds = array<i64: 1>}, {transform_indices = @transform_8, window_bounds = array<i64: 1, 64, 3, 128>}, {transform_indices = @transform_9, window_bounds = array<i64: 1, 64, 3, 128>}, {transform_indices = @transform_10, window_bounds = array<i64: 1, 1, 3, 128>}, {transform_indices = @transform_11, window_bounds = array<i64: 1, 1, 3, 128>}]} {
    %c0 = arith.constant 0 : index
    %c0_0 = arith.constant 0 : index
    %c0_1 = arith.constant 0 : index
    %c0_2 = arith.constant 0 : index
    %0 = vector.load %arg1[%c0, %c0_0, %c0_1, %c0_2] : memref<1x64x3x128xf32, #tpu.memory_space<vmem>>, vector<1x64x3x128xf32>
    %1 = vector.shape_cast %0 : vector<1x64x3x128xf32> to vector<64x3x128xf32>
    %cst = arith.constant dense<0.000000e+00> : vector<3x128xf32>
    %2 = vector.multi_reduction <add>, %1, %cst [0] : vector<64x3x128xf32> to vector<3x128xf32>
    %cst_3 = arith.constant 6.400000e+01 : f32
    %3 = vector.broadcast %cst_3 : f32 to vector<3x128xf32>
    %4 = arith.divf %2, %3 : vector<3x128xf32>
    %c0_4 = arith.constant 0 : index
    %c0_5 = arith.constant 0 : index
    %c0_6 = arith.constant 0 : index
    %c0_7 = arith.constant 0 : index
    %5 = vector.load %arg2[%c0_4, %c0_5, %c0_6, %c0_7] : memref<1x64x3x128xf32, #tpu.memory_space<vmem>>, vector<1x64x3x128xf32>
    %6 = vector.shape_cast %5 : vector<1x64x3x128xf32> to vector<64x3x128xf32>
    %cst_8 = arith.constant dense<0.000000e+00> : vector<3x128xf32>
    %7 = vector.multi_reduction <add>, %6, %cst_8 [0] : vector<64x3x128xf32> to vector<3x128xf32>
    %cst_9 = arith.constant 6.400000e+01 : f32
    %8 = vector.broadcast %cst_9 : f32 to vector<3x128xf32>
    %9 = arith.divf %7, %8 : vector<3x128xf32>
    %10 = tpu.iota {dimensions = array<i32: 1>} : vector<3x128xi32>
    %c0_i32 = arith.constant 0 : i32
    %11 = vector.broadcast %c0_i32 : i32 to vector<3x128xi32>
    %12 = arith.cmpi sgt, %10, %11 : vector<3x128xi32>
    %c127_i32 = arith.constant 127 : i32
    %13 = vector.broadcast %c127_i32 : i32 to vector<3x128xi32>
    %14 = arith.cmpi slt, %10, %13 : vector<3x128xi32>
    %c1_i32 = arith.constant 1 : i32
    %15 = tpu.dynamic_rotate %4 by %c1_i32 dim 1 : vector<3x128xf32>, i32 -> vector<3x128xf32>
    %cst_10 = arith.constant 0.000000e+00 : f32
    %16 = vector.broadcast %cst_10 : f32 to vector<3x128xf32>
    %17 = arith.select %12, %15, %16 : vector<3x128xi1>, vector<3x128xf32>
    %c127_i32_11 = arith.constant 127 : i32
    %18 = tpu.dynamic_rotate %4 by %c127_i32_11 dim 1 : vector<3x128xf32>, i32 -> vector<3x128xf32>
    %cst_12 = arith.constant 0.000000e+00 : f32
    %19 = vector.broadcast %cst_12 : f32 to vector<3x128xf32>
    %20 = arith.select %14, %18, %19 : vector<3x128xi1>, vector<3x128xf32>
    %c1_i32_13 = arith.constant 1 : i32
    %21 = tpu.dynamic_rotate %9 by %c1_i32_13 dim 1 : vector<3x128xf32>, i32 -> vector<3x128xf32>
    %cst_14 = arith.constant 0.000000e+00 : f32
    %22 = vector.broadcast %cst_14 : f32 to vector<3x128xf32>
    %23 = arith.select %12, %21, %22 : vector<3x128xi1>, vector<3x128xf32>
    %c127_i32_15 = arith.constant 127 : i32
    %24 = tpu.dynamic_rotate %9 by %c127_i32_15 dim 1 : vector<3x128xf32>, i32 -> vector<3x128xf32>
    %cst_16 = arith.constant 0.000000e+00 : f32
    %25 = vector.broadcast %cst_16 : f32 to vector<3x128xf32>
    %26 = arith.select %14, %24, %25 : vector<3x128xi1>, vector<3x128xf32>
    %c0_17 = arith.constant 0 : index
    %27 = memref.load %arg3[%c0_17] : memref<96xf32, #tpu.memory_space<smem>>
    %28 = vector.broadcast %27 : f32 to vector<3x128xf32>
    %29 = arith.mulf %28, %17 : vector<3x128xf32>
    %c1 = arith.constant 1 : index
    %30 = memref.load %arg3[%c1] : memref<96xf32, #tpu.memory_space<smem>>
    %31 = vector.broadcast %30 : f32 to vector<3x128xf32>
    %32 = arith.mulf %31, %4 : vector<3x128xf32>
    %33 = arith.addf %29, %32 : vector<3x128xf32>
    %c2 = arith.constant 2 : index
    %34 = memref.load %arg3[%c2] : memref<96xf32, #tpu.memory_space<smem>>
    %35 = vector.broadcast %34 : f32 to vector<3x128xf32>
    %36 = arith.mulf %35, %20 : vector<3x128xf32>
    %37 = arith.addf %33, %36 : vector<3x128xf32>
    %c3 = arith.constant 3 : index
    %38 = memref.load %arg3[%c3] : memref<96xf32, #tpu.memory_space<smem>>
    %39 = vector.broadcast %38 : f32 to vector<3x128xf32>
    %40 = arith.mulf %39, %23 : vector<3x128xf32>
    %41 = arith.addf %37, %40 : vector<3x128xf32>
    %c4 = arith.constant 4 : index
    %42 = memref.load %arg3[%c4] : memref<96xf32, #tpu.memory_space<smem>>
    %43 = vector.broadcast %42 : f32 to vector<3x128xf32>
    %44 = arith.mulf %43, %9 : vector<3x128xf32>
    %45 = arith.addf %41, %44 : vector<3x128xf32>
    %c5 = arith.constant 5 : index
    %46 = memref.load %arg3[%c5] : memref<96xf32, #tpu.memory_space<smem>>
    %47 = vector.broadcast %46 : f32 to vector<3x128xf32>
    %48 = arith.mulf %47, %26 : vector<3x128xf32>
    %49 = arith.addf %45, %48 : vector<3x128xf32>
    %c0_18 = arith.constant 0 : index
    %50 = memref.load %arg4[%c0_18] : memref<16xf32, #tpu.memory_space<smem>>
    %51 = vector.broadcast %50 : f32 to vector<3x128xf32>
    %52 = arith.addf %49, %51 : vector<3x128xf32>
    %cst_19 = arith.constant 0.000000e+00 : f32
    %53 = vector.broadcast %cst_19 : f32 to vector<3x128xf32>
    %54 = arith.maximumf %52, %53 : vector<3x128xf32>
    %c1_i32_20 = arith.constant 1 : i32
    %55 = tpu.dynamic_rotate %54 by %c1_i32_20 dim 1 : vector<3x128xf32>, i32 -> vector<3x128xf32>
    %cst_21 = arith.constant 0.000000e+00 : f32
    %56 = vector.broadcast %cst_21 : f32 to vector<3x128xf32>
    %57 = arith.select %12, %55, %56 : vector<3x128xi1>, vector<3x128xf32>
    %c0_22 = arith.constant 0 : index
    %58 = memref.load %arg5[%c0_22] : memref<48xf32, #tpu.memory_space<smem>>
    %59 = vector.broadcast %58 : f32 to vector<3x128xf32>
    %60 = arith.mulf %59, %57 : vector<3x128xf32>
    %c0_23 = arith.constant 0 : index
    %61 = memref.load %arg7[%c0_23] : memref<48xf32, #tpu.memory_space<smem>>
    %62 = vector.broadcast %61 : f32 to vector<3x128xf32>
    %63 = arith.mulf %62, %57 : vector<3x128xf32>
    %c1_24 = arith.constant 1 : index
    %64 = memref.load %arg5[%c1_24] : memref<48xf32, #tpu.memory_space<smem>>
    %65 = vector.broadcast %64 : f32 to vector<3x128xf32>
    %66 = arith.mulf %65, %54 : vector<3x128xf32>
    %c1_25 = arith.constant 1 : index
    %67 = memref.load %arg7[%c1_25] : memref<48xf32, #tpu.memory_space<smem>>
    %68 = vector.broadcast %67 : f32 to vector<3x128xf32>
    %69 = arith.mulf %68, %54 : vector<3x128xf32>
    %70 = arith.addf %60, %66 : vector<3x128xf32>
    %71 = arith.addf %63, %69 : vector<3x128xf32>
    %c127_i32_26 = arith.constant 127 : i32
    %72 = tpu.dynamic_rotate %54 by %c127_i32_26 dim 1 : vector<3x128xf32>, i32 -> vector<3x128xf32>
    %cst_27 = arith.constant 0.000000e+00 : f32
    %73 = vector.broadcast %cst_27 : f32 to vector<3x128xf32>
    %74 = arith.select %14, %72, %73 : vector<3x128xi1>, vector<3x128xf32>
    %c2_28 = arith.constant 2 : index
    %75 = memref.load %arg5[%c2_28] : memref<48xf32, #tpu.memory_space<smem>>
    %76 = vector.broadcast %75 : f32 to vector<3x128xf32>
    %77 = arith.mulf %76, %74 : vector<3x128xf32>
    %c2_29 = arith.constant 2 : index
    %78 = memref.load %arg7[%c2_29] : memref<48xf32, #tpu.memory_space<smem>>
    %79 = vector.broadcast %78 : f32 to vector<3x128xf32>
    %80 = arith.mulf %79, %74 : vector<3x128xf32>
    %81 = arith.addf %70, %77 : vector<3x128xf32>
    %82 = arith.addf %71, %80 : vector<3x128xf32>
    %c6 = arith.constant 6 : index
    %83 = memref.load %arg3[%c6] : memref<96xf32, #tpu.memory_space<smem>>
    %84 = vector.broadcast %83 : f32 to vector<3x128xf32>
    %85 = arith.mulf %84, %17 : vector<3x128xf32>
    %c7 = arith.constant 7 : index
    %86 = memref.load %arg3[%c7] : memref<96xf32, #tpu.memory_space<smem>>
    %87 = vector.broadcast %86 : f32 to vector<3x128xf32>
    %88 = arith.mulf %87, %4 : vector<3x128xf32>
    %89 = arith.addf %85, %88 : vector<3x128xf32>
    %c8 = arith.constant 8 : index
    %90 = memref.load %arg3[%c8] : memref<96xf32, #tpu.memory_space<smem>>
    %91 = vector.broadcast %90 : f32 to vector<3x128xf32>
    %92 = arith.mulf %91, %20 : vector<3x128xf32>
    %93 = arith.addf %89, %92 : vector<3x128xf32>
    %c9 = arith.constant 9 : index
    %94 = memref.load %arg3[%c9] : memref<96xf32, #tpu.memory_space<smem>>
    %95 = vector.broadcast %94 : f32 to vector<3x128xf32>
    %96 = arith.mulf %95, %23 : vector<3x128xf32>
    %97 = arith.addf %93, %96 : vector<3x128xf32>
    %c10 = arith.constant 10 : index
    %98 = memref.load %arg3[%c10] : memref<96xf32, #tpu.memory_space<smem>>
    %99 = vector.broadcast %98 : f32 to vector<3x128xf32>
    %100 = arith.mulf %99, %9 : vector<3x128xf32>
    %101 = arith.addf %97, %100 : vector<3x128xf32>
    %c11 = arith.constant 11 : index
    %102 = memref.load %arg3[%c11] : memref<96xf32, #tpu.memory_space<smem>>
    %103 = vector.broadcast %102 : f32 to vector<3x128xf32>
    %104 = arith.mulf %103, %26 : vector<3x128xf32>
    %105 = arith.addf %101, %104 : vector<3x128xf32>
    %c1_30 = arith.constant 1 : index
    %106 = memref.load %arg4[%c1_30] : memref<16xf32, #tpu.memory_space<smem>>
    %107 = vector.broadcast %106 : f32 to vector<3x128xf32>
    %108 = arith.addf %105, %107 : vector<3x128xf32>
    %cst_31 = arith.constant 0.000000e+00 : f32
    %109 = vector.broadcast %cst_31 : f32 to vector<3x128xf32>
    %110 = arith.maximumf %108, %109 : vector<3x128xf32>
    %c1_i32_32 = arith.constant 1 : i32
    %111 = tpu.dynamic_rotate %110 by %c1_i32_32 dim 1 : vector<3x128xf32>, i32 -> vector<3x128xf32>
    %cst_33 = arith.constant 0.000000e+00 : f32
    %112 = vector.broadcast %cst_33 : f32 to vector<3x128xf32>
    %113 = arith.select %12, %111, %112 : vector<3x128xi1>, vector<3x128xf32>
    %c3_34 = arith.constant 3 : index
    %114 = memref.load %arg5[%c3_34] : memref<48xf32, #tpu.memory_space<smem>>
    %115 = vector.broadcast %114 : f32 to vector<3x128xf32>
    %116 = arith.mulf %115, %113 : vector<3x128xf32>
    %c3_35 = arith.constant 3 : index
    %117 = memref.load %arg7[%c3_35] : memref<48xf32, #tpu.memory_space<smem>>
    %118 = vector.broadcast %117 : f32 to vector<3x128xf32>
    %119 = arith.mulf %118, %113 : vector<3x128xf32>
    %120 = arith.addf %81, %116 : vector<3x128xf32>
    %121 = arith.addf %82, %119 : vector<3x128xf32>
    %c4_36 = arith.constant 4 : index
    %122 = memref.load %arg5[%c4_36] : memref<48xf32, #tpu.memory_space<smem>>
    %123 = vector.broadcast %122 : f32 to vector<3x128xf32>
    %124 = arith.mulf %123, %110 : vector<3x128xf32>
    %c4_37 = arith.constant 4 : index
    %125 = memref.load %arg7[%c4_37] : memref<48xf32, #tpu.memory_space<smem>>
    %126 = vector.broadcast %125 : f32 to vector<3x128xf32>
    %127 = arith.mulf %126, %110 : vector<3x128xf32>
    %128 = arith.addf %120, %124 : vector<3x128xf32>
    %129 = arith.addf %121, %127 : vector<3x128xf32>
    %c127_i32_38 = arith.constant 127 : i32
    %130 = tpu.dynamic_rotate %110 by %c127_i32_38 dim 1 : vector<3x128xf32>, i32 -> vector<3x128xf32>
    %cst_39 = arith.constant 0.000000e+00 : f32
    %131 = vector.broadcast %cst_39 : f32 to vector<3x128xf32>
    %132 = arith.select %14, %130, %131 : vector<3x128xi1>, vector<3x128xf32>
    %c5_40 = arith.constant 5 : index
    %133 = memref.load %arg5[%c5_40] : memref<48xf32, #tpu.memory_space<smem>>
    %134 = vector.broadcast %133 : f32 to vector<3x128xf32>
    %135 = arith.mulf %134, %132 : vector<3x128xf32>
    %c5_41 = arith.constant 5 : index
    %136 = memref.load %arg7[%c5_41] : memref<48xf32, #tpu.memory_space<smem>>
    %137 = vector.broadcast %136 : f32 to vector<3x128xf32>
    %138 = arith.mulf %137, %132 : vector<3x128xf32>
    %139 = arith.addf %128, %135 : vector<3x128xf32>
    %140 = arith.addf %129, %138 : vector<3x128xf32>
    %c12 = arith.constant 12 : index
    %141 = memref.load %arg3[%c12] : memref<96xf32, #tpu.memory_space<smem>>
    %142 = vector.broadcast %141 : f32 to vector<3x128xf32>
    %143 = arith.mulf %142, %17 : vector<3x128xf32>
    %c13 = arith.constant 13 : index
    %144 = memref.load %arg3[%c13] : memref<96xf32, #tpu.memory_space<smem>>
    %145 = vector.broadcast %144 : f32 to vector<3x128xf32>
    %146 = arith.mulf %145, %4 : vector<3x128xf32>
    %147 = arith.addf %143, %146 : vector<3x128xf32>
    %c14 = arith.constant 14 : index
    %148 = memref.load %arg3[%c14] : memref<96xf32, #tpu.memory_space<smem>>
    %149 = vector.broadcast %148 : f32 to vector<3x128xf32>
    %150 = arith.mulf %149, %20 : vector<3x128xf32>
    %151 = arith.addf %147, %150 : vector<3x128xf32>
    %c15 = arith.constant 15 : index
    %152 = memref.load %arg3[%c15] : memref<96xf32, #tpu.memory_space<smem>>
    %153 = vector.broadcast %152 : f32 to vector<3x128xf32>
    %154 = arith.mulf %153, %23 : vector<3x128xf32>
    %155 = arith.addf %151, %154 : vector<3x128xf32>
    %c16 = arith.constant 16 : index
    %156 = memref.load %arg3[%c16] : memref<96xf32, #tpu.memory_space<smem>>
    %157 = vector.broadcast %156 : f32 to vector<3x128xf32>
    %158 = arith.mulf %157, %9 : vector<3x128xf32>
    %159 = arith.addf %155, %158 : vector<3x128xf32>
    %c17 = arith.constant 17 : index
    %160 = memref.load %arg3[%c17] : memref<96xf32, #tpu.memory_space<smem>>
    %161 = vector.broadcast %160 : f32 to vector<3x128xf32>
    %162 = arith.mulf %161, %26 : vector<3x128xf32>
    %163 = arith.addf %159, %162 : vector<3x128xf32>
    %c2_42 = arith.constant 2 : index
    %164 = memref.load %arg4[%c2_42] : memref<16xf32, #tpu.memory_space<smem>>
    %165 = vector.broadcast %164 : f32 to vector<3x128xf32>
    %166 = arith.addf %163, %165 : vector<3x128xf32>
    %cst_43 = arith.constant 0.000000e+00 : f32
    %167 = vector.broadcast %cst_43 : f32 to vector<3x128xf32>
    %168 = arith.maximumf %166, %167 : vector<3x128xf32>
    %c1_i32_44 = arith.constant 1 : i32
    %169 = tpu.dynamic_rotate %168 by %c1_i32_44 dim 1 : vector<3x128xf32>, i32 -> vector<3x128xf32>
    %cst_45 = arith.constant 0.000000e+00 : f32
    %170 = vector.broadcast %cst_45 : f32 to vector<3x128xf32>
    %171 = arith.select %12, %169, %170 : vector<3x128xi1>, vector<3x128xf32>
    %c6_46 = arith.constant 6 : index
    %172 = memref.load %arg5[%c6_46] : memref<48xf32, #tpu.memory_space<smem>>
    %173 = vector.broadcast %172 : f32 to vector<3x128xf32>
    %174 = arith.mulf %173, %171 : vector<3x128xf32>
    %c6_47 = arith.constant 6 : index
    %175 = memref.load %arg7[%c6_47] : memref<48xf32, #tpu.memory_space<smem>>
    %176 = vector.broadcast %175 : f32 to vector<3x128xf32>
    %177 = arith.mulf %176, %171 : vector<3x128xf32>
    %178 = arith.addf %139, %174 : vector<3x128xf32>
    %179 = arith.addf %140, %177 : vector<3x128xf32>
    %c7_48 = arith.constant 7 : index
    %180 = memref.load %arg5[%c7_48] : memref<48xf32, #tpu.memory_space<smem>>
    %181 = vector.broadcast %180 : f32 to vector<3x128xf32>
    %182 = arith.mulf %181, %168 : vector<3x128xf32>
    %c7_49 = arith.constant 7 : index
    %183 = memref.load %arg7[%c7_49] : memref<48xf32, #tpu.memory_space<smem>>
    %184 = vector.broadcast %183 : f32 to vector<3x128xf32>
    %185 = arith.mulf %184, %168 : vector<3x128xf32>
    %186 = arith.addf %178, %182 : vector<3x128xf32>
    %187 = arith.addf %179, %185 : vector<3x128xf32>
    %c127_i32_50 = arith.constant 127 : i32
    %188 = tpu.dynamic_rotate %168 by %c127_i32_50 dim 1 : vector<3x128xf32>, i32 -> vector<3x128xf32>
    %cst_51 = arith.constant 0.000000e+00 : f32
    %189 = vector.broadcast %cst_51 : f32 to vector<3x128xf32>
    %190 = arith.select %14, %188, %189 : vector<3x128xi1>, vector<3x128xf32>
    %c8_52 = arith.constant 8 : index
    %191 = memref.load %arg5[%c8_52] : memref<48xf32, #tpu.memory_space<smem>>
    %192 = vector.broadcast %191 : f32 to vector<3x128xf32>
    %193 = arith.mulf %192, %190 : vector<3x128xf32>
    %c8_53 = arith.constant 8 : index
    %194 = memref.load %arg7[%c8_53] : memref<48xf32, #tpu.memory_space<smem>>
    %195 = vector.broadcast %194 : f32 to vector<3x128xf32>
    %196 = arith.mulf %195, %190 : vector<3x128xf32>
    %197 = arith.addf %186, %193 : vector<3x128xf32>
    %198 = arith.addf %187, %196 : vector<3x128xf32>
    %c18 = arith.constant 18 : index
    %199 = memref.load %arg3[%c18] : memref<96xf32, #tpu.memory_space<smem>>
    %200 = vector.broadcast %199 : f32 to vector<3x128xf32>
    %201 = arith.mulf %200, %17 : vector<3x128xf32>
    %c19 = arith.constant 19 : index
    %202 = memref.load %arg3[%c19] : memref<96xf32, #tpu.memory_space<smem>>
    %203 = vector.broadcast %202 : f32 to vector<3x128xf32>
    %204 = arith.mulf %203, %4 : vector<3x128xf32>
    %205 = arith.addf %201, %204 : vector<3x128xf32>
    %c20 = arith.constant 20 : index
    %206 = memref.load %arg3[%c20] : memref<96xf32, #tpu.memory_space<smem>>
    %207 = vector.broadcast %206 : f32 to vector<3x128xf32>
    %208 = arith.mulf %207, %20 : vector<3x128xf32>
    %209 = arith.addf %205, %208 : vector<3x128xf32>
    %c21 = arith.constant 21 : index
    %210 = memref.load %arg3[%c21] : memref<96xf32, #tpu.memory_space<smem>>
    %211 = vector.broadcast %210 : f32 to vector<3x128xf32>
    %212 = arith.mulf %211, %23 : vector<3x128xf32>
    %213 = arith.addf %209, %212 : vector<3x128xf32>
    %c22 = arith.constant 22 : index
    %214 = memref.load %arg3[%c22] : memref<96xf32, #tpu.memory_space<smem>>
    %215 = vector.broadcast %214 : f32 to vector<3x128xf32>
    %216 = arith.mulf %215, %9 : vector<3x128xf32>
    %217 = arith.addf %213, %216 : vector<3x128xf32>
    %c23 = arith.constant 23 : index
    %218 = memref.load %arg3[%c23] : memref<96xf32, #tpu.memory_space<smem>>
    %219 = vector.broadcast %218 : f32 to vector<3x128xf32>
    %220 = arith.mulf %219, %26 : vector<3x128xf32>
    %221 = arith.addf %217, %220 : vector<3x128xf32>
    %c3_54 = arith.constant 3 : index
    %222 = memref.load %arg4[%c3_54] : memref<16xf32, #tpu.memory_space<smem>>
    %223 = vector.broadcast %222 : f32 to vector<3x128xf32>
    %224 = arith.addf %221, %223 : vector<3x128xf32>
    %cst_55 = arith.constant 0.000000e+00 : f32
    %225 = vector.broadcast %cst_55 : f32 to vector<3x128xf32>
    %226 = arith.maximumf %224, %225 : vector<3x128xf32>
    %c1_i32_56 = arith.constant 1 : i32
    %227 = tpu.dynamic_rotate %226 by %c1_i32_56 dim 1 : vector<3x128xf32>, i32 -> vector<3x128xf32>
    %cst_57 = arith.constant 0.000000e+00 : f32
    %228 = vector.broadcast %cst_57 : f32 to vector<3x128xf32>
    %229 = arith.select %12, %227, %228 : vector<3x128xi1>, vector<3x128xf32>
    %c9_58 = arith.constant 9 : index
    %230 = memref.load %arg5[%c9_58] : memref<48xf32, #tpu.memory_space<smem>>
    %231 = vector.broadcast %230 : f32 to vector<3x128xf32>
    %232 = arith.mulf %231, %229 : vector<3x128xf32>
    %c9_59 = arith.constant 9 : index
    %233 = memref.load %arg7[%c9_59] : memref<48xf32, #tpu.memory_space<smem>>
    %234 = vector.broadcast %233 : f32 to vector<3x128xf32>
    %235 = arith.mulf %234, %229 : vector<3x128xf32>
    %236 = arith.addf %197, %232 : vector<3x128xf32>
    %237 = arith.addf %198, %235 : vector<3x128xf32>
    %c10_60 = arith.constant 10 : index
    %238 = memref.load %arg5[%c10_60] : memref<48xf32, #tpu.memory_space<smem>>
    %239 = vector.broadcast %238 : f32 to vector<3x128xf32>
    %240 = arith.mulf %239, %226 : vector<3x128xf32>
    %c10_61 = arith.constant 10 : index
    %241 = memref.load %arg7[%c10_61] : memref<48xf32, #tpu.memory_space<smem>>
    %242 = vector.broadcast %241 : f32 to vector<3x128xf32>
    %243 = arith.mulf %242, %226 : vector<3x128xf32>
    %244 = arith.addf %236, %240 : vector<3x128xf32>
    %245 = arith.addf %237, %243 : vector<3x128xf32>
    %c127_i32_62 = arith.constant 127 : i32
    %246 = tpu.dynamic_rotate %226 by %c127_i32_62 dim 1 : vector<3x128xf32>, i32 -> vector<3x128xf32>
    %cst_63 = arith.constant 0.000000e+00 : f32
    %247 = vector.broadcast %cst_63 : f32 to vector<3x128xf32>
    %248 = arith.select %14, %246, %247 : vector<3x128xi1>, vector<3x128xf32>
    %c11_64 = arith.constant 11 : index
    %249 = memref.load %arg5[%c11_64] : memref<48xf32, #tpu.memory_space<smem>>
    %250 = vector.broadcast %249 : f32 to vector<3x128xf32>
    %251 = arith.mulf %250, %248 : vector<3x128xf32>
    %c11_65 = arith.constant 11 : index
    %252 = memref.load %arg7[%c11_65] : memref<48xf32, #tpu.memory_space<smem>>
    %253 = vector.broadcast %252 : f32 to vector<3x128xf32>
    %254 = arith.mulf %253, %248 : vector<3x128xf32>
    %255 = arith.addf %244, %251 : vector<3x128xf32>
    %256 = arith.addf %245, %254 : vector<3x128xf32>
    %c24 = arith.constant 24 : index
    %257 = memref.load %arg3[%c24] : memref<96xf32, #tpu.memory_space<smem>>
    %258 = vector.broadcast %257 : f32 to vector<3x128xf32>
    %259 = arith.mulf %258, %17 : vector<3x128xf32>
    %c25 = arith.constant 25 : index
    %260 = memref.load %arg3[%c25] : memref<96xf32, #tpu.memory_space<smem>>
    %261 = vector.broadcast %260 : f32 to vector<3x128xf32>
    %262 = arith.mulf %261, %4 : vector<3x128xf32>
    %263 = arith.addf %259, %262 : vector<3x128xf32>
    %c26 = arith.constant 26 : index
    %264 = memref.load %arg3[%c26] : memref<96xf32, #tpu.memory_space<smem>>
    %265 = vector.broadcast %264 : f32 to vector<3x128xf32>
    %266 = arith.mulf %265, %20 : vector<3x128xf32>
    %267 = arith.addf %263, %266 : vector<3x128xf32>
    %c27 = arith.constant 27 : index
    %268 = memref.load %arg3[%c27] : memref<96xf32, #tpu.memory_space<smem>>
    %269 = vector.broadcast %268 : f32 to vector<3x128xf32>
    %270 = arith.mulf %269, %23 : vector<3x128xf32>
    %271 = arith.addf %267, %270 : vector<3x128xf32>
    %c28 = arith.constant 28 : index
    %272 = memref.load %arg3[%c28] : memref<96xf32, #tpu.memory_space<smem>>
    %273 = vector.broadcast %272 : f32 to vector<3x128xf32>
    %274 = arith.mulf %273, %9 : vector<3x128xf32>
    %275 = arith.addf %271, %274 : vector<3x128xf32>
    %c29 = arith.constant 29 : index
    %276 = memref.load %arg3[%c29] : memref<96xf32, #tpu.memory_space<smem>>
    %277 = vector.broadcast %276 : f32 to vector<3x128xf32>
    %278 = arith.mulf %277, %26 : vector<3x128xf32>
    %279 = arith.addf %275, %278 : vector<3x128xf32>
    %c4_66 = arith.constant 4 : index
    %280 = memref.load %arg4[%c4_66] : memref<16xf32, #tpu.memory_space<smem>>
    %281 = vector.broadcast %280 : f32 to vector<3x128xf32>
    %282 = arith.addf %279, %281 : vector<3x128xf32>
    %cst_67 = arith.constant 0.000000e+00 : f32
    %283 = vector.broadcast %cst_67 : f32 to vector<3x128xf32>
    %284 = arith.maximumf %282, %283 : vector<3x128xf32>
    %c1_i32_68 = arith.constant 1 : i32
    %285 = tpu.dynamic_rotate %284 by %c1_i32_68 dim 1 : vector<3x128xf32>, i32 -> vector<3x128xf32>
    %cst_69 = arith.constant 0.000000e+00 : f32
    %286 = vector.broadcast %cst_69 : f32 to vector<3x128xf32>
    %287 = arith.select %12, %285, %286 : vector<3x128xi1>, vector<3x128xf32>
    %c12_70 = arith.constant 12 : index
    %288 = memref.load %arg5[%c12_70] : memref<48xf32, #tpu.memory_space<smem>>
    %289 = vector.broadcast %288 : f32 to vector<3x128xf32>
    %290 = arith.mulf %289, %287 : vector<3x128xf32>
    %c12_71 = arith.constant 12 : index
    %291 = memref.load %arg7[%c12_71] : memref<48xf32, #tpu.memory_space<smem>>
    %292 = vector.broadcast %291 : f32 to vector<3x128xf32>
    %293 = arith.mulf %292, %287 : vector<3x128xf32>
    %294 = arith.addf %255, %290 : vector<3x128xf32>
    %295 = arith.addf %256, %293 : vector<3x128xf32>
    %c13_72 = arith.constant 13 : index
    %296 = memref.load %arg5[%c13_72] : memref<48xf32, #tpu.memory_space<smem>>
    %297 = vector.broadcast %296 : f32 to vector<3x128xf32>
    %298 = arith.mulf %297, %284 : vector<3x128xf32>
    %c13_73 = arith.constant 13 : index
    %299 = memref.load %arg7[%c13_73] : memref<48xf32, #tpu.memory_space<smem>>
    %300 = vector.broadcast %299 : f32 to vector<3x128xf32>
    %301 = arith.mulf %300, %284 : vector<3x128xf32>
    %302 = arith.addf %294, %298 : vector<3x128xf32>
    %303 = arith.addf %295, %301 : vector<3x128xf32>
    %c127_i32_74 = arith.constant 127 : i32
    %304 = tpu.dynamic_rotate %284 by %c127_i32_74 dim 1 : vector<3x128xf32>, i32 -> vector<3x128xf32>
    %cst_75 = arith.constant 0.000000e+00 : f32
    %305 = vector.broadcast %cst_75 : f32 to vector<3x128xf32>
    %306 = arith.select %14, %304, %305 : vector<3x128xi1>, vector<3x128xf32>
    %c14_76 = arith.constant 14 : index
    %307 = memref.load %arg5[%c14_76] : memref<48xf32, #tpu.memory_space<smem>>
    %308 = vector.broadcast %307 : f32 to vector<3x128xf32>
    %309 = arith.mulf %308, %306 : vector<3x128xf32>
    %c14_77 = arith.constant 14 : index
    %310 = memref.load %arg7[%c14_77] : memref<48xf32, #tpu.memory_space<smem>>
    %311 = vector.broadcast %310 : f32 to vector<3x128xf32>
    %312 = arith.mulf %311, %306 : vector<3x128xf32>
    %313 = arith.addf %302, %309 : vector<3x128xf32>
    %314 = arith.addf %303, %312 : vector<3x128xf32>
    %c30 = arith.constant 30 : index
    %315 = memref.load %arg3[%c30] : memref<96xf32, #tpu.memory_space<smem>>
    %316 = vector.broadcast %315 : f32 to vector<3x128xf32>
    %317 = arith.mulf %316, %17 : vector<3x128xf32>
    %c31 = arith.constant 31 : index
    %318 = memref.load %arg3[%c31] : memref<96xf32, #tpu.memory_space<smem>>
    %319 = vector.broadcast %318 : f32 to vector<3x128xf32>
    %320 = arith.mulf %319, %4 : vector<3x128xf32>
    %321 = arith.addf %317, %320 : vector<3x128xf32>
    %c32 = arith.constant 32 : index
    %322 = memref.load %arg3[%c32] : memref<96xf32, #tpu.memory_space<smem>>
    %323 = vector.broadcast %322 : f32 to vector<3x128xf32>
    %324 = arith.mulf %323, %20 : vector<3x128xf32>
    %325 = arith.addf %321, %324 : vector<3x128xf32>
    %c33 = arith.constant 33 : index
    %326 = memref.load %arg3[%c33] : memref<96xf32, #tpu.memory_space<smem>>
    %327 = vector.broadcast %326 : f32 to vector<3x128xf32>
    %328 = arith.mulf %327, %23 : vector<3x128xf32>
    %329 = arith.addf %325, %328 : vector<3x128xf32>
    %c34 = arith.constant 34 : index
    %330 = memref.load %arg3[%c34] : memref<96xf32, #tpu.memory_space<smem>>
    %331 = vector.broadcast %330 : f32 to vector<3x128xf32>
    %332 = arith.mulf %331, %9 : vector<3x128xf32>
    %333 = arith.addf %329, %332 : vector<3x128xf32>
    %c35 = arith.constant 35 : index
    %334 = memref.load %arg3[%c35] : memref<96xf32, #tpu.memory_space<smem>>
    %335 = vector.broadcast %334 : f32 to vector<3x128xf32>
    %336 = arith.mulf %335, %26 : vector<3x128xf32>
    %337 = arith.addf %333, %336 : vector<3x128xf32>
    %c5_78 = arith.constant 5 : index
    %338 = memref.load %arg4[%c5_78] : memref<16xf32, #tpu.memory_space<smem>>
    %339 = vector.broadcast %338 : f32 to vector<3x128xf32>
    %340 = arith.addf %337, %339 : vector<3x128xf32>
    %cst_79 = arith.constant 0.000000e+00 : f32
    %341 = vector.broadcast %cst_79 : f32 to vector<3x128xf32>
    %342 = arith.maximumf %340, %341 : vector<3x128xf32>
    %c1_i32_80 = arith.constant 1 : i32
    %343 = tpu.dynamic_rotate %342 by %c1_i32_80 dim 1 : vector<3x128xf32>, i32 -> vector<3x128xf32>
    %cst_81 = arith.constant 0.000000e+00 : f32
    %344 = vector.broadcast %cst_81 : f32 to vector<3x128xf32>
    %345 = arith.select %12, %343, %344 : vector<3x128xi1>, vector<3x128xf32>
    %c15_82 = arith.constant 15 : index
    %346 = memref.load %arg5[%c15_82] : memref<48xf32, #tpu.memory_space<smem>>
    %347 = vector.broadcast %346 : f32 to vector<3x128xf32>
    %348 = arith.mulf %347, %345 : vector<3x128xf32>
    %c15_83 = arith.constant 15 : index
    %349 = memref.load %arg7[%c15_83] : memref<48xf32, #tpu.memory_space<smem>>
    %350 = vector.broadcast %349 : f32 to vector<3x128xf32>
    %351 = arith.mulf %350, %345 : vector<3x128xf32>
    %352 = arith.addf %313, %348 : vector<3x128xf32>
    %353 = arith.addf %314, %351 : vector<3x128xf32>
    %c16_84 = arith.constant 16 : index
    %354 = memref.load %arg5[%c16_84] : memref<48xf32, #tpu.memory_space<smem>>
    %355 = vector.broadcast %354 : f32 to vector<3x128xf32>
    %356 = arith.mulf %355, %342 : vector<3x128xf32>
    %c16_85 = arith.constant 16 : index
    %357 = memref.load %arg7[%c16_85] : memref<48xf32, #tpu.memory_space<smem>>
    %358 = vector.broadcast %357 : f32 to vector<3x128xf32>
    %359 = arith.mulf %358, %342 : vector<3x128xf32>
    %360 = arith.addf %352, %356 : vector<3x128xf32>
    %361 = arith.addf %353, %359 : vector<3x128xf32>
    %c127_i32_86 = arith.constant 127 : i32
    %362 = tpu.dynamic_rotate %342 by %c127_i32_86 dim 1 : vector<3x128xf32>, i32 -> vector<3x128xf32>
    %cst_87 = arith.constant 0.000000e+00 : f32
    %363 = vector.broadcast %cst_87 : f32 to vector<3x128xf32>
    %364 = arith.select %14, %362, %363 : vector<3x128xi1>, vector<3x128xf32>
    %c17_88 = arith.constant 17 : index
    %365 = memref.load %arg5[%c17_88] : memref<48xf32, #tpu.memory_space<smem>>
    %366 = vector.broadcast %365 : f32 to vector<3x128xf32>
    %367 = arith.mulf %366, %364 : vector<3x128xf32>
    %c17_89 = arith.constant 17 : index
    %368 = memref.load %arg7[%c17_89] : memref<48xf32, #tpu.memory_space<smem>>
    %369 = vector.broadcast %368 : f32 to vector<3x128xf32>
    %370 = arith.mulf %369, %364 : vector<3x128xf32>
    %371 = arith.addf %360, %367 : vector<3x128xf32>
    %372 = arith.addf %361, %370 : vector<3x128xf32>
    %c36 = arith.constant 36 : index
    %373 = memref.load %arg3[%c36] : memref<96xf32, #tpu.memory_space<smem>>
    %374 = vector.broadcast %373 : f32 to vector<3x128xf32>
    %375 = arith.mulf %374, %17 : vector<3x128xf32>
    %c37 = arith.constant 37 : index
    %376 = memref.load %arg3[%c37] : memref<96xf32, #tpu.memory_space<smem>>
    %377 = vector.broadcast %376 : f32 to vector<3x128xf32>
    %378 = arith.mulf %377, %4 : vector<3x128xf32>
    %379 = arith.addf %375, %378 : vector<3x128xf32>
    %c38 = arith.constant 38 : index
    %380 = memref.load %arg3[%c38] : memref<96xf32, #tpu.memory_space<smem>>
    %381 = vector.broadcast %380 : f32 to vector<3x128xf32>
    %382 = arith.mulf %381, %20 : vector<3x128xf32>
    %383 = arith.addf %379, %382 : vector<3x128xf32>
    %c39 = arith.constant 39 : index
    %384 = memref.load %arg3[%c39] : memref<96xf32, #tpu.memory_space<smem>>
    %385 = vector.broadcast %384 : f32 to vector<3x128xf32>
    %386 = arith.mulf %385, %23 : vector<3x128xf32>
    %387 = arith.addf %383, %386 : vector<3x128xf32>
    %c40 = arith.constant 40 : index
    %388 = memref.load %arg3[%c40] : memref<96xf32, #tpu.memory_space<smem>>
    %389 = vector.broadcast %388 : f32 to vector<3x128xf32>
    %390 = arith.mulf %389, %9 : vector<3x128xf32>
    %391 = arith.addf %387, %390 : vector<3x128xf32>
    %c41 = arith.constant 41 : index
    %392 = memref.load %arg3[%c41] : memref<96xf32, #tpu.memory_space<smem>>
    %393 = vector.broadcast %392 : f32 to vector<3x128xf32>
    %394 = arith.mulf %393, %26 : vector<3x128xf32>
    %395 = arith.addf %391, %394 : vector<3x128xf32>
    %c6_90 = arith.constant 6 : index
    %396 = memref.load %arg4[%c6_90] : memref<16xf32, #tpu.memory_space<smem>>
    %397 = vector.broadcast %396 : f32 to vector<3x128xf32>
    %398 = arith.addf %395, %397 : vector<3x128xf32>
    %cst_91 = arith.constant 0.000000e+00 : f32
    %399 = vector.broadcast %cst_91 : f32 to vector<3x128xf32>
    %400 = arith.maximumf %398, %399 : vector<3x128xf32>
    %c1_i32_92 = arith.constant 1 : i32
    %401 = tpu.dynamic_rotate %400 by %c1_i32_92 dim 1 : vector<3x128xf32>, i32 -> vector<3x128xf32>
    %cst_93 = arith.constant 0.000000e+00 : f32
    %402 = vector.broadcast %cst_93 : f32 to vector<3x128xf32>
    %403 = arith.select %12, %401, %402 : vector<3x128xi1>, vector<3x128xf32>
    %c18_94 = arith.constant 18 : index
    %404 = memref.load %arg5[%c18_94] : memref<48xf32, #tpu.memory_space<smem>>
    %405 = vector.broadcast %404 : f32 to vector<3x128xf32>
    %406 = arith.mulf %405, %403 : vector<3x128xf32>
    %c18_95 = arith.constant 18 : index
    %407 = memref.load %arg7[%c18_95] : memref<48xf32, #tpu.memory_space<smem>>
    %408 = vector.broadcast %407 : f32 to vector<3x128xf32>
    %409 = arith.mulf %408, %403 : vector<3x128xf32>
    %410 = arith.addf %371, %406 : vector<3x128xf32>
    %411 = arith.addf %372, %409 : vector<3x128xf32>
    %c19_96 = arith.constant 19 : index
    %412 = memref.load %arg5[%c19_96] : memref<48xf32, #tpu.memory_space<smem>>
    %413 = vector.broadcast %412 : f32 to vector<3x128xf32>
    %414 = arith.mulf %413, %400 : vector<3x128xf32>
    %c19_97 = arith.constant 19 : index
    %415 = memref.load %arg7[%c19_97] : memref<48xf32, #tpu.memory_space<smem>>
    %416 = vector.broadcast %415 : f32 to vector<3x128xf32>
    %417 = arith.mulf %416, %400 : vector<3x128xf32>
    %418 = arith.addf %410, %414 : vector<3x128xf32>
    %419 = arith.addf %411, %417 : vector<3x128xf32>
    %c127_i32_98 = arith.constant 127 : i32
    %420 = tpu.dynamic_rotate %400 by %c127_i32_98 dim 1 : vector<3x128xf32>, i32 -> vector<3x128xf32>
    %cst_99 = arith.constant 0.000000e+00 : f32
    %421 = vector.broadcast %cst_99 : f32 to vector<3x128xf32>
    %422 = arith.select %14, %420, %421 : vector<3x128xi1>, vector<3x128xf32>
    %c20_100 = arith.constant 20 : index
    %423 = memref.load %arg5[%c20_100] : memref<48xf32, #tpu.memory_space<smem>>
    %424 = vector.broadcast %423 : f32 to vector<3x128xf32>
    %425 = arith.mulf %424, %422 : vector<3x128xf32>
    %c20_101 = arith.constant 20 : index
    %426 = memref.load %arg7[%c20_101] : memref<48xf32, #tpu.memory_space<smem>>
    %427 = vector.broadcast %426 : f32 to vector<3x128xf32>
    %428 = arith.mulf %427, %422 : vector<3x128xf32>
    %429 = arith.addf %418, %425 : vector<3x128xf32>
    %430 = arith.addf %419, %428 : vector<3x128xf32>
    %c42 = arith.constant 42 : index
    %431 = memref.load %arg3[%c42] : memref<96xf32, #tpu.memory_space<smem>>
    %432 = vector.broadcast %431 : f32 to vector<3x128xf32>
    %433 = arith.mulf %432, %17 : vector<3x128xf32>
    %c43 = arith.constant 43 : index
    %434 = memref.load %arg3[%c43] : memref<96xf32, #tpu.memory_space<smem>>
    %435 = vector.broadcast %434 : f32 to vector<3x128xf32>
    %436 = arith.mulf %435, %4 : vector<3x128xf32>
    %437 = arith.addf %433, %436 : vector<3x128xf32>
    %c44 = arith.constant 44 : index
    %438 = memref.load %arg3[%c44] : memref<96xf32, #tpu.memory_space<smem>>
    %439 = vector.broadcast %438 : f32 to vector<3x128xf32>
    %440 = arith.mulf %439, %20 : vector<3x128xf32>
    %441 = arith.addf %437, %440 : vector<3x128xf32>
    %c45 = arith.constant 45 : index
    %442 = memref.load %arg3[%c45] : memref<96xf32, #tpu.memory_space<smem>>
    %443 = vector.broadcast %442 : f32 to vector<3x128xf32>
    %444 = arith.mulf %443, %23 : vector<3x128xf32>
    %445 = arith.addf %441, %444 : vector<3x128xf32>
    %c46 = arith.constant 46 : index
    %446 = memref.load %arg3[%c46] : memref<96xf32, #tpu.memory_space<smem>>
    %447 = vector.broadcast %446 : f32 to vector<3x128xf32>
    %448 = arith.mulf %447, %9 : vector<3x128xf32>
    %449 = arith.addf %445, %448 : vector<3x128xf32>
    %c47 = arith.constant 47 : index
    %450 = memref.load %arg3[%c47] : memref<96xf32, #tpu.memory_space<smem>>
    %451 = vector.broadcast %450 : f32 to vector<3x128xf32>
    %452 = arith.mulf %451, %26 : vector<3x128xf32>
    %453 = arith.addf %449, %452 : vector<3x128xf32>
    %c7_102 = arith.constant 7 : index
    %454 = memref.load %arg4[%c7_102] : memref<16xf32, #tpu.memory_space<smem>>
    %455 = vector.broadcast %454 : f32 to vector<3x128xf32>
    %456 = arith.addf %453, %455 : vector<3x128xf32>
    %cst_103 = arith.constant 0.000000e+00 : f32
    %457 = vector.broadcast %cst_103 : f32 to vector<3x128xf32>
    %458 = arith.maximumf %456, %457 : vector<3x128xf32>
    %c1_i32_104 = arith.constant 1 : i32
    %459 = tpu.dynamic_rotate %458 by %c1_i32_104 dim 1 : vector<3x128xf32>, i32 -> vector<3x128xf32>
    %cst_105 = arith.constant 0.000000e+00 : f32
    %460 = vector.broadcast %cst_105 : f32 to vector<3x128xf32>
    %461 = arith.select %12, %459, %460 : vector<3x128xi1>, vector<3x128xf32>
    %c21_106 = arith.constant 21 : index
    %462 = memref.load %arg5[%c21_106] : memref<48xf32, #tpu.memory_space<smem>>
    %463 = vector.broadcast %462 : f32 to vector<3x128xf32>
    %464 = arith.mulf %463, %461 : vector<3x128xf32>
    %c21_107 = arith.constant 21 : index
    %465 = memref.load %arg7[%c21_107] : memref<48xf32, #tpu.memory_space<smem>>
    %466 = vector.broadcast %465 : f32 to vector<3x128xf32>
    %467 = arith.mulf %466, %461 : vector<3x128xf32>
    %468 = arith.addf %429, %464 : vector<3x128xf32>
    %469 = arith.addf %430, %467 : vector<3x128xf32>
    %c22_108 = arith.constant 22 : index
    %470 = memref.load %arg5[%c22_108] : memref<48xf32, #tpu.memory_space<smem>>
    %471 = vector.broadcast %470 : f32 to vector<3x128xf32>
    %472 = arith.mulf %471, %458 : vector<3x128xf32>
    %c22_109 = arith.constant 22 : index
    %473 = memref.load %arg7[%c22_109] : memref<48xf32, #tpu.memory_space<smem>>
    %474 = vector.broadcast %473 : f32 to vector<3x128xf32>
    %475 = arith.mulf %474, %458 : vector<3x128xf32>
    %476 = arith.addf %468, %472 : vector<3x128xf32>
    %477 = arith.addf %469, %475 : vector<3x128xf32>
    %c127_i32_110 = arith.constant 127 : i32
    %478 = tpu.dynamic_rotate %458 by %c127_i32_110 dim 1 : vector<3x128xf32>, i32 -> vector<3x128xf32>
    %cst_111 = arith.constant 0.000000e+00 : f32
    %479 = vector.broadcast %cst_111 : f32 to vector<3x128xf32>
    %480 = arith.select %14, %478, %479 : vector<3x128xi1>, vector<3x128xf32>
    %c23_112 = arith.constant 23 : index
    %481 = memref.load %arg5[%c23_112] : memref<48xf32, #tpu.memory_space<smem>>
    %482 = vector.broadcast %481 : f32 to vector<3x128xf32>
    %483 = arith.mulf %482, %480 : vector<3x128xf32>
    %c23_113 = arith.constant 23 : index
    %484 = memref.load %arg7[%c23_113] : memref<48xf32, #tpu.memory_space<smem>>
    %485 = vector.broadcast %484 : f32 to vector<3x128xf32>
    %486 = arith.mulf %485, %480 : vector<3x128xf32>
    %487 = arith.addf %476, %483 : vector<3x128xf32>
    %488 = arith.addf %477, %486 : vector<3x128xf32>
    %c48 = arith.constant 48 : index
    %489 = memref.load %arg3[%c48] : memref<96xf32, #tpu.memory_space<smem>>
    %490 = vector.broadcast %489 : f32 to vector<3x128xf32>
    %491 = arith.mulf %490, %17 : vector<3x128xf32>
    %c49 = arith.constant 49 : index
    %492 = memref.load %arg3[%c49] : memref<96xf32, #tpu.memory_space<smem>>
    %493 = vector.broadcast %492 : f32 to vector<3x128xf32>
    %494 = arith.mulf %493, %4 : vector<3x128xf32>
    %495 = arith.addf %491, %494 : vector<3x128xf32>
    %c50 = arith.constant 50 : index
    %496 = memref.load %arg3[%c50] : memref<96xf32, #tpu.memory_space<smem>>
    %497 = vector.broadcast %496 : f32 to vector<3x128xf32>
    %498 = arith.mulf %497, %20 : vector<3x128xf32>
    %499 = arith.addf %495, %498 : vector<3x128xf32>
    %c51 = arith.constant 51 : index
    %500 = memref.load %arg3[%c51] : memref<96xf32, #tpu.memory_space<smem>>
    %501 = vector.broadcast %500 : f32 to vector<3x128xf32>
    %502 = arith.mulf %501, %23 : vector<3x128xf32>
    %503 = arith.addf %499, %502 : vector<3x128xf32>
    %c52 = arith.constant 52 : index
    %504 = memref.load %arg3[%c52] : memref<96xf32, #tpu.memory_space<smem>>
    %505 = vector.broadcast %504 : f32 to vector<3x128xf32>
    %506 = arith.mulf %505, %9 : vector<3x128xf32>
    %507 = arith.addf %503, %506 : vector<3x128xf32>
    %c53 = arith.constant 53 : index
    %508 = memref.load %arg3[%c53] : memref<96xf32, #tpu.memory_space<smem>>
    %509 = vector.broadcast %508 : f32 to vector<3x128xf32>
    %510 = arith.mulf %509, %26 : vector<3x128xf32>
    %511 = arith.addf %507, %510 : vector<3x128xf32>
    %c8_114 = arith.constant 8 : index
    %512 = memref.load %arg4[%c8_114] : memref<16xf32, #tpu.memory_space<smem>>
    %513 = vector.broadcast %512 : f32 to vector<3x128xf32>
    %514 = arith.addf %511, %513 : vector<3x128xf32>
    %cst_115 = arith.constant 0.000000e+00 : f32
    %515 = vector.broadcast %cst_115 : f32 to vector<3x128xf32>
    %516 = arith.maximumf %514, %515 : vector<3x128xf32>
    %c1_i32_116 = arith.constant 1 : i32
    %517 = tpu.dynamic_rotate %516 by %c1_i32_116 dim 1 : vector<3x128xf32>, i32 -> vector<3x128xf32>
    %cst_117 = arith.constant 0.000000e+00 : f32
    %518 = vector.broadcast %cst_117 : f32 to vector<3x128xf32>
    %519 = arith.select %12, %517, %518 : vector<3x128xi1>, vector<3x128xf32>
    %c24_118 = arith.constant 24 : index
    %520 = memref.load %arg5[%c24_118] : memref<48xf32, #tpu.memory_space<smem>>
    %521 = vector.broadcast %520 : f32 to vector<3x128xf32>
    %522 = arith.mulf %521, %519 : vector<3x128xf32>
    %c24_119 = arith.constant 24 : index
    %523 = memref.load %arg7[%c24_119] : memref<48xf32, #tpu.memory_space<smem>>
    %524 = vector.broadcast %523 : f32 to vector<3x128xf32>
    %525 = arith.mulf %524, %519 : vector<3x128xf32>
    %526 = arith.addf %487, %522 : vector<3x128xf32>
    %527 = arith.addf %488, %525 : vector<3x128xf32>
    %c25_120 = arith.constant 25 : index
    %528 = memref.load %arg5[%c25_120] : memref<48xf32, #tpu.memory_space<smem>>
    %529 = vector.broadcast %528 : f32 to vector<3x128xf32>
    %530 = arith.mulf %529, %516 : vector<3x128xf32>
    %c25_121 = arith.constant 25 : index
    %531 = memref.load %arg7[%c25_121] : memref<48xf32, #tpu.memory_space<smem>>
    %532 = vector.broadcast %531 : f32 to vector<3x128xf32>
    %533 = arith.mulf %532, %516 : vector<3x128xf32>
    %534 = arith.addf %526, %530 : vector<3x128xf32>
    %535 = arith.addf %527, %533 : vector<3x128xf32>
    %c127_i32_122 = arith.constant 127 : i32
    %536 = tpu.dynamic_rotate %516 by %c127_i32_122 dim 1 : vector<3x128xf32>, i32 -> vector<3x128xf32>
    %cst_123 = arith.constant 0.000000e+00 : f32
    %537 = vector.broadcast %cst_123 : f32 to vector<3x128xf32>
    %538 = arith.select %14, %536, %537 : vector<3x128xi1>, vector<3x128xf32>
    %c26_124 = arith.constant 26 : index
    %539 = memref.load %arg5[%c26_124] : memref<48xf32, #tpu.memory_space<smem>>
    %540 = vector.broadcast %539 : f32 to vector<3x128xf32>
    %541 = arith.mulf %540, %538 : vector<3x128xf32>
    %c26_125 = arith.constant 26 : index
    %542 = memref.load %arg7[%c26_125] : memref<48xf32, #tpu.memory_space<smem>>
    %543 = vector.broadcast %542 : f32 to vector<3x128xf32>
    %544 = arith.mulf %543, %538 : vector<3x128xf32>
    %545 = arith.addf %534, %541 : vector<3x128xf32>
    %546 = arith.addf %535, %544 : vector<3x128xf32>
    %c54 = arith.constant 54 : index
    %547 = memref.load %arg3[%c54] : memref<96xf32, #tpu.memory_space<smem>>
    %548 = vector.broadcast %547 : f32 to vector<3x128xf32>
    %549 = arith.mulf %548, %17 : vector<3x128xf32>
    %c55 = arith.constant 55 : index
    %550 = memref.load %arg3[%c55] : memref<96xf32, #tpu.memory_space<smem>>
    %551 = vector.broadcast %550 : f32 to vector<3x128xf32>
    %552 = arith.mulf %551, %4 : vector<3x128xf32>
    %553 = arith.addf %549, %552 : vector<3x128xf32>
    %c56 = arith.constant 56 : index
    %554 = memref.load %arg3[%c56] : memref<96xf32, #tpu.memory_space<smem>>
    %555 = vector.broadcast %554 : f32 to vector<3x128xf32>
    %556 = arith.mulf %555, %20 : vector<3x128xf32>
    %557 = arith.addf %553, %556 : vector<3x128xf32>
    %c57 = arith.constant 57 : index
    %558 = memref.load %arg3[%c57] : memref<96xf32, #tpu.memory_space<smem>>
    %559 = vector.broadcast %558 : f32 to vector<3x128xf32>
    %560 = arith.mulf %559, %23 : vector<3x128xf32>
    %561 = arith.addf %557, %560 : vector<3x128xf32>
    %c58 = arith.constant 58 : index
    %562 = memref.load %arg3[%c58] : memref<96xf32, #tpu.memory_space<smem>>
    %563 = vector.broadcast %562 : f32 to vector<3x128xf32>
    %564 = arith.mulf %563, %9 : vector<3x128xf32>
    %565 = arith.addf %561, %564 : vector<3x128xf32>
    %c59 = arith.constant 59 : index
    %566 = memref.load %arg3[%c59] : memref<96xf32, #tpu.memory_space<smem>>
    %567 = vector.broadcast %566 : f32 to vector<3x128xf32>
    %568 = arith.mulf %567, %26 : vector<3x128xf32>
    %569 = arith.addf %565, %568 : vector<3x128xf32>
    %c9_126 = arith.constant 9 : index
    %570 = memref.load %arg4[%c9_126] : memref<16xf32, #tpu.memory_space<smem>>
    %571 = vector.broadcast %570 : f32 to vector<3x128xf32>
    %572 = arith.addf %569, %571 : vector<3x128xf32>
    %cst_127 = arith.constant 0.000000e+00 : f32
    %573 = vector.broadcast %cst_127 : f32 to vector<3x128xf32>
    %574 = arith.maximumf %572, %573 : vector<3x128xf32>
    %c1_i32_128 = arith.constant 1 : i32
    %575 = tpu.dynamic_rotate %574 by %c1_i32_128 dim 1 : vector<3x128xf32>, i32 -> vector<3x128xf32>
    %cst_129 = arith.constant 0.000000e+00 : f32
    %576 = vector.broadcast %cst_129 : f32 to vector<3x128xf32>
    %577 = arith.select %12, %575, %576 : vector<3x128xi1>, vector<3x128xf32>
    %c27_130 = arith.constant 27 : index
    %578 = memref.load %arg5[%c27_130] : memref<48xf32, #tpu.memory_space<smem>>
    %579 = vector.broadcast %578 : f32 to vector<3x128xf32>
    %580 = arith.mulf %579, %577 : vector<3x128xf32>
    %c27_131 = arith.constant 27 : index
    %581 = memref.load %arg7[%c27_131] : memref<48xf32, #tpu.memory_space<smem>>
    %582 = vector.broadcast %581 : f32 to vector<3x128xf32>
    %583 = arith.mulf %582, %577 : vector<3x128xf32>
    %584 = arith.addf %545, %580 : vector<3x128xf32>
    %585 = arith.addf %546, %583 : vector<3x128xf32>
    %c28_132 = arith.constant 28 : index
    %586 = memref.load %arg5[%c28_132] : memref<48xf32, #tpu.memory_space<smem>>
    %587 = vector.broadcast %586 : f32 to vector<3x128xf32>
    %588 = arith.mulf %587, %574 : vector<3x128xf32>
    %c28_133 = arith.constant 28 : index
    %589 = memref.load %arg7[%c28_133] : memref<48xf32, #tpu.memory_space<smem>>
    %590 = vector.broadcast %589 : f32 to vector<3x128xf32>
    %591 = arith.mulf %590, %574 : vector<3x128xf32>
    %592 = arith.addf %584, %588 : vector<3x128xf32>
    %593 = arith.addf %585, %591 : vector<3x128xf32>
    %c127_i32_134 = arith.constant 127 : i32
    %594 = tpu.dynamic_rotate %574 by %c127_i32_134 dim 1 : vector<3x128xf32>, i32 -> vector<3x128xf32>
    %cst_135 = arith.constant 0.000000e+00 : f32
    %595 = vector.broadcast %cst_135 : f32 to vector<3x128xf32>
    %596 = arith.select %14, %594, %595 : vector<3x128xi1>, vector<3x128xf32>
    %c29_136 = arith.constant 29 : index
    %597 = memref.load %arg5[%c29_136] : memref<48xf32, #tpu.memory_space<smem>>
    %598 = vector.broadcast %597 : f32 to vector<3x128xf32>
    %599 = arith.mulf %598, %596 : vector<3x128xf32>
    %c29_137 = arith.constant 29 : index
    %600 = memref.load %arg7[%c29_137] : memref<48xf32, #tpu.memory_space<smem>>
    %601 = vector.broadcast %600 : f32 to vector<3x128xf32>
    %602 = arith.mulf %601, %596 : vector<3x128xf32>
    %603 = arith.addf %592, %599 : vector<3x128xf32>
    %604 = arith.addf %593, %602 : vector<3x128xf32>
    %c60 = arith.constant 60 : index
    %605 = memref.load %arg3[%c60] : memref<96xf32, #tpu.memory_space<smem>>
    %606 = vector.broadcast %605 : f32 to vector<3x128xf32>
    %607 = arith.mulf %606, %17 : vector<3x128xf32>
    %c61 = arith.constant 61 : index
    %608 = memref.load %arg3[%c61] : memref<96xf32, #tpu.memory_space<smem>>
    %609 = vector.broadcast %608 : f32 to vector<3x128xf32>
    %610 = arith.mulf %609, %4 : vector<3x128xf32>
    %611 = arith.addf %607, %610 : vector<3x128xf32>
    %c62 = arith.constant 62 : index
    %612 = memref.load %arg3[%c62] : memref<96xf32, #tpu.memory_space<smem>>
    %613 = vector.broadcast %612 : f32 to vector<3x128xf32>
    %614 = arith.mulf %613, %20 : vector<3x128xf32>
    %615 = arith.addf %611, %614 : vector<3x128xf32>
    %c63 = arith.constant 63 : index
    %616 = memref.load %arg3[%c63] : memref<96xf32, #tpu.memory_space<smem>>
    %617 = vector.broadcast %616 : f32 to vector<3x128xf32>
    %618 = arith.mulf %617, %23 : vector<3x128xf32>
    %619 = arith.addf %615, %618 : vector<3x128xf32>
    %c64 = arith.constant 64 : index
    %620 = memref.load %arg3[%c64] : memref<96xf32, #tpu.memory_space<smem>>
    %621 = vector.broadcast %620 : f32 to vector<3x128xf32>
    %622 = arith.mulf %621, %9 : vector<3x128xf32>
    %623 = arith.addf %619, %622 : vector<3x128xf32>
    %c65 = arith.constant 65 : index
    %624 = memref.load %arg3[%c65] : memref<96xf32, #tpu.memory_space<smem>>
    %625 = vector.broadcast %624 : f32 to vector<3x128xf32>
    %626 = arith.mulf %625, %26 : vector<3x128xf32>
    %627 = arith.addf %623, %626 : vector<3x128xf32>
    %c10_138 = arith.constant 10 : index
    %628 = memref.load %arg4[%c10_138] : memref<16xf32, #tpu.memory_space<smem>>
    %629 = vector.broadcast %628 : f32 to vector<3x128xf32>
    %630 = arith.addf %627, %629 : vector<3x128xf32>
    %cst_139 = arith.constant 0.000000e+00 : f32
    %631 = vector.broadcast %cst_139 : f32 to vector<3x128xf32>
    %632 = arith.maximumf %630, %631 : vector<3x128xf32>
    %c1_i32_140 = arith.constant 1 : i32
    %633 = tpu.dynamic_rotate %632 by %c1_i32_140 dim 1 : vector<3x128xf32>, i32 -> vector<3x128xf32>
    %cst_141 = arith.constant 0.000000e+00 : f32
    %634 = vector.broadcast %cst_141 : f32 to vector<3x128xf32>
    %635 = arith.select %12, %633, %634 : vector<3x128xi1>, vector<3x128xf32>
    %c30_142 = arith.constant 30 : index
    %636 = memref.load %arg5[%c30_142] : memref<48xf32, #tpu.memory_space<smem>>
    %637 = vector.broadcast %636 : f32 to vector<3x128xf32>
    %638 = arith.mulf %637, %635 : vector<3x128xf32>
    %c30_143 = arith.constant 30 : index
    %639 = memref.load %arg7[%c30_143] : memref<48xf32, #tpu.memory_space<smem>>
    %640 = vector.broadcast %639 : f32 to vector<3x128xf32>
    %641 = arith.mulf %640, %635 : vector<3x128xf32>
    %642 = arith.addf %603, %638 : vector<3x128xf32>
    %643 = arith.addf %604, %641 : vector<3x128xf32>
    %c31_144 = arith.constant 31 : index
    %644 = memref.load %arg5[%c31_144] : memref<48xf32, #tpu.memory_space<smem>>
    %645 = vector.broadcast %644 : f32 to vector<3x128xf32>
    %646 = arith.mulf %645, %632 : vector<3x128xf32>
    %c31_145 = arith.constant 31 : index
    %647 = memref.load %arg7[%c31_145] : memref<48xf32, #tpu.memory_space<smem>>
    %648 = vector.broadcast %647 : f32 to vector<3x128xf32>
    %649 = arith.mulf %648, %632 : vector<3x128xf32>
    %650 = arith.addf %642, %646 : vector<3x128xf32>
    %651 = arith.addf %643, %649 : vector<3x128xf32>
    %c127_i32_146 = arith.constant 127 : i32
    %652 = tpu.dynamic_rotate %632 by %c127_i32_146 dim 1 : vector<3x128xf32>, i32 -> vector<3x128xf32>
    %cst_147 = arith.constant 0.000000e+00 : f32
    %653 = vector.broadcast %cst_147 : f32 to vector<3x128xf32>
    %654 = arith.select %14, %652, %653 : vector<3x128xi1>, vector<3x128xf32>
    %c32_148 = arith.constant 32 : index
    %655 = memref.load %arg5[%c32_148] : memref<48xf32, #tpu.memory_space<smem>>
    %656 = vector.broadcast %655 : f32 to vector<3x128xf32>
    %657 = arith.mulf %656, %654 : vector<3x128xf32>
    %c32_149 = arith.constant 32 : index
    %658 = memref.load %arg7[%c32_149] : memref<48xf32, #tpu.memory_space<smem>>
    %659 = vector.broadcast %658 : f32 to vector<3x128xf32>
    %660 = arith.mulf %659, %654 : vector<3x128xf32>
    %661 = arith.addf %650, %657 : vector<3x128xf32>
    %662 = arith.addf %651, %660 : vector<3x128xf32>
    %c66 = arith.constant 66 : index
    %663 = memref.load %arg3[%c66] : memref<96xf32, #tpu.memory_space<smem>>
    %664 = vector.broadcast %663 : f32 to vector<3x128xf32>
    %665 = arith.mulf %664, %17 : vector<3x128xf32>
    %c67 = arith.constant 67 : index
    %666 = memref.load %arg3[%c67] : memref<96xf32, #tpu.memory_space<smem>>
    %667 = vector.broadcast %666 : f32 to vector<3x128xf32>
    %668 = arith.mulf %667, %4 : vector<3x128xf32>
    %669 = arith.addf %665, %668 : vector<3x128xf32>
    %c68 = arith.constant 68 : index
    %670 = memref.load %arg3[%c68] : memref<96xf32, #tpu.memory_space<smem>>
    %671 = vector.broadcast %670 : f32 to vector<3x128xf32>
    %672 = arith.mulf %671, %20 : vector<3x128xf32>
    %673 = arith.addf %669, %672 : vector<3x128xf32>
    %c69 = arith.constant 69 : index
    %674 = memref.load %arg3[%c69] : memref<96xf32, #tpu.memory_space<smem>>
    %675 = vector.broadcast %674 : f32 to vector<3x128xf32>
    %676 = arith.mulf %675, %23 : vector<3x128xf32>
    %677 = arith.addf %673, %676 : vector<3x128xf32>
    %c70 = arith.constant 70 : index
    %678 = memref.load %arg3[%c70] : memref<96xf32, #tpu.memory_space<smem>>
    %679 = vector.broadcast %678 : f32 to vector<3x128xf32>
    %680 = arith.mulf %679, %9 : vector<3x128xf32>
    %681 = arith.addf %677, %680 : vector<3x128xf32>
    %c71 = arith.constant 71 : index
    %682 = memref.load %arg3[%c71] : memref<96xf32, #tpu.memory_space<smem>>
    %683 = vector.broadcast %682 : f32 to vector<3x128xf32>
    %684 = arith.mulf %683, %26 : vector<3x128xf32>
    %685 = arith.addf %681, %684 : vector<3x128xf32>
    %c11_150 = arith.constant 11 : index
    %686 = memref.load %arg4[%c11_150] : memref<16xf32, #tpu.memory_space<smem>>
    %687 = vector.broadcast %686 : f32 to vector<3x128xf32>
    %688 = arith.addf %685, %687 : vector<3x128xf32>
    %cst_151 = arith.constant 0.000000e+00 : f32
    %689 = vector.broadcast %cst_151 : f32 to vector<3x128xf32>
    %690 = arith.maximumf %688, %689 : vector<3x128xf32>
    %c1_i32_152 = arith.constant 1 : i32
    %691 = tpu.dynamic_rotate %690 by %c1_i32_152 dim 1 : vector<3x128xf32>, i32 -> vector<3x128xf32>
    %cst_153 = arith.constant 0.000000e+00 : f32
    %692 = vector.broadcast %cst_153 : f32 to vector<3x128xf32>
    %693 = arith.select %12, %691, %692 : vector<3x128xi1>, vector<3x128xf32>
    %c33_154 = arith.constant 33 : index
    %694 = memref.load %arg5[%c33_154] : memref<48xf32, #tpu.memory_space<smem>>
    %695 = vector.broadcast %694 : f32 to vector<3x128xf32>
    %696 = arith.mulf %695, %693 : vector<3x128xf32>
    %c33_155 = arith.constant 33 : index
    %697 = memref.load %arg7[%c33_155] : memref<48xf32, #tpu.memory_space<smem>>
    %698 = vector.broadcast %697 : f32 to vector<3x128xf32>
    %699 = arith.mulf %698, %693 : vector<3x128xf32>
    %700 = arith.addf %661, %696 : vector<3x128xf32>
    %701 = arith.addf %662, %699 : vector<3x128xf32>
    %c34_156 = arith.constant 34 : index
    %702 = memref.load %arg5[%c34_156] : memref<48xf32, #tpu.memory_space<smem>>
    %703 = vector.broadcast %702 : f32 to vector<3x128xf32>
    %704 = arith.mulf %703, %690 : vector<3x128xf32>
    %c34_157 = arith.constant 34 : index
    %705 = memref.load %arg7[%c34_157] : memref<48xf32, #tpu.memory_space<smem>>
    %706 = vector.broadcast %705 : f32 to vector<3x128xf32>
    %707 = arith.mulf %706, %690 : vector<3x128xf32>
    %708 = arith.addf %700, %704 : vector<3x128xf32>
    %709 = arith.addf %701, %707 : vector<3x128xf32>
    %c127_i32_158 = arith.constant 127 : i32
    %710 = tpu.dynamic_rotate %690 by %c127_i32_158 dim 1 : vector<3x128xf32>, i32 -> vector<3x128xf32>
    %cst_159 = arith.constant 0.000000e+00 : f32
    %711 = vector.broadcast %cst_159 : f32 to vector<3x128xf32>
    %712 = arith.select %14, %710, %711 : vector<3x128xi1>, vector<3x128xf32>
    %c35_160 = arith.constant 35 : index
    %713 = memref.load %arg5[%c35_160] : memref<48xf32, #tpu.memory_space<smem>>
    %714 = vector.broadcast %713 : f32 to vector<3x128xf32>
    %715 = arith.mulf %714, %712 : vector<3x128xf32>
    %c35_161 = arith.constant 35 : index
    %716 = memref.load %arg7[%c35_161] : memref<48xf32, #tpu.memory_space<smem>>
    %717 = vector.broadcast %716 : f32 to vector<3x128xf32>
    %718 = arith.mulf %717, %712 : vector<3x128xf32>
    %719 = arith.addf %708, %715 : vector<3x128xf32>
    %720 = arith.addf %709, %718 : vector<3x128xf32>
    %c72 = arith.constant 72 : index
    %721 = memref.load %arg3[%c72] : memref<96xf32, #tpu.memory_space<smem>>
    %722 = vector.broadcast %721 : f32 to vector<3x128xf32>
    %723 = arith.mulf %722, %17 : vector<3x128xf32>
    %c73 = arith.constant 73 : index
    %724 = memref.load %arg3[%c73] : memref<96xf32, #tpu.memory_space<smem>>
    %725 = vector.broadcast %724 : f32 to vector<3x128xf32>
    %726 = arith.mulf %725, %4 : vector<3x128xf32>
    %727 = arith.addf %723, %726 : vector<3x128xf32>
    %c74 = arith.constant 74 : index
    %728 = memref.load %arg3[%c74] : memref<96xf32, #tpu.memory_space<smem>>
    %729 = vector.broadcast %728 : f32 to vector<3x128xf32>
    %730 = arith.mulf %729, %20 : vector<3x128xf32>
    %731 = arith.addf %727, %730 : vector<3x128xf32>
    %c75 = arith.constant 75 : index
    %732 = memref.load %arg3[%c75] : memref<96xf32, #tpu.memory_space<smem>>
    %733 = vector.broadcast %732 : f32 to vector<3x128xf32>
    %734 = arith.mulf %733, %23 : vector<3x128xf32>
    %735 = arith.addf %731, %734 : vector<3x128xf32>
    %c76 = arith.constant 76 : index
    %736 = memref.load %arg3[%c76] : memref<96xf32, #tpu.memory_space<smem>>
    %737 = vector.broadcast %736 : f32 to vector<3x128xf32>
    %738 = arith.mulf %737, %9 : vector<3x128xf32>
    %739 = arith.addf %735, %738 : vector<3x128xf32>
    %c77 = arith.constant 77 : index
    %740 = memref.load %arg3[%c77] : memref<96xf32, #tpu.memory_space<smem>>
    %741 = vector.broadcast %740 : f32 to vector<3x128xf32>
    %742 = arith.mulf %741, %26 : vector<3x128xf32>
    %743 = arith.addf %739, %742 : vector<3x128xf32>
    %c12_162 = arith.constant 12 : index
    %744 = memref.load %arg4[%c12_162] : memref<16xf32, #tpu.memory_space<smem>>
    %745 = vector.broadcast %744 : f32 to vector<3x128xf32>
    %746 = arith.addf %743, %745 : vector<3x128xf32>
    %cst_163 = arith.constant 0.000000e+00 : f32
    %747 = vector.broadcast %cst_163 : f32 to vector<3x128xf32>
    %748 = arith.maximumf %746, %747 : vector<3x128xf32>
    %c1_i32_164 = arith.constant 1 : i32
    %749 = tpu.dynamic_rotate %748 by %c1_i32_164 dim 1 : vector<3x128xf32>, i32 -> vector<3x128xf32>
    %cst_165 = arith.constant 0.000000e+00 : f32
    %750 = vector.broadcast %cst_165 : f32 to vector<3x128xf32>
    %751 = arith.select %12, %749, %750 : vector<3x128xi1>, vector<3x128xf32>
    %c36_166 = arith.constant 36 : index
    %752 = memref.load %arg5[%c36_166] : memref<48xf32, #tpu.memory_space<smem>>
    %753 = vector.broadcast %752 : f32 to vector<3x128xf32>
    %754 = arith.mulf %753, %751 : vector<3x128xf32>
    %c36_167 = arith.constant 36 : index
    %755 = memref.load %arg7[%c36_167] : memref<48xf32, #tpu.memory_space<smem>>
    %756 = vector.broadcast %755 : f32 to vector<3x128xf32>
    %757 = arith.mulf %756, %751 : vector<3x128xf32>
    %758 = arith.addf %719, %754 : vector<3x128xf32>
    %759 = arith.addf %720, %757 : vector<3x128xf32>
    %c37_168 = arith.constant 37 : index
    %760 = memref.load %arg5[%c37_168] : memref<48xf32, #tpu.memory_space<smem>>
    %761 = vector.broadcast %760 : f32 to vector<3x128xf32>
    %762 = arith.mulf %761, %748 : vector<3x128xf32>
    %c37_169 = arith.constant 37 : index
    %763 = memref.load %arg7[%c37_169] : memref<48xf32, #tpu.memory_space<smem>>
    %764 = vector.broadcast %763 : f32 to vector<3x128xf32>
    %765 = arith.mulf %764, %748 : vector<3x128xf32>
    %766 = arith.addf %758, %762 : vector<3x128xf32>
    %767 = arith.addf %759, %765 : vector<3x128xf32>
    %c127_i32_170 = arith.constant 127 : i32
    %768 = tpu.dynamic_rotate %748 by %c127_i32_170 dim 1 : vector<3x128xf32>, i32 -> vector<3x128xf32>
    %cst_171 = arith.constant 0.000000e+00 : f32
    %769 = vector.broadcast %cst_171 : f32 to vector<3x128xf32>
    %770 = arith.select %14, %768, %769 : vector<3x128xi1>, vector<3x128xf32>
    %c38_172 = arith.constant 38 : index
    %771 = memref.load %arg5[%c38_172] : memref<48xf32, #tpu.memory_space<smem>>
    %772 = vector.broadcast %771 : f32 to vector<3x128xf32>
    %773 = arith.mulf %772, %770 : vector<3x128xf32>
    %c38_173 = arith.constant 38 : index
    %774 = memref.load %arg7[%c38_173] : memref<48xf32, #tpu.memory_space<smem>>
    %775 = vector.broadcast %774 : f32 to vector<3x128xf32>
    %776 = arith.mulf %775, %770 : vector<3x128xf32>
    %777 = arith.addf %766, %773 : vector<3x128xf32>
    %778 = arith.addf %767, %776 : vector<3x128xf32>
    %c78 = arith.constant 78 : index
    %779 = memref.load %arg3[%c78] : memref<96xf32, #tpu.memory_space<smem>>
    %780 = vector.broadcast %779 : f32 to vector<3x128xf32>
    %781 = arith.mulf %780, %17 : vector<3x128xf32>
    %c79 = arith.constant 79 : index
    %782 = memref.load %arg3[%c79] : memref<96xf32, #tpu.memory_space<smem>>
    %783 = vector.broadcast %782 : f32 to vector<3x128xf32>
    %784 = arith.mulf %783, %4 : vector<3x128xf32>
    %785 = arith.addf %781, %784 : vector<3x128xf32>
    %c80 = arith.constant 80 : index
    %786 = memref.load %arg3[%c80] : memref<96xf32, #tpu.memory_space<smem>>
    %787 = vector.broadcast %786 : f32 to vector<3x128xf32>
    %788 = arith.mulf %787, %20 : vector<3x128xf32>
    %789 = arith.addf %785, %788 : vector<3x128xf32>
    %c81 = arith.constant 81 : index
    %790 = memref.load %arg3[%c81] : memref<96xf32, #tpu.memory_space<smem>>
    %791 = vector.broadcast %790 : f32 to vector<3x128xf32>
    %792 = arith.mulf %791, %23 : vector<3x128xf32>
    %793 = arith.addf %789, %792 : vector<3x128xf32>
    %c82 = arith.constant 82 : index
    %794 = memref.load %arg3[%c82] : memref<96xf32, #tpu.memory_space<smem>>
    %795 = vector.broadcast %794 : f32 to vector<3x128xf32>
    %796 = arith.mulf %795, %9 : vector<3x128xf32>
    %797 = arith.addf %793, %796 : vector<3x128xf32>
    %c83 = arith.constant 83 : index
    %798 = memref.load %arg3[%c83] : memref<96xf32, #tpu.memory_space<smem>>
    %799 = vector.broadcast %798 : f32 to vector<3x128xf32>
    %800 = arith.mulf %799, %26 : vector<3x128xf32>
    %801 = arith.addf %797, %800 : vector<3x128xf32>
    %c13_174 = arith.constant 13 : index
    %802 = memref.load %arg4[%c13_174] : memref<16xf32, #tpu.memory_space<smem>>
    %803 = vector.broadcast %802 : f32 to vector<3x128xf32>
    %804 = arith.addf %801, %803 : vector<3x128xf32>
    %cst_175 = arith.constant 0.000000e+00 : f32
    %805 = vector.broadcast %cst_175 : f32 to vector<3x128xf32>
    %806 = arith.maximumf %804, %805 : vector<3x128xf32>
    %c1_i32_176 = arith.constant 1 : i32
    %807 = tpu.dynamic_rotate %806 by %c1_i32_176 dim 1 : vector<3x128xf32>, i32 -> vector<3x128xf32>
    %cst_177 = arith.constant 0.000000e+00 : f32
    %808 = vector.broadcast %cst_177 : f32 to vector<3x128xf32>
    %809 = arith.select %12, %807, %808 : vector<3x128xi1>, vector<3x128xf32>
    %c39_178 = arith.constant 39 : index
    %810 = memref.load %arg5[%c39_178] : memref<48xf32, #tpu.memory_space<smem>>
    %811 = vector.broadcast %810 : f32 to vector<3x128xf32>
    %812 = arith.mulf %811, %809 : vector<3x128xf32>
    %c39_179 = arith.constant 39 : index
    %813 = memref.load %arg7[%c39_179] : memref<48xf32, #tpu.memory_space<smem>>
    %814 = vector.broadcast %813 : f32 to vector<3x128xf32>
    %815 = arith.mulf %814, %809 : vector<3x128xf32>
    %816 = arith.addf %777, %812 : vector<3x128xf32>
    %817 = arith.addf %778, %815 : vector<3x128xf32>
    %c40_180 = arith.constant 40 : index
    %818 = memref.load %arg5[%c40_180] : memref<48xf32, #tpu.memory_space<smem>>
    %819 = vector.broadcast %818 : f32 to vector<3x128xf32>
    %820 = arith.mulf %819, %806 : vector<3x128xf32>
    %c40_181 = arith.constant 40 : index
    %821 = memref.load %arg7[%c40_181] : memref<48xf32, #tpu.memory_space<smem>>
    %822 = vector.broadcast %821 : f32 to vector<3x128xf32>
    %823 = arith.mulf %822, %806 : vector<3x128xf32>
    %824 = arith.addf %816, %820 : vector<3x128xf32>
    %825 = arith.addf %817, %823 : vector<3x128xf32>
    %c127_i32_182 = arith.constant 127 : i32
    %826 = tpu.dynamic_rotate %806 by %c127_i32_182 dim 1 : vector<3x128xf32>, i32 -> vector<3x128xf32>
    %cst_183 = arith.constant 0.000000e+00 : f32
    %827 = vector.broadcast %cst_183 : f32 to vector<3x128xf32>
    %828 = arith.select %14, %826, %827 : vector<3x128xi1>, vector<3x128xf32>
    %c41_184 = arith.constant 41 : index
    %829 = memref.load %arg5[%c41_184] : memref<48xf32, #tpu.memory_space<smem>>
    %830 = vector.broadcast %829 : f32 to vector<3x128xf32>
    %831 = arith.mulf %830, %828 : vector<3x128xf32>
    %c41_185 = arith.constant 41 : index
    %832 = memref.load %arg7[%c41_185] : memref<48xf32, #tpu.memory_space<smem>>
    %833 = vector.broadcast %832 : f32 to vector<3x128xf32>
    %834 = arith.mulf %833, %828 : vector<3x128xf32>
    %835 = arith.addf %824, %831 : vector<3x128xf32>
    %836 = arith.addf %825, %834 : vector<3x128xf32>
    %c84 = arith.constant 84 : index
    %837 = memref.load %arg3[%c84] : memref<96xf32, #tpu.memory_space<smem>>
    %838 = vector.broadcast %837 : f32 to vector<3x128xf32>
    %839 = arith.mulf %838, %17 : vector<3x128xf32>
    %c85 = arith.constant 85 : index
    %840 = memref.load %arg3[%c85] : memref<96xf32, #tpu.memory_space<smem>>
    %841 = vector.broadcast %840 : f32 to vector<3x128xf32>
    %842 = arith.mulf %841, %4 : vector<3x128xf32>
    %843 = arith.addf %839, %842 : vector<3x128xf32>
    %c86 = arith.constant 86 : index
    %844 = memref.load %arg3[%c86] : memref<96xf32, #tpu.memory_space<smem>>
    %845 = vector.broadcast %844 : f32 to vector<3x128xf32>
    %846 = arith.mulf %845, %20 : vector<3x128xf32>
    %847 = arith.addf %843, %846 : vector<3x128xf32>
    %c87 = arith.constant 87 : index
    %848 = memref.load %arg3[%c87] : memref<96xf32, #tpu.memory_space<smem>>
    %849 = vector.broadcast %848 : f32 to vector<3x128xf32>
    %850 = arith.mulf %849, %23 : vector<3x128xf32>
    %851 = arith.addf %847, %850 : vector<3x128xf32>
    %c88 = arith.constant 88 : index
    %852 = memref.load %arg3[%c88] : memref<96xf32, #tpu.memory_space<smem>>
    %853 = vector.broadcast %852 : f32 to vector<3x128xf32>
    %854 = arith.mulf %853, %9 : vector<3x128xf32>
    %855 = arith.addf %851, %854 : vector<3x128xf32>
    %c89 = arith.constant 89 : index
    %856 = memref.load %arg3[%c89] : memref<96xf32, #tpu.memory_space<smem>>
    %857 = vector.broadcast %856 : f32 to vector<3x128xf32>
    %858 = arith.mulf %857, %26 : vector<3x128xf32>
    %859 = arith.addf %855, %858 : vector<3x128xf32>
    %c14_186 = arith.constant 14 : index
    %860 = memref.load %arg4[%c14_186] : memref<16xf32, #tpu.memory_space<smem>>
    %861 = vector.broadcast %860 : f32 to vector<3x128xf32>
    %862 = arith.addf %859, %861 : vector<3x128xf32>
    %cst_187 = arith.constant 0.000000e+00 : f32
    %863 = vector.broadcast %cst_187 : f32 to vector<3x128xf32>
    %864 = arith.maximumf %862, %863 : vector<3x128xf32>
    %c1_i32_188 = arith.constant 1 : i32
    %865 = tpu.dynamic_rotate %864 by %c1_i32_188 dim 1 : vector<3x128xf32>, i32 -> vector<3x128xf32>
    %cst_189 = arith.constant 0.000000e+00 : f32
    %866 = vector.broadcast %cst_189 : f32 to vector<3x128xf32>
    %867 = arith.select %12, %865, %866 : vector<3x128xi1>, vector<3x128xf32>
    %c42_190 = arith.constant 42 : index
    %868 = memref.load %arg5[%c42_190] : memref<48xf32, #tpu.memory_space<smem>>
    %869 = vector.broadcast %868 : f32 to vector<3x128xf32>
    %870 = arith.mulf %869, %867 : vector<3x128xf32>
    %c42_191 = arith.constant 42 : index
    %871 = memref.load %arg7[%c42_191] : memref<48xf32, #tpu.memory_space<smem>>
    %872 = vector.broadcast %871 : f32 to vector<3x128xf32>
    %873 = arith.mulf %872, %867 : vector<3x128xf32>
    %874 = arith.addf %835, %870 : vector<3x128xf32>
    %875 = arith.addf %836, %873 : vector<3x128xf32>
    %c43_192 = arith.constant 43 : index
    %876 = memref.load %arg5[%c43_192] : memref<48xf32, #tpu.memory_space<smem>>
    %877 = vector.broadcast %876 : f32 to vector<3x128xf32>
    %878 = arith.mulf %877, %864 : vector<3x128xf32>
    %c43_193 = arith.constant 43 : index
    %879 = memref.load %arg7[%c43_193] : memref<48xf32, #tpu.memory_space<smem>>
    %880 = vector.broadcast %879 : f32 to vector<3x128xf32>
    %881 = arith.mulf %880, %864 : vector<3x128xf32>
    %882 = arith.addf %874, %878 : vector<3x128xf32>
    %883 = arith.addf %875, %881 : vector<3x128xf32>
    %c127_i32_194 = arith.constant 127 : i32
    %884 = tpu.dynamic_rotate %864 by %c127_i32_194 dim 1 : vector<3x128xf32>, i32 -> vector<3x128xf32>
    %cst_195 = arith.constant 0.000000e+00 : f32
    %885 = vector.broadcast %cst_195 : f32 to vector<3x128xf32>
    %886 = arith.select %14, %884, %885 : vector<3x128xi1>, vector<3x128xf32>
    %c44_196 = arith.constant 44 : index
    %887 = memref.load %arg5[%c44_196] : memref<48xf32, #tpu.memory_space<smem>>
    %888 = vector.broadcast %887 : f32 to vector<3x128xf32>
    %889 = arith.mulf %888, %886 : vector<3x128xf32>
    %c44_197 = arith.constant 44 : index
    %890 = memref.load %arg7[%c44_197] : memref<48xf32, #tpu.memory_space<smem>>
    %891 = vector.broadcast %890 : f32 to vector<3x128xf32>
    %892 = arith.mulf %891, %886 : vector<3x128xf32>
    %893 = arith.addf %882, %889 : vector<3x128xf32>
    %894 = arith.addf %883, %892 : vector<3x128xf32>
    %c90 = arith.constant 90 : index
    %895 = memref.load %arg3[%c90] : memref<96xf32, #tpu.memory_space<smem>>
    %896 = vector.broadcast %895 : f32 to vector<3x128xf32>
    %897 = arith.mulf %896, %17 : vector<3x128xf32>
    %c91 = arith.constant 91 : index
    %898 = memref.load %arg3[%c91] : memref<96xf32, #tpu.memory_space<smem>>
    %899 = vector.broadcast %898 : f32 to vector<3x128xf32>
    %900 = arith.mulf %899, %4 : vector<3x128xf32>
    %901 = arith.addf %897, %900 : vector<3x128xf32>
    %c92 = arith.constant 92 : index
    %902 = memref.load %arg3[%c92] : memref<96xf32, #tpu.memory_space<smem>>
    %903 = vector.broadcast %902 : f32 to vector<3x128xf32>
    %904 = arith.mulf %903, %20 : vector<3x128xf32>
    %905 = arith.addf %901, %904 : vector<3x128xf32>
    %c93 = arith.constant 93 : index
    %906 = memref.load %arg3[%c93] : memref<96xf32, #tpu.memory_space<smem>>
    %907 = vector.broadcast %906 : f32 to vector<3x128xf32>
    %908 = arith.mulf %907, %23 : vector<3x128xf32>
    %909 = arith.addf %905, %908 : vector<3x128xf32>
    %c94 = arith.constant 94 : index
    %910 = memref.load %arg3[%c94] : memref<96xf32, #tpu.memory_space<smem>>
    %911 = vector.broadcast %910 : f32 to vector<3x128xf32>
    %912 = arith.mulf %911, %9 : vector<3x128xf32>
    %913 = arith.addf %909, %912 : vector<3x128xf32>
    %c95 = arith.constant 95 : index
    %914 = memref.load %arg3[%c95] : memref<96xf32, #tpu.memory_space<smem>>
    %915 = vector.broadcast %914 : f32 to vector<3x128xf32>
    %916 = arith.mulf %915, %26 : vector<3x128xf32>
    %917 = arith.addf %913, %916 : vector<3x128xf32>
    %c15_198 = arith.constant 15 : index
    %918 = memref.load %arg4[%c15_198] : memref<16xf32, #tpu.memory_space<smem>>
    %919 = vector.broadcast %918 : f32 to vector<3x128xf32>
    %920 = arith.addf %917, %919 : vector<3x128xf32>
    %cst_199 = arith.constant 0.000000e+00 : f32
    %921 = vector.broadcast %cst_199 : f32 to vector<3x128xf32>
    %922 = arith.maximumf %920, %921 : vector<3x128xf32>
    %c1_i32_200 = arith.constant 1 : i32
    %923 = tpu.dynamic_rotate %922 by %c1_i32_200 dim 1 : vector<3x128xf32>, i32 -> vector<3x128xf32>
    %cst_201 = arith.constant 0.000000e+00 : f32
    %924 = vector.broadcast %cst_201 : f32 to vector<3x128xf32>
    %925 = arith.select %12, %923, %924 : vector<3x128xi1>, vector<3x128xf32>
    %c45_202 = arith.constant 45 : index
    %926 = memref.load %arg5[%c45_202] : memref<48xf32, #tpu.memory_space<smem>>
    %927 = vector.broadcast %926 : f32 to vector<3x128xf32>
    %928 = arith.mulf %927, %925 : vector<3x128xf32>
    %c45_203 = arith.constant 45 : index
    %929 = memref.load %arg7[%c45_203] : memref<48xf32, #tpu.memory_space<smem>>
    %930 = vector.broadcast %929 : f32 to vector<3x128xf32>
    %931 = arith.mulf %930, %925 : vector<3x128xf32>
    %932 = arith.addf %893, %928 : vector<3x128xf32>
    %933 = arith.addf %894, %931 : vector<3x128xf32>
    %c46_204 = arith.constant 46 : index
    %934 = memref.load %arg5[%c46_204] : memref<48xf32, #tpu.memory_space<smem>>
    %935 = vector.broadcast %934 : f32 to vector<3x128xf32>
    %936 = arith.mulf %935, %922 : vector<3x128xf32>
    %c46_205 = arith.constant 46 : index
    %937 = memref.load %arg7[%c46_205] : memref<48xf32, #tpu.memory_space<smem>>
    %938 = vector.broadcast %937 : f32 to vector<3x128xf32>
    %939 = arith.mulf %938, %922 : vector<3x128xf32>
    %940 = arith.addf %932, %936 : vector<3x128xf32>
    %941 = arith.addf %933, %939 : vector<3x128xf32>
    %c127_i32_206 = arith.constant 127 : i32
    %942 = tpu.dynamic_rotate %922 by %c127_i32_206 dim 1 : vector<3x128xf32>, i32 -> vector<3x128xf32>
    %cst_207 = arith.constant 0.000000e+00 : f32
    %943 = vector.broadcast %cst_207 : f32 to vector<3x128xf32>
    %944 = arith.select %14, %942, %943 : vector<3x128xi1>, vector<3x128xf32>
    %c47_208 = arith.constant 47 : index
    %945 = memref.load %arg5[%c47_208] : memref<48xf32, #tpu.memory_space<smem>>
    %946 = vector.broadcast %945 : f32 to vector<3x128xf32>
    %947 = arith.mulf %946, %944 : vector<3x128xf32>
    %c47_209 = arith.constant 47 : index
    %948 = memref.load %arg7[%c47_209] : memref<48xf32, #tpu.memory_space<smem>>
    %949 = vector.broadcast %948 : f32 to vector<3x128xf32>
    %950 = arith.mulf %949, %944 : vector<3x128xf32>
    %951 = arith.addf %940, %947 : vector<3x128xf32>
    %952 = arith.addf %941, %950 : vector<3x128xf32>
    %c0_210 = arith.constant 0 : index
    %953 = memref.load %arg6[%c0_210] : memref<1xf32, #tpu.memory_space<smem>>
    %954 = vector.broadcast %953 : f32 to vector<3x128xf32>
    %955 = arith.addf %951, %954 : vector<3x128xf32>
    %956 = arith.negf %955 : vector<3x128xf32>
    %957 = math.exp %956 : vector<3x128xf32>
    %cst_211 = arith.constant 1.000000e+00 : f32
    %958 = vector.broadcast %cst_211 : f32 to vector<3x128xf32>
    %959 = arith.addf %958, %957 : vector<3x128xf32>
    %960 = arith.divf %958, %959 : vector<3x128xf32>
    %c0_212 = arith.constant 0 : index
    %961 = memref.load %arg8[%c0_212] : memref<1xf32, #tpu.memory_space<smem>>
    %962 = vector.broadcast %961 : f32 to vector<3x128xf32>
    %963 = arith.addf %952, %962 : vector<3x128xf32>
    %964 = arith.negf %963 : vector<3x128xf32>
    %965 = math.exp %964 : vector<3x128xf32>
    %cst_213 = arith.constant 1.000000e+00 : f32
    %966 = vector.broadcast %cst_213 : f32 to vector<3x128xf32>
    %967 = arith.addf %966, %965 : vector<3x128xf32>
    %968 = arith.divf %966, %967 : vector<3x128xf32>
    %969 = vector.shape_cast %960 : vector<3x128xf32> to vector<1x3x128xf32>
    %c0_214 = arith.constant 0 : index
    %c0_215 = arith.constant 0 : index
    %c0_216 = arith.constant 0 : index
    %c0_217 = arith.constant 0 : index
    %970 = vector.load %arg11[%c0_214, %c0_215, %c0_216, %c0_217] : memref<1x1x3x128xf32, #tpu.memory_space<vmem>>, vector<1x1x3x128xf32>
    %971 = vector.shape_cast %970 : vector<1x1x3x128xf32> to vector<1x3x128xf32>
    %972 = vector.shape_cast %969 : vector<1x3x128xf32> to vector<1x1x3x128xf32>
    tpu.vector_store %arg11[%c0_214, %c0_215, %c0_216, %c0_217], %972 {strides = array<i32>} : memref<1x1x3x128xf32, #tpu.memory_space<vmem>>, vector<1x1x3x128xf32>,
    %973 = vector.shape_cast %968 : vector<3x128xf32> to vector<1x3x128xf32>
    %c0_218 = arith.constant 0 : index
    %c0_219 = arith.constant 0 : index
    %c0_220 = arith.constant 0 : index
    %c0_221 = arith.constant 0 : index
    %974 = vector.load %arg12[%c0_218, %c0_219, %c0_220, %c0_221] : memref<1x1x3x128xf32, #tpu.memory_space<vmem>>, vector<1x1x3x128xf32>
    %975 = vector.shape_cast %974 : vector<1x1x3x128xf32> to vector<1x3x128xf32>
    %976 = vector.shape_cast %973 : vector<1x3x128xf32> to vector<1x1x3x128xf32>
    tpu.vector_store %arg12[%c0_218, %c0_219, %c0_220, %c0_221], %976 {strides = array<i32>} : memref<1x1x3x128xf32, #tpu.memory_space<vmem>>, vector<1x1x3x128xf32>,
    %c0_222 = arith.constant 0 : index
    %c0_223 = arith.constant 0 : index
    %c0_224 = arith.constant 0 : index
    %c0_225 = arith.constant 0 : index
    %977 = vector.load %arg1[%c0_222, %c0_223, %c0_224, %c0_225] : memref<1x64x3x128xf32, #tpu.memory_space<vmem>>, vector<1x64x3x128xf32>
    %978 = vector.shape_cast %977 : vector<1x64x3x128xf32> to vector<64x3x128xf32>
    %cst_226 = arith.constant 1.000000e+00 : f32
    %979 = vector.broadcast %cst_226 : f32 to vector<3x128xf32>
    %980 = arith.addf %979, %960 : vector<3x128xf32>
    %981 = vector.shape_cast %980 : vector<3x128xf32> to vector<1x3x128xf32>
    %982 = vector.broadcast %981 : vector<1x3x128xf32> to vector<64x3x128xf32>
    %983 = arith.mulf %978, %982 : vector<64x3x128xf32>
    %c0_227 = arith.constant 0 : index
    %c0_228 = arith.constant 0 : index
    %c0_229 = arith.constant 0 : index
    %c0_230 = arith.constant 0 : index
    %984 = vector.load %arg9[%c0_227, %c0_228, %c0_229, %c0_230] : memref<1x64x3x128xf32, #tpu.memory_space<vmem>>, vector<1x64x3x128xf32>
    %985 = vector.shape_cast %984 : vector<1x64x3x128xf32> to vector<64x3x128xf32>
    %986 = vector.shape_cast %983 : vector<64x3x128xf32> to vector<1x64x3x128xf32>
    tpu.vector_store %arg9[%c0_227, %c0_228, %c0_229, %c0_230], %986 {strides = array<i32>} : memref<1x64x3x128xf32, #tpu.memory_space<vmem>>, vector<1x64x3x128xf32>,
    %c0_231 = arith.constant 0 : index
    %c0_232 = arith.constant 0 : index
    %c0_233 = arith.constant 0 : index
    %c0_234 = arith.constant 0 : index
    %987 = vector.load %arg2[%c0_231, %c0_232, %c0_233, %c0_234] : memref<1x64x3x128xf32, #tpu.memory_space<vmem>>, vector<1x64x3x128xf32>
    %988 = vector.shape_cast %987 : vector<1x64x3x128xf32> to vector<64x3x128xf32>
    %cst_235 = arith.constant 1.000000e+00 : f32
    %989 = vector.broadcast %cst_235 : f32 to vector<3x128xf32>
    %990 = arith.addf %989, %968 : vector<3x128xf32>
    %991 = vector.shape_cast %990 : vector<3x128xf32> to vector<1x3x128xf32>
    %992 = vector.broadcast %991 : vector<1x3x128xf32> to vector<64x3x128xf32>
    %993 = arith.mulf %988, %992 : vector<64x3x128xf32>
    %c0_236 = arith.constant 0 : index
    %c0_237 = arith.constant 0 : index
    %c0_238 = arith.constant 0 : index
    %c0_239 = arith.constant 0 : index
    %994 = vector.load %arg10[%c0_236, %c0_237, %c0_238, %c0_239] : memref<1x64x3x128xf32, #tpu.memory_space<vmem>>, vector<1x64x3x128xf32>
    %995 = vector.shape_cast %994 : vector<1x64x3x128xf32> to vector<64x3x128xf32>
    %996 = vector.shape_cast %993 : vector<64x3x128xf32> to vector<1x64x3x128xf32>
    tpu.vector_store %arg10[%c0_236, %c0_237, %c0_238, %c0_239], %996 {strides = array<i32>} : memref<1x64x3x128xf32, #tpu.memory_space<vmem>>, vector<1x64x3x128xf32>,
    return
  }
  func.func @transform_0(%arg0: i32) -> (i32, i32, i32, i32) {
    %c0_i32 = arith.constant 0 : i32
    %c0_i32_0 = arith.constant 0 : i32
    %c0_i32_1 = arith.constant 0 : i32
    %c0_i32_2 = arith.constant 0 : i32
    return %arg0, %c0_i32, %c0_i32_0, %c0_i32_1 : i32, i32, i32, i32
  }
  func.func @transform_1(%arg0: i32) -> (i32, i32, i32, i32) {
    %c0_i32 = arith.constant 0 : i32
    %c0_i32_0 = arith.constant 0 : i32
    %c0_i32_1 = arith.constant 0 : i32
    %c0_i32_2 = arith.constant 0 : i32
    return %arg0, %c0_i32, %c0_i32_0, %c0_i32_1 : i32, i32, i32, i32
  }
  func.func @transform_2(%arg0: i32) -> i32 {
    %c0_i32 = arith.constant 0 : i32
    %c0_i32_0 = arith.constant 0 : i32
    return %c0_i32 : i32
  }
  func.func @transform_3(%arg0: i32) -> i32 {
    %c0_i32 = arith.constant 0 : i32
    %c0_i32_0 = arith.constant 0 : i32
    return %c0_i32 : i32
  }
  func.func @transform_4(%arg0: i32) -> i32 {
    %c0_i32 = arith.constant 0 : i32
    %c0_i32_0 = arith.constant 0 : i32
    return %c0_i32 : i32
  }
  func.func @transform_5(%arg0: i32) -> i32 {
    %c0_i32 = arith.constant 0 : i32
    %c0_i32_0 = arith.constant 0 : i32
    return %c0_i32 : i32
  }
  func.func @transform_6(%arg0: i32) -> i32 {
    %c0_i32 = arith.constant 0 : i32
    %c0_i32_0 = arith.constant 0 : i32
    return %c0_i32 : i32
  }
  func.func @transform_7(%arg0: i32) -> i32 {
    %c0_i32 = arith.constant 0 : i32
    %c0_i32_0 = arith.constant 0 : i32
    return %c0_i32 : i32
  }
  func.func @transform_8(%arg0: i32) -> (i32, i32, i32, i32) {
    %c0_i32 = arith.constant 0 : i32
    %c0_i32_0 = arith.constant 0 : i32
    %c0_i32_1 = arith.constant 0 : i32
    %c0_i32_2 = arith.constant 0 : i32
    return %arg0, %c0_i32, %c0_i32_0, %c0_i32_1 : i32, i32, i32, i32
  }
  func.func @transform_9(%arg0: i32) -> (i32, i32, i32, i32) {
    %c0_i32 = arith.constant 0 : i32
    %c0_i32_0 = arith.constant 0 : i32
    %c0_i32_1 = arith.constant 0 : i32
    %c0_i32_2 = arith.constant 0 : i32
    return %arg0, %c0_i32, %c0_i32_0, %c0_i32_1 : i32, i32, i32, i32
  }
  func.func @transform_10(%arg0: i32) -> (i32, i32, i32, i32) {
    %c0_i32 = arith.constant 0 : i32
    %c0_i32_0 = arith.constant 0 : i32
    %c0_i32_1 = arith.constant 0 : i32
    %c0_i32_2 = arith.constant 0 : i32
    return %arg0, %c0_i32, %c0_i32_0, %c0_i32_1 : i32, i32, i32, i32
  }
  func.func @transform_11(%arg0: i32) -> (i32, i32, i32, i32) {
    %c0_i32 = arith.constant 0 : i32
    %c0_i32_0 = arith.constant 0 : i32
    %c0_i32_1 = arith.constant 0 : i32
    %c0_i32_2 = arith.constant 0 : i32
    return %arg0, %c0_i32, %c0_i32_0, %c0_i32_1 : i32, i32, i32, i32
  }
}

</mosaic_0001>

<bundles_post_ra>
// kernel: tpu_custom_call.1
= control target key start
LH: loop header
LB: loop body
LE: loop exit
PB: predicated region body
PF: predicated region fallthrough
CT: control target
= control target key end

     0   :  { %s4922_s0 = inlined_call_operand.vmem [shape: f32[2,64,3,128], index: 0, kind: input, shape index: {}]   ;;  %s4923_s1 = inlined_call_operand.vmem [shape: f32[2,64,3,128], index: 1, kind: input, shape index: {}]   ;;  %s4924_s2 = inlined_call_operand.vmem [shape: f32[96], index: 2, kind: input, shape index: {}]   ;;  %s4925_s3 = inlined_call_operand.vmem [shape: f32[16], index: 3, kind: input, shape index: {}]   ;;  %s4926_s4 = inlined_call_operand.vmem [shape: f32[48], index: 4, kind: input, shape index: {}]   ;;  %s4927_s5 = inlined_call_operand.<no memory space> [shape: f32[1], index: 5, kind: input, shape index: {}]   ;;  %s4928_s6 = inlined_call_operand.vmem [shape: f32[48], index: 6, kind: input, shape index: {}]   ;;  %s4929_s7 = inlined_call_operand.<no memory space> [shape: f32[1], index: 7, kind: input, shape index: {}]   ;;  %s4930_s8 = inlined_call_operand.vmem [shape: f32[2,64,3,128], index: 8, kind: output, shape index: {0}]   ;;  %s4931_s9 = inlined_call_operand.vmem [shape: f32[2,64,3,128], index: 9, kind: output, shape index: {1}]   ;;  %s4932_s10 = inlined_call_operand.vmem [shape: f32[2,1,3,128], index: 10, kind: output, shape index: {2}]   ;;  %s4933_s11 = inlined_call_operand.vmem [shape: f32[2,1,3,128], index: 11, kind: output, shape index: {3}]  }
   0x1   :  { %4974 = sst [smem:[#allocation44_spill]] %s4922_s0 }
   0x2   :  { %4975 = sst [smem:[#allocation45_spill]] %s4923_s1 }
   0x3   :  { %4976 = sst [smem:[#allocation46_spill]] %s4924_s2 }
   0x4   :  { %4977 = sst [smem:[#allocation47_spill]] %s4925_s3 }
   0x5   :  { %4978 = sst [smem:[#allocation48_spill]] %s4926_s4 }
   0x6   :  { %4979 = sst [smem:[#allocation49_spill]] %s4928_s6 }
   0x7   :  { %4980 = sst [smem:[#allocation50_spill]] %s4930_s8 }
   0x8   :  { %4981 = sst [smem:[#allocation51_spill]] %s4931_s9 }
   0x9   :  { %4982 = sst [smem:[#allocation52_spill]] %s4932_s10 }
   0xa   :  { %4983 = sst [smem:[#allocation53_spill]] %s4933_s11 }
   0xb   :  { %17 = sst [smem:[#allocation2]] %s4927_s5 }
   0xc   :  { %18 = sst [smem:[#allocation3]] %s4929_s7 }
   0xd   :  { %19 = vsyncpa [#allocation5], 0 }
   0xe   :  { %20 = vsyncpa [#allocation7], 0 }
   0xf   :  { %21 = vsyncpa [#allocation10], 0  ;;  %s2861_s21 = smov 0  }
  0x10 LB: > { %4984 = sst [smem:[#allocation14_spill]] %s2787_s21  ;;  %s4985_s3 = sld [smem:[#allocation47_spill]]  ;;  %s2787_s21 = sphi %s2861_s21, %s27_s21  }
  0x11   : > { %s2870_s24 = sadd.s32 4294967295, %s2787_s21   ;;  %p2417_p0 = scmp.ge.s32.totalorder %s2787_s21, 1 }
  0x12   : > { %p314_p1 = scmp.lt.s32.totalorder %s2787_s21, 3  ;;  %p2679_p2 = scmp.eq.s32.totalorder %s2870_s24, 0 }
  0x13   : > { %s4987_s2 = sld [smem:[#allocation46_spill]]  ;;  %s4988_s4 = sld [smem:[#allocation48_spill]] }
  0x14   : > { %p2875_p3 = pnand %p2417_p0, %p314_p1  ;;  %s4990_s6 = sld [smem:[#allocation49_spill]] }
  0x16   : > { %s338_s5 = sshll.u32 %s4985_s3, 4  ;;  %p2666_p4 = pneg %p2875_p3  ;;  %s339_s5 = int_to_ptr.vmem [resolvable:$true] %s338_s5 }
  0x17   : > { %s2709_s16 = scalar_lea.vmem %s339_s5, 16  ;;  %p2717_p10 = scmp.lt.s32.totalorder %s339_s5, %s339_s5 }
  0x18   : > { %p2893_p5 = pnand %p2679_p2, %p2666_p4  ;;  %p2710_p6 = scmp.ne.s32.totalorder %s339_s5, %s2709_s16 }
  0x19   : > { %s327_s27 = sshll.u32 %s4987_s2, 4  ;;  %s349_s30 = sshll.u32 %s4988_s4, 4  ;;  %s2882_s27 = int_to_ptr.vmem [resolvable:$true] %s327_s27  ;;  %s2889_s30 = int_to_ptr.vmem [resolvable:$true] %s349_s30 }
  0x1a   : > { %s363_s15 = sshll.u32 %s4990_s6, 4  ;;  %p2711_p7 = pneg %p2893_p5  ;;  %s2900_s15 = int_to_ptr.vmem [resolvable:$true] %s363_s15 }
  0x1b   : > { %p2718_p11 = scmp.lt.s32.totalorder %s2709_s16, %s2709_s16 }
  0x1c   : > { %p2712_p8 = pnand %p2711_p7, %p2710_p6 }
  0x1d   : > { %p2719_p12 = por %p2718_p11, %p2717_p10 }
  0x1e   : > { %p2713_p9 = pneg %p2712_p8 }
  0x20   : > { %p2720_p13 = pnand %p2719_p12, %p2713_p9 }
  0x22   : > { %2723 = shalt.err (!%p2720_p13)
}
  0x23   : > { %s2789_s17 = smov [#allocation6]   ;;  %s2724_s18 = scalar_lea.vmem %s2882_s27, 16 }
  0x24   : > { %2672 = dma.vmem_to_smem (!%p2893_p5), %s339_s5, 16, %s2789_s17, [#allocation7]  }
  0x25   : > { %p2725_p0 = scmp.ne.s32.totalorder %s2882_s27, %s2724_s18  ;;  %p2732_p6 = scmp.lt.s32.totalorder %s2882_s27, %s2882_s27 }
  0x26   : > { %p2733_p8 = scmp.lt.s32.totalorder %s2724_s18, %s2724_s18 }
  0x27   : > { %p2727_p1 = pnand %p2725_p0, %p2711_p7 }
  0x28   : > { %p2734_p10 = por %p2733_p8, %p2732_p6 }
  0x29   : > { %p2728_p4 = pneg %p2727_p1 }
  0x2b   : > { %p2735_p9 = pnand %p2734_p10, %p2728_p4 }
  0x2d   : > { %2738 = shalt.err (!%p2735_p9)
}
  0x2e   : > { %s2790_s19 = smov [#allocation4]   ;;  %s2739_s20 = scalar_lea.vmem %s2889_s30, 16 }
  0x2f   : > { %2669 = dma.vmem_to_smem (!%p2893_p5), %s2882_s27, 16, %s2790_s19, [#allocation5]  }
  0x30   : > { %p2740_p11 = scmp.ne.s32.totalorder %s2889_s30, %s2739_s20  ;;  %p2747_p0 = scmp.lt.s32.totalorder %s2889_s30, %s2889_s30 }
  0x31   : > { %p2748_p1 = scmp.lt.s32.totalorder %s2739_s20, %s2739_s20 }
  0x32   : > { %p2742_p12 = pnand %p2740_p11, %p2711_p7 }
  0x33   : > { %p2749_p4 = por %p2748_p1, %p2747_p0 }
  0x34   : > { %p2743_p13 = pneg %p2742_p12 }
  0x36   : > { %p2750_p6 = pnand %p2749_p4, %p2743_p13 }
  0x38   : > { %2753 = shalt.err (!%p2750_p6)
}
  0x39   : > { %s2791_s22 = smov [#allocation8]   ;;  %s2754_s23 = scalar_lea.vmem %s2900_s15, 16 }
  0x3a   : > { %2675 = dma.vmem_to_smem (!%p2893_p5), %s2889_s30, 16, %s2791_s22, [#allocation7]  }
  0x3b   : > { %p2755_p8 = scmp.ne.s32.totalorder %s2900_s15, %s2754_s23  ;;  %p2762_p11 = scmp.lt.s32.totalorder %s2900_s15, %s2900_s15 }
  0x3c   : > { %p2763_p12 = scmp.lt.s32.totalorder %s2754_s23, %s2754_s23 }
  0x3d   : > { %p2757_p10 = pnand %p2755_p8, %p2711_p7 }
  0x3e   : > { %p2764_p13 = por %p2763_p12, %p2762_p11 }
  0x3f   : > { %p2758_p9 = pneg %p2757_p10 }
  0x41   : > { %p2765_p0 = pnand %p2764_p13, %p2758_p9 }
  0x43   : > { %2768 = shalt.err (!%p2765_p0)
}
  0x44   : > { %s2792_s5 = smov [#allocation9]   ;;  %395 = sbr.rel (%p2875_p3) target bundleno = 681 (0x2a9), region = 52 }
  0x45   : > { %2678 = dma.vmem_to_smem (!%p2893_p5), %s2900_s15, 16, %s2792_s5, [#allocation10]  }
  0x4b   : > { %2774 = dma.done.wait (%p2679_p2), [#allocation5], 16  }
  0x4c   : > { %2776 = vsyncadd (%p2679_p2), [#allocation5], 4294967280 }
  0x4d   : > { %2778 = dma.done.wait (%p2679_p2), [#allocation7], 32  }
  0x4e   : > { %2780 = vsyncadd (%p2679_p2), [#allocation7], 4294967264 }
  0x4f   : > { %2782 = dma.done.wait (%p2679_p2), [#allocation10], 16  }
  0x50   : > { %2784 = vsyncadd (%p2679_p2), [#allocation10], 4294967280 }
  0x51   : > { %413 = sfence }
  0x52   : > { %p466_p3 = scmp.lt.s32.totalorder %s2870_s24, 1  ;;  %s4993_s0 = sld [smem:[#allocation44_spill]]  ;;  %vm558_vm0 = vcmask 1042432  }
  0x53   : > { %s4995_s1 = sld [smem:[#allocation45_spill]]  ;;  %s4934_s12 = smov 1  }
  0x54   : > { %s5077_s24 = smov (!%p466_p3, %s2870_s24), 1  ;;  %s4936_s13 = smov 127  }
  0x55   : > { %4991 = sst [smem:[#allocation15_spill]] %s5077_s24  ;;  %s2958_s7 = sshll.u32 %s5077_s24, 8 }
  0x56   : > { %4992 = sst [smem:[#allocation16_spill]] %s2958_s7  ;;  %s3240_s14 = sld [smem:[#allocation4]] }
  0x57   : > { %s3242_s15 = sld [smem:[#allocation4 + $0x1]]  ;;  %s3244_s16 = sld [smem:[#allocation4 + $0x6]] }
  0x58   : > { %s2964_s27 = scalar_lea.vmem %s4993_s0, %s2958_s7  ;;  %s3246_s17 = sld [smem:[#allocation4 + $0x7]] }
  0x59   : > { %4994 = sst [smem:[#allocation17_spill]] %s2964_s27  ;;  %v494_v0 = vld [vmem:[%s2964_s27] sm:$0x7]  ;;  %v495_v1 = vld [vmem:[%s2964_s27 + $0x4] sm:$0x7]  ;;  %s3003_s30 = scalar_lea.vmem %s4995_s1, %s2958_s7 }
  0x5a   : > { %v496_v2 = vld [vmem:[%s2964_s27 + $0x8] sm:$0x7]  ;;  %v497_v3 = vld [vmem:[%s2964_s27 + $0xc] sm:$0x7]  ;;  %v559_v4 = vsel %vm558_vm0, %v494_v0, 0.0  ;;  %v560_v5 = vsel %vm558_vm0, %v495_v1, 0.0 }
  0x5b   : > { %v562_v6 = vsel %vm558_vm0, %v496_v2, 0.0  ;;  %v498_v7 = vld [vmem:[%s2964_s27 + $0x10] sm:$0x7]  ;;  %v561_v8 = vadd.f32 %v560_v5, %v559_v4  ;;  %v564_v9 = vsel %vm558_vm0, %v497_v3, 0.0  ;;  %v499_v10 = vld [vmem:[%s2964_s27 + $0x14] sm:$0x7] }
  0x5c   : > { %v566_v12 = vsel %vm558_vm0, %v498_v7, 0.0  ;;  %v500_v13 = vld [vmem:[%s2964_s27 + $0x18] sm:$0x7]  ;;  %v568_v15 = vsel %vm558_vm0, %v499_v10, 0.0  ;;  %v501_v16 = vld [vmem:[%s2964_s27 + $0x1c] sm:$0x7] }
  0x5d   : > { %v563_v11 = vadd.f32 %v562_v6, %v561_v8  ;;  %v570_v18 = vsel %vm558_vm0, %v500_v13, 0.0  ;;  %v502_v19 = vld [vmem:[%s2964_s27 + $0x20] sm:$0x7]  ;;  %v572_v21 = vsel %vm558_vm0, %v501_v16, 0.0  ;;  %v503_v22 = vld [vmem:[%s2964_s27 + $0x24] sm:$0x7] }
  0x5e   : > { %v574_v24 = vsel %vm558_vm0, %v502_v19, 0.0  ;;  %v504_v25 = vld [vmem:[%s2964_s27 + $0x28] sm:$0x7]  ;;  %v576_v27 = vsel %vm558_vm0, %v503_v22, 0.0  ;;  %v505_v28 = vld [vmem:[%s2964_s27 + $0x2c] sm:$0x7] }
  0x5f   : > { %v565_v14 = vadd.f32 %v564_v9, %v563_v11  ;;  %v578_v30 = vsel %vm558_vm0, %v504_v25, 0.0  ;;  %v506_v31 = vld [vmem:[%s2964_s27 + $0x30] sm:$0x7]  ;;  %v580_v33 = vsel %vm558_vm0, %v505_v28, 0.0  ;;  %v507_v34 = vld [vmem:[%s2964_s27 + $0x34] sm:$0x7] }
  0x60   : > { %v582_v36 = vsel %vm558_vm0, %v506_v31, 0.0  ;;  %v508_v37 = vld [vmem:[%s2964_s27 + $0x38] sm:$0x7]  ;;  %v584_v39 = vsel %vm558_vm0, %v507_v34, 0.0  ;;  %v509_v40 = vld [vmem:[%s2964_s27 + $0x3c] sm:$0x7] }
  0x61   : > { %v567_v17 = vadd.f32 %v566_v12, %v565_v14  ;;  %v586_v42 = vsel %vm558_vm0, %v508_v37, 0.0  ;;  %v510_v43 = vld [vmem:[%s2964_s27 + $0x40] sm:$0x7]  ;;  %v588_v45 = vsel %vm558_vm0, %v509_v40, 0.0  ;;  %4996 = sst [smem:[#allocation18_spill]] %s3003_s30  ;;  %s3250_s19 = sld [smem:[#allocation4 + $0xd]] }
  0x62   : > { %v511_v46 = vld [vmem:[%s2964_s27 + $0x44] sm:$0x7]  ;;  %v590_v48 = vsel %vm558_vm0, %v510_v43, 0.0  ;;  %v512_v49 = vld [vmem:[%s2964_s27 + $0x48] sm:$0x7]  ;;  %4997 = sst [smem:[#allocation19_spill]] %s3240_s14 }
  0x63   : > { %v569_v20 = vadd.f32 %v568_v15, %v567_v17  ;;  %v688_v51 = vld [vmem:[%s3003_s30] sm:$0x7]  ;;  %v592_v52 = vsel %vm558_vm0, %v511_v46, 0.0  ;;  %v513_v53 = vld [vmem:[%s2964_s27 + $0x4c] sm:$0x7]  ;;  %v594_v57 = vsel %vm558_vm0, %v512_v49, 0.0 }
  0x64   : > { %v689_v55 = vld [vmem:[%s3003_s30 + $0x4] sm:$0x7]  ;;  %v690_v56 = vld [vmem:[%s3003_s30 + $0x8] sm:$0x7]  ;;  %v752_v58 = vsel %vm558_vm0, %v688_v51, 0.0  ;;  %v596_v62 = vsel %vm558_vm0, %v513_v53, 0.0 }
  0x65   : > { %v571_v23 = vadd.f32 %v570_v18, %v569_v20  ;;  %v514_v59 = vld [vmem:[%s2964_s27 + $0x50] sm:$0x7]  ;;  %v691_v61 = vld [vmem:[%s3003_s30 + $0xc] sm:$0x7]  ;;  %v753_v63 = vsel %vm558_vm0, %v689_v55, 0.0  ;;  %v755_v0 = vsel %vm558_vm0, %v690_v56, 0.0 }
  0x66   : > { %v515_v1 = vld [vmem:[%s2964_s27 + $0x54] sm:$0x7]  ;;  %v692_v3 = vld [vmem:[%s3003_s30 + $0x10] sm:$0x7]  ;;  %v754_v4 = vadd.f32 %v753_v63, %v752_v58  ;;  %v598_v5 = vsel %vm558_vm0, %v514_v59, 0.0  ;;  %v757_v6 = vsel %vm558_vm0, %v691_v61, 0.0 }
  0x67   : > { %v573_v26 = vadd.f32 %v572_v21, %v571_v23  ;;  %v516_v7 = vld [vmem:[%s2964_s27 + $0x58] sm:$0x7]  ;;  %v693_v9 = vld [vmem:[%s3003_s30 + $0x14] sm:$0x7]  ;;  %v600_v11 = vsel %vm558_vm0, %v515_v1, 0.0  ;;  %v759_v12 = vsel %vm558_vm0, %v692_v3, 0.0 }
  0x68   : > { %v756_v10 = vadd.f32 %v755_v0, %v754_v4  ;;  %v517_v13 = vld [vmem:[%s2964_s27 + $0x5c] sm:$0x7]  ;;  %v694_v15 = vld [vmem:[%s3003_s30 + $0x18] sm:$0x7]  ;;  %v602_v17 = vsel %vm558_vm0, %v516_v7, 0.0  ;;  %v761_v18 = vsel %vm558_vm0, %v693_v9, 0.0 }
  0x69   : > { %v575_v29 = vadd.f32 %v574_v24, %v573_v26  ;;  %v518_v19 = vld [vmem:[%s2964_s27 + $0x60] sm:$0x7]  ;;  %v695_v21 = vld [vmem:[%s3003_s30 + $0x1c] sm:$0x7]  ;;  %v604_v23 = vsel %vm558_vm0, %v517_v13, 0.0  ;;  %v763_v24 = vsel %vm558_vm0, %v694_v15, 0.0 }
  0x6a   : > { %v758_v16 = vadd.f32 %v757_v6, %v756_v10  ;;  %v519_v25 = vld [vmem:[%s2964_s27 + $0x64] sm:$0x7]  ;;  %v520_v31 = vld [vmem:[%s2964_s27 + $0x68] sm:$0x7]  ;;  %v521_v37 = vld [vmem:[%s2964_s27 + $0x6c] sm:$0x7] }
  0x6b   : > { %v577_v32 = vadd.f32 %v576_v27, %v575_v29  ;;  %v696_v27 = vld [vmem:[%s3003_s30 + $0x20] sm:$0x7]  ;;  %v606_v29 = vsel %vm558_vm0, %v518_v19, 0.0  ;;  %v522_v43 = vld [vmem:[%s2964_s27 + $0x70] sm:$0x7]  ;;  %4998 = sst [smem:[#allocation20_spill]] %s3244_s16 }
  0x6c   : > { %v760_v22 = vadd.f32 %v759_v12, %v758_v16  ;;  %v523_v49 = vld [vmem:[%s2964_s27 + $0x74] sm:$0x7]  ;;  %v700_v51 = vld [vmem:[%s3003_s30 + $0x30] sm:$0x7]  ;;  %v614_v53 = vsel %vm558_vm0, %v522_v43, 0.0  ;;  %s3248_s18 = sld [smem:[#allocation4 + $0xc]] }
  0x6d   : > { %v579_v35 = vadd.f32 %v578_v30, %v577_v32  ;;  %v765_v30 = vsel %vm558_vm0, %v695_v21, 0.0  ;;  %v524_v55 = vld [vmem:[%s2964_s27 + $0x78] sm:$0x7]  ;;  %v616_v59 = vsel %vm558_vm0, %v523_v49, 0.0  ;;  %v525_v61 = vld [vmem:[%s2964_s27 + $0x7c] sm:$0x7] }
  0x6e   : > { %v762_v28 = vadd.f32 %v761_v18, %v760_v22  ;;  %v702_v63 = vld [vmem:[%s3003_s30 + $0x38] sm:$0x7]  ;;  %v618_v1 = vsel %vm558_vm0, %v524_v55, 0.0  ;;  %v526_v3 = vld [vmem:[%s2964_s27 + $0x80] sm:$0x7]  ;;  %v620_v7 = vsel %vm558_vm0, %v525_v61, 0.0 }
  0x6f   : > { %v581_v38 = vadd.f32 %v580_v33, %v579_v35  ;;  %v697_v33 = vld [vmem:[%s3003_s30 + $0x24] sm:$0x7]  ;;  %v608_v35 = vsel %vm558_vm0, %v519_v25, 0.0  ;;  %v622_v13 = vsel %vm558_vm0, %v526_v3, 0.0  ;;  %v528_v15 = vld [vmem:[%s2964_s27 + $0x88] sm:$0x7] }
  0x70   : > { %v764_v34 = vadd.f32 %v763_v24, %v762_v28  ;;  %v527_v9 = vld [vmem:[%s2964_s27 + $0x84] sm:$0x7]  ;;  %v529_v21 = vld [vmem:[%s2964_s27 + $0x8c] sm:$0x7]  ;;  %v626_v25 = vsel %vm558_vm0, %v528_v15, 0.0  ;;  %s3252_s20 = sld [smem:[#allocation4 + $0x12]] }
  0x71   : > { %v583_v41 = vadd.f32 %v582_v36, %v581_v38  ;;  %v767_v36 = vsel %vm558_vm0, %v696_v27, 0.0  ;;  %v624_v19 = vsel %vm558_vm0, %v527_v9, 0.0  ;;  %v530_v27 = vld [vmem:[%s2964_s27 + $0x90] sm:$0x7]  ;;  %s3254_s22 = sld [smem:[#allocation4 + $0x13]]  ;;  %s3256_s23 = sld [smem:[#allocation4 + $0x2]] }
  0x72   : > { %v766_v40 = vadd.f32 %v765_v30, %v764_v34  ;;  %4999 = sst [smem:[#allocation21_spill]] %s3248_s18  ;;  %s3258_s5 = sld [smem:[#allocation4 + $0x8]] }
  0x73   : > { %v585_v44 = vadd.f32 %v584_v39, %v583_v41  ;;  %v698_v39 = vld [vmem:[%s3003_s30 + $0x28] sm:$0x7]  ;;  %v610_v41 = vsel %vm558_vm0, %v520_v31, 0.0  ;;  %v628_v31 = vsel %vm558_vm0, %v529_v21, 0.0  ;;  %s3260_s25 = sld [smem:[#allocation4 + $0xe]]  ;;  %s3262_s26 = sld [smem:[#allocation4 + $0x14]] }
  0x74   : > { %v768_v46 = vadd.f32 %v767_v36, %v766_v40  ;;  %s3264_s28 = sld [smem:[#allocation4 + $0x3]]  ;;  %s3266_s29 = sld [smem:[#allocation4 + $0x9]] }
  0x75   : > { %v587_v47 = vadd.f32 %v586_v42, %v585_v44  ;;  %v769_v42 = vsel %vm558_vm0, %v697_v33, 0.0  ;;  %v531_v33 = vld [vmem:[%s2964_s27 + $0x94] sm:$0x7]  ;;  %s3272_s0 = sld [smem:[#allocation4 + $0x4]]  ;;  %s3274_s1 = sld [smem:[#allocation4 + $0xa]] }
  0x76   : > { %v632_v43 = vsel %vm558_vm0, %v531_v33, 0.0  ;;  %5000 = sst [smem:[#allocation22_spill]] %s3252_s20  ;;  %s3278_s3 = sld [smem:[#allocation4 + $0x16]] }
  0x77   : > { %v589_v50 = vadd.f32 %v588_v45, %v587_v47  ;;  %v699_v45 = vld [vmem:[%s3003_s30 + $0x2c] sm:$0x7]  ;;  %v612_v47 = vsel %vm558_vm0, %v521_v37, 0.0  ;;  %v630_v37 = vsel %vm558_vm0, %v530_v27, 0.0  ;;  %5001 = sst [smem:[#allocation23_spill]] %s3256_s23  ;;  %s3276_s2 = sld [smem:[#allocation4 + $0x10]] }
  0x78   : > { %5002 = sst [smem:[#allocation24_spill]] %s3258_s5  ;;  %s3280_s4 = sld [smem:[#allocation4 + $0x5]] }
  0x79   : > { %v591_v54 = vadd.f32 %v590_v48, %v589_v50  ;;  %v771_v48 = vsel %vm558_vm0, %v698_v39, 0.0  ;;  %v532_v39 = vld [vmem:[%s2964_s27 + $0x98] sm:$0x7]  ;;  %5003 = sst [smem:[#allocation25_spill]] %s3260_s25  ;;  %s3284_s21 = sld [smem:[#allocation4 + $0x11]] }
  0x7a   : > { %v634_v49 = vsel %vm558_vm0, %v532_v39, 0.0  ;;  %5004 = sst [smem:[#allocation26_spill]] %s3262_s26  ;;  %s3282_s6 = sld [smem:[#allocation4 + $0xb]] }
  0x7b   : > { %v593_v60 = vadd.f32 %v592_v52, %v591_v54  ;;  %v770_v52 = vadd.f32 %v769_v42, %v768_v46  ;;  %v773_v54 = vsel %vm558_vm0, %v699_v45, 0.0  ;;  %v533_v45 = vld [vmem:[%s2964_s27 + $0x9c] sm:$0x7]  ;;  %5005 = sst [smem:[#allocation27_spill]] %s3266_s29  ;;  %s3286_s9 = sld [smem:[#allocation4 + $0x17]] }
  0x7c   : > { %v636_v55 = vsel %vm558_vm0, %v533_v45, 0.0  ;;  %s3290_s8 = sld [smem:[#allocation4 + $0x19]]  ;;  %s3292_s7 = sld [smem:[#allocation4 + $0x1a]] }
  0x7d   : > { %v595_v2 = vadd.f32 %v594_v57, %v593_v60  ;;  %v701_v57 = vld [vmem:[%s3003_s30 + $0x34] sm:$0x7]  ;;  %v772_v58 = vadd.f32 %v771_v48, %v770_v52  ;;  %v775_v60 = vsel %vm558_vm0, %v700_v51, 0.0  ;;  %v534_v51 = vld [vmem:[%s2964_s27 + $0xa0] sm:$0x7]  ;;  %s3294_s11 = sld [smem:[#allocation4 + $0x1b]] }
  0x7e   : > { %v638_v61 = vsel %vm558_vm0, %v534_v51, 0.0  ;;  %s3296_s10 = sld [smem:[#allocation6]]  ;;  %s3302_s24 = sld [smem:[#allocation6 + $0x2]] }
  0x7f   : > { %v597_v8 = vadd.f32 %v596_v62, %v595_v2  ;;  %v774_v0 = vadd.f32 %v773_v54, %v772_v58  ;;  %v777_v2 = vsel %vm558_vm0, %v701_v57, 0.0  ;;  %v535_v57 = vld [vmem:[%s2964_s27 + $0xa4] sm:$0x7]  ;;  %5007 = sst [smem:[#allocation29_spill]] %s3284_s21 }
  0x80   : > { %v640_v3 = vsel %vm558_vm0, %v535_v57, 0.0 }
  0x81   : > { %v599_v14 = vadd.f32 %v598_v5, %v597_v8  ;;  %v703_v5 = vld [vmem:[%s3003_s30 + $0x3c] sm:$0x7]  ;;  %v776_v6 = vadd.f32 %v775_v60, %v774_v0  ;;  %v779_v8 = vsel %vm558_vm0, %v702_v63, 0.0  ;;  %v536_v63 = vld [vmem:[%s2964_s27 + $0xa8] sm:$0x7]  ;;  %5008 = sst [smem:[#allocation30_spill]] %s3286_s9 }
  0x82   : > { %v642_v9 = vsel %vm558_vm0, %v536_v63, 0.0  ;;  %5009 = sst [smem:[#allocation31_spill]] %s3292_s7  ;;  %s3304_s9 = sld [smem:[#allocation6 + $0x3]] }
  0x83   : > { %v601_v20 = vadd.f32 %v600_v11, %v599_v14  ;;  %v704_v11 = vld [vmem:[%s3003_s30 + $0x40] sm:$0x7]  ;;  %v778_v12 = vadd.f32 %v777_v2, %v776_v6  ;;  %v781_v14 = vsel %vm558_vm0, %v703_v5, 0.0  ;;  %v537_v5 = vld [vmem:[%s2964_s27 + $0xac] sm:$0x7]  ;;  %5010 = sst [smem:[#allocation32_spill]] %s3294_s11 }
  0x84   : > { %v644_v15 = vsel %vm558_vm0, %v537_v5, 0.0  ;;  %5011 = sst [smem:[#allocation33_spill]] %s3296_s10  ;;  %s3309_s7 = sld [smem:[#allocation4 + $0x1c]] }
  0x85   : > { %v603_v26 = vadd.f32 %v602_v17, %v601_v20  ;;  %v705_v17 = vld [vmem:[%s3003_s30 + $0x44] sm:$0x7]  ;;  %v780_v18 = vadd.f32 %v779_v8, %v778_v12  ;;  %v783_v20 = vsel %vm558_vm0, %v704_v11, 0.0  ;;  %v538_v11 = vld [vmem:[%s2964_s27 + $0xb0] sm:$0x7]  ;;  %5013 = sst [smem:[#allocation35_spill]] %s3302_s24 }
  0x86   : > { %v646_v21 = vsel %vm558_vm0, %v538_v11, 0.0  ;;  %s3311_s11 = sld [smem:[#allocation4 + $0x1d]]  ;;  %s3314_s10 = sld [smem:[#allocation6 + $0x4]] }
  0x87   : > { %v605_v32 = vadd.f32 %v604_v23, %v603_v26  ;;  %v706_v23 = vld [vmem:[%s3003_s30 + $0x48] sm:$0x7]  ;;  %v782_v24 = vadd.f32 %v781_v14, %v780_v18  ;;  %v785_v26 = vsel %vm558_vm0, %v705_v17, 0.0  ;;  %v539_v17 = vld [vmem:[%s2964_s27 + $0xb4] sm:$0x7] }
  0x88   : > { %v648_v27 = vsel %vm558_vm0, %v539_v17, 0.0  ;;  %5014 = sst [smem:[#allocation36_spill]] %s3304_s9  ;;  %s3442_s9 = sld [smem:[#allocation4 + $0x32]] }
  0x89   : > { %v607_v38 = vadd.f32 %v606_v29, %v605_v32  ;;  %v707_v29 = vld [vmem:[%s3003_s30 + $0x4c] sm:$0x7]  ;;  %v784_v30 = vadd.f32 %v783_v20, %v782_v24  ;;  %v787_v32 = vsel %vm558_vm0, %v706_v23, 0.0  ;;  %v540_v23 = vld [vmem:[%s2964_s27 + $0xb8] sm:$0x7] }
  0x8a   : > { %v650_v33 = vsel %vm558_vm0, %v540_v23, 0.0 }
  0x8b   : > { %v609_v44 = vadd.f32 %v608_v35, %v607_v38  ;;  %v708_v35 = vld [vmem:[%s3003_s30 + $0x50] sm:$0x7]  ;;  %v786_v36 = vadd.f32 %v785_v26, %v784_v30  ;;  %v789_v38 = vsel %vm558_vm0, %v707_v29, 0.0  ;;  %v541_v29 = vld [vmem:[%s2964_s27 + $0xbc] sm:$0x7] }
  0x8c   : > { %v652_v39 = vsel %vm558_vm0, %v541_v29, 0.0  ;;  %5015 = sst [smem:[#allocation37_spill]] %s3311_s11 }
  0x8d   : > { %v611_v50 = vadd.f32 %v610_v41, %v609_v44  ;;  %v709_v41 = vld [vmem:[%s3003_s30 + $0x54] sm:$0x7]  ;;  %v788_v42 = vadd.f32 %v787_v32, %v786_v36  ;;  %v791_v44 = vsel %vm558_vm0, %v708_v35, 0.0  ;;  %v542_v35 = vld [vmem:[%s2964_s27 + $0xc0] sm:$0x7]  ;;  %5016 = sst [smem:[#allocation38_spill]] %s3314_s10 }
  0x8e   : > { %v654_v45 = vsel %vm558_vm0, %v542_v35, 0.0  ;;  %s3434_s10 = sld [smem:[#allocation4 + $0x34]] }
  0x8f   : > { %v613_v56 = vadd.f32 %v612_v47, %v611_v50  ;;  %v710_v47 = vld [vmem:[%s3003_s30 + $0x58] sm:$0x7]  ;;  %v790_v48 = vadd.f32 %v789_v38, %v788_v42  ;;  %v793_v50 = vsel %vm558_vm0, %v709_v41, 0.0  ;;  %v543_v41 = vld [vmem:[%s2964_s27 + $0xc4] sm:$0x7] }
  0x90   : > { %v656_v51 = vsel %vm558_vm0, %v543_v41, 0.0 }
  0x91   : > { %v615_v62 = vadd.f32 %v614_v53, %v613_v56  ;;  %v711_v53 = vld [vmem:[%s3003_s30 + $0x5c] sm:$0x7]  ;;  %v792_v54 = vadd.f32 %v791_v44, %v790_v48  ;;  %v795_v56 = vsel %vm558_vm0, %v710_v47, 0.0  ;;  %v544_v47 = vld [vmem:[%s2964_s27 + $0xc8] sm:$0x7] }
  0x92   : > { %v658_v57 = vsel %vm558_vm0, %v544_v47, 0.0 }
  0x93   : > { %v617_v4 = vadd.f32 %v616_v59, %v615_v62  ;;  %v712_v59 = vld [vmem:[%s3003_s30 + $0x60] sm:$0x7]  ;;  %v794_v60 = vadd.f32 %v793_v50, %v792_v54  ;;  %v797_v62 = vsel %vm558_vm0, %v711_v53, 0.0  ;;  %v545_v53 = vld [vmem:[%s2964_s27 + $0xcc] sm:$0x7] }
  0x94   : > { %v660_v63 = vsel %vm558_vm0, %v545_v53, 0.0 }
  0x95   : > { %v619_v10 = vadd.f32 %v618_v1, %v617_v4  ;;  %v713_v1 = vld [vmem:[%s3003_s30 + $0x64] sm:$0x7]  ;;  %v796_v2 = vadd.f32 %v795_v56, %v794_v60  ;;  %v799_v4 = vsel %vm558_vm0, %v712_v59, 0.0  ;;  %v546_v59 = vld [vmem:[%s2964_s27 + $0xd0] sm:$0x7] }
  0x96   : > { %v662_v5 = vsel %vm558_vm0, %v546_v59, 0.0 }
  0x97   : > { %v621_v16 = vadd.f32 %v620_v7, %v619_v10  ;;  %v714_v7 = vld [vmem:[%s3003_s30 + $0x68] sm:$0x7]  ;;  %v798_v8 = vadd.f32 %v797_v62, %v796_v2  ;;  %v801_v10 = vsel %vm558_vm0, %v713_v1, 0.0  ;;  %v547_v1 = vld [vmem:[%s2964_s27 + $0xd4] sm:$0x7] }
  0x98   : > { %v664_v11 = vsel %vm558_vm0, %v547_v1, 0.0 }
  0x99   : > { %v623_v22 = vadd.f32 %v622_v13, %v621_v16  ;;  %v715_v13 = vld [vmem:[%s3003_s30 + $0x6c] sm:$0x7]  ;;  %v800_v14 = vadd.f32 %v799_v4, %v798_v8  ;;  %v803_v16 = vsel %vm558_vm0, %v714_v7, 0.0  ;;  %v548_v7 = vld [vmem:[%s2964_s27 + $0xd8] sm:$0x7] }
  0x9a   : > { %v666_v17 = vsel %vm558_vm0, %v548_v7, 0.0 }
  0x9b   : > { %v625_v28 = vadd.f32 %v624_v19, %v623_v22  ;;  %v716_v19 = vld [vmem:[%s3003_s30 + $0x70] sm:$0x7]  ;;  %v802_v20 = vadd.f32 %v801_v10, %v800_v14  ;;  %v805_v22 = vsel %vm558_vm0, %v715_v13, 0.0  ;;  %v549_v13 = vld [vmem:[%s2964_s27 + $0xdc] sm:$0x7] }
  0x9c   : > { %v668_v23 = vsel %vm558_vm0, %v549_v13, 0.0  ;;  %v737_v13 = vld [vmem:[%s3003_s30 + $0xc4] sm:$0x7] }
  0x9d   : > { %v627_v34 = vadd.f32 %v626_v25, %v625_v28  ;;  %v717_v25 = vld [vmem:[%s3003_s30 + $0x74] sm:$0x7]  ;;  %v804_v26 = vadd.f32 %v803_v16, %v802_v20  ;;  %v807_v28 = vsel %vm558_vm0, %v716_v19, 0.0  ;;  %v550_v19 = vld [vmem:[%s2964_s27 + $0xe0] sm:$0x7] }
  0x9e   : > { %v670_v29 = vsel %vm558_vm0, %v550_v19, 0.0  ;;  %v849_v19 = vsel %vm558_vm0, %v737_v13, 0.0  ;;  %v1066_v13 = vstv %s3252_s20  ;;  %s3349_s20 = sld [smem:[#allocation6 + $0x5]] }
  0x9f   : > { %v629_v40 = vadd.f32 %v628_v31, %v627_v34  ;;  %v718_v31 = vld [vmem:[%s3003_s30 + $0x78] sm:$0x7]  ;;  %v806_v32 = vadd.f32 %v805_v22, %v804_v26  ;;  %v809_v34 = vsel %vm558_vm0, %v717_v25, 0.0  ;;  %v551_v25 = vld [vmem:[%s2964_s27 + $0xe4] sm:$0x7] }
  0xa0   : > { %v672_v35 = vsel %vm558_vm0, %v551_v25, 0.0 }
  0xa1   : > { %v631_v46 = vadd.f32 %v630_v37, %v629_v40  ;;  %v719_v37 = vld [vmem:[%s3003_s30 + $0x7c] sm:$0x7]  ;;  %v808_v38 = vadd.f32 %v807_v28, %v806_v32  ;;  %v811_v40 = vsel %vm558_vm0, %v718_v31, 0.0  ;;  %v552_v31 = vld [vmem:[%s2964_s27 + $0xe8] sm:$0x7] }
  0xa2   : > { %v674_v41 = vsel %vm558_vm0, %v552_v31, 0.0 }
  0xa3   : > { %v633_v52 = vadd.f32 %v632_v43, %v631_v46  ;;  %v720_v43 = vld [vmem:[%s3003_s30 + $0x80] sm:$0x7]  ;;  %v810_v44 = vadd.f32 %v809_v34, %v808_v38  ;;  %v813_v46 = vsel %vm558_vm0, %v719_v37, 0.0  ;;  %v553_v37 = vld [vmem:[%s2964_s27 + $0xec] sm:$0x7] }
  0xa4   : > { %v676_v47 = vsel %vm558_vm0, %v553_v37, 0.0  ;;  %5020 = sst [smem:[#allocation42_spill]] %s3349_s20  ;;  %s3364_s20 = sld [smem:[#allocation4 + $0x26]] }
  0xa5   : > { %v635_v58 = vadd.f32 %v634_v49, %v633_v52  ;;  %v721_v49 = vld [vmem:[%s3003_s30 + $0x84] sm:$0x7]  ;;  %v812_v50 = vadd.f32 %v811_v40, %v810_v44  ;;  %v815_v52 = vsel %vm558_vm0, %v720_v43, 0.0  ;;  %v554_v43 = vld [vmem:[%s2964_s27 + $0xf0] sm:$0x7] }
  0xa6   : > { %v678_v53 = vsel %vm558_vm0, %v554_v43, 0.0 }
  0xa7   : > { %v637_v0 = vadd.f32 %v636_v55, %v635_v58  ;;  %v722_v55 = vld [vmem:[%s3003_s30 + $0x88] sm:$0x7]  ;;  %v814_v56 = vadd.f32 %v813_v46, %v812_v50  ;;  %v817_v58 = vsel %vm558_vm0, %v721_v49, 0.0  ;;  %v555_v49 = vld [vmem:[%s2964_s27 + $0xf4] sm:$0x7] }
  0xa8   : > { %v680_v59 = vsel %vm558_vm0, %v555_v49, 0.0 }
  0xa9   : > { %v639_v6 = vadd.f32 %v638_v61, %v637_v0  ;;  %v723_v61 = vld [vmem:[%s3003_s30 + $0x8c] sm:$0x7]  ;;  %v816_v62 = vadd.f32 %v815_v52, %v814_v56  ;;  %v819_v0 = vsel %vm558_vm0, %v722_v55, 0.0  ;;  %v556_v55 = vld [vmem:[%s2964_s27 + $0xf8] sm:$0x7] }
  0xaa   : > { %v682_v1 = vsel %vm558_vm0, %v556_v55, 0.0 }
  0xab   : > { %v641_v12 = vadd.f32 %v640_v3, %v639_v6  ;;  %v724_v3 = vld [vmem:[%s3003_s30 + $0x90] sm:$0x7]  ;;  %v818_v4 = vadd.f32 %v817_v58, %v816_v62  ;;  %v821_v6 = vsel %vm558_vm0, %v723_v61, 0.0  ;;  %v557_v61 = vld [vmem:[%s2964_s27 + $0xfc] sm:$0x7]  ;;  %s3298_s27 = sld [smem:[#allocation6 + $0x1]] }
  0xad   : > { %v643_v18 = vadd.f32 %v642_v9, %v641_v12  ;;  %v725_v9 = vld [vmem:[%s3003_s30 + $0x94] sm:$0x7]  ;;  %v820_v10 = vadd.f32 %v819_v0, %v818_v4  ;;  %v823_v12 = vsel %vm558_vm0, %v724_v3, 0.0  ;;  %v735_v4 = vld [vmem:[%s3003_s30 + $0xbc] sm:$0x7] }
  0xaf   : > { %v645_v24 = vadd.f32 %v644_v15, %v643_v18  ;;  %v726_v15 = vld [vmem:[%s3003_s30 + $0x98] sm:$0x7]  ;;  %v822_v16 = vadd.f32 %v821_v6, %v820_v10  ;;  %v825_v18 = vsel %vm558_vm0, %v725_v9, 0.0  ;;  %v684_v6 = vsel %vm558_vm0, %v557_v61, 0.0  ;;  %v736_v9 = vld [vmem:[%s3003_s30 + $0xc0] sm:$0x7] }
  0xb1   : > { %v647_v30 = vadd.f32 %v646_v21, %v645_v24  ;;  %v727_v21 = vld [vmem:[%s3003_s30 + $0x9c] sm:$0x7]  ;;  %v824_v22 = vadd.f32 %v823_v12, %v822_v16  ;;  %v827_v24 = vsel %vm558_vm0, %v726_v15, 0.0  ;;  %v847_v15 = vsel %vm558_vm0, %v736_v9, 0.0  ;;  %5012 = sst [smem:[#allocation34_spill]] %s3298_s27 }
  0xb3   : > { %v649_v36 = vadd.f32 %v648_v27, %v647_v30  ;;  %v728_v27 = vld [vmem:[%s3003_s30 + $0xa0] sm:$0x7]  ;;  %v826_v28 = vadd.f32 %v825_v18, %v824_v22  ;;  %v829_v30 = vsel %vm558_vm0, %v727_v21, 0.0 }
  0xb5   : > { %v651_v42 = vadd.f32 %v650_v33, %v649_v36  ;;  %v729_v33 = vld [vmem:[%s3003_s30 + $0xa4] sm:$0x7]  ;;  %v828_v34 = vadd.f32 %v827_v24, %v826_v28  ;;  %v831_v36 = vsel %vm558_vm0, %v728_v27, 0.0 }
  0xb7   : > { %v653_v48 = vadd.f32 %v652_v39, %v651_v42  ;;  %v730_v39 = vld [vmem:[%s3003_s30 + $0xa8] sm:$0x7]  ;;  %v830_v40 = vadd.f32 %v829_v30, %v828_v34  ;;  %v833_v42 = vsel %vm558_vm0, %v729_v33, 0.0 }
  0xb9   : > { %v655_v54 = vadd.f32 %v654_v45, %v653_v48  ;;  %v731_v45 = vld [vmem:[%s3003_s30 + $0xac] sm:$0x7]  ;;  %v832_v46 = vadd.f32 %v831_v36, %v830_v40  ;;  %v835_v48 = vsel %vm558_vm0, %v730_v39, 0.0 }
  0xbb   : > { %v657_v60 = vadd.f32 %v656_v51, %v655_v54  ;;  %v732_v51 = vld [vmem:[%s3003_s30 + $0xb0] sm:$0x7]  ;;  %v834_v52 = vadd.f32 %v833_v42, %v832_v46  ;;  %v837_v54 = vsel %vm558_vm0, %v731_v45, 0.0 }
  0xbd   : > { %v659_v2 = vadd.f32 %v658_v57, %v657_v60  ;;  %v733_v57 = vld [vmem:[%s3003_s30 + $0xb4] sm:$0x7]  ;;  %v836_v58 = vadd.f32 %v835_v48, %v834_v52  ;;  %v839_v60 = vsel %vm558_vm0, %v732_v51, 0.0 }
  0xbf   : > { %v661_v8 = vadd.f32 %v660_v63, %v659_v2  ;;  %v734_v63 = vld [vmem:[%s3003_s30 + $0xb8] sm:$0x7]  ;;  %v838_v0 = vadd.f32 %v837_v54, %v836_v58  ;;  %v841_v2 = vsel %vm558_vm0, %v733_v57, 0.0 }
  0xc0   : > { %v843_v7 = vsel %vm558_vm0, %v734_v63, 0.0 }
  0xc1   : > { %v663_v14 = vadd.f32 %v662_v5, %v661_v8  ;;  %v840_v5 = vadd.f32 %v839_v60, %v838_v0  ;;  %v880_v0 = vlaneseq }
  0xc3   : > { %v665_v20 = vadd.f32 %v664_v11, %v663_v14  ;;  %v842_v10 = vadd.f32 %v841_v2, %v840_v5  ;;  %v845_v11 = vsel %vm558_vm0, %v735_v4, 0.0  ;;  %v955_v2 = vstv %s3246_s17  ;;  %s3326_s17 = sld [smem:[#allocation4 + $0x1f]] }
  0xc4   : > { %v1012_v4 = vstv %s3250_s19  ;;  %v1069_v5 = vstv %s3254_s22  ;;  %s3328_s19 = sld [smem:[#allocation4 + $0x20]]  ;;  %s3336_s22 = sld [smem:[#allocation4 + $0x21]] }
  0xc5   : > { %v667_v26 = vadd.f32 %v666_v17, %v665_v20  ;;  %v844_v14 = vadd.f32 %v843_v7, %v842_v10  ;;  %v738_v17 = vld [vmem:[%s3003_s30 + $0xc8] sm:$0x7]  ;;  %v739_v20 = vld [vmem:[%s3003_s30 + $0xcc] sm:$0x7]  ;;  %v904_v10 = vstv %s3256_s23  ;;  %s3347_s23 = sld [smem:[#allocation4 + $0x23]] }
  0xc6   : > { %v851_v22 = vsel %vm558_vm0, %v738_v17, 0.0  ;;  %v853_v25 = vsel %vm558_vm0, %v739_v20, 0.0  ;;  %v963_v20 = vstv %s3266_s29  ;;  %s3366_s29 = sld [smem:[#allocation4 + $0x28]] }
  0xc7   : > { %v669_v32 = vadd.f32 %v668_v23, %v667_v26  ;;  %v846_v18 = vadd.f32 %v845_v11, %v844_v14  ;;  %v740_v23 = vld [vmem:[%s3003_s30 + $0xd0] sm:$0x7]  ;;  %v741_v26 = vld [vmem:[%s3003_s30 + $0xd4] sm:$0x7]  ;;  %v1009_v11 = vstv %s3248_s18  ;;  %v959_v14 = vstv %s3258_s5  ;;  %s3355_s18 = sld [smem:[#allocation4 + $0x24]]  ;;  %s5021_s5 = sld [smem:[#allocation30_spill]] }
  0xc8   : > { %v855_v28 = vsel %vm558_vm0, %v740_v23, 0.0  ;;  %v857_v31 = vsel %vm558_vm0, %v741_v26, 0.0  ;;  %v912_v23 = vstv %s3272_s0  ;;  %s3374_s0 = sld [smem:[#allocation4 + $0x29]] }
  0xc9   : > { %v671_v38 = vadd.f32 %v670_v29, %v669_v32  ;;  %v848_v21 = vadd.f32 %v847_v15, %v846_v18  ;;  %v742_v29 = vld [vmem:[%s3003_s30 + $0xd8] sm:$0x7]  ;;  %v743_v32 = vld [vmem:[%s3003_s30 + $0xdc] sm:$0x7]  ;;  %v1016_v15 = vstv %s3260_s25  ;;  %v1073_v18 = vstv %s3262_s26  ;;  %s3357_s25 = sld [smem:[#allocation4 + $0x25]]  ;;  %s5022_s26 = sld [smem:[#allocation31_spill]] }
  0xca   : > { %v859_v34 = vsel %vm558_vm0, %v742_v29, 0.0  ;;  %v861_v37 = vsel %vm558_vm0, %v743_v32, 0.0  ;;  %5017 = sst [smem:[#allocation39_spill]] %s3328_s19  ;;  %v1028_v29 = vstv %s3284_s21  ;;  %s3398_s21 = sld [smem:[#allocation4 + $0x2c]] }
  0xcb   : > { %v673_v44 = vadd.f32 %v672_v35, %v671_v38  ;;  %v850_v24 = vadd.f32 %v849_v19, %v848_v21  ;;  %v744_v35 = vld [vmem:[%s3003_s30 + $0xe0] sm:$0x7]  ;;  %v745_v38 = vld [vmem:[%s3003_s30 + $0xe4] sm:$0x7]  ;;  %5018 = sst [smem:[#allocation40_spill]] %s3336_s22  ;;  %v908_v19 = vstv %s3264_s28  ;;  %s3678_s28 = sld [smem:[#allocation6 + $0xb]] }
  0xcc   : > { %v863_v40 = vsel %vm558_vm0, %v744_v35, 0.0  ;;  %v865_v43 = vsel %vm558_vm0, %v745_v38, 0.0  ;;  %5019 = sst [smem:[#allocation41_spill]] %s3347_s23  ;;  %v1032_v38 = vstv %s3302_s24  ;;  %s3406_s24 = sld [smem:[#allocation4 + $0x31]] }
  0xcd   : > { %v675_v50 = vadd.f32 %v674_v41, %v673_v44  ;;  %v852_v27 = vadd.f32 %v851_v22, %v850_v24  ;;  %v746_v41 = vld [vmem:[%s3003_s30 + $0xe8] sm:$0x7]  ;;  %v747_v44 = vld [vmem:[%s3003_s30 + $0xec] sm:$0x7]  ;;  %v1126_v22 = vstv %s3290_s8  ;;  %v967_v24 = vstv %s3274_s1  ;;  %5024 = sst [smem:[#allocation31_spill]] %s3364_s20  ;;  %s5025_s8 = sld [smem:[#allocation32_spill]] }
  0xce   : > { %v867_v46 = vsel %vm558_vm0, %v746_v41, 0.0  ;;  %v869_v49 = vsel %vm558_vm0, %v747_v44, 0.0  ;;  %5027 = sst [smem:[#allocation43_spill]] %s3374_s0  ;;  %v1085_v32 = vstv %s5021_s5  ;;  %s3382_s1 = sld [smem:[#allocation4 + $0x2b]]  ;;  %v1138_v41 = vstv %s3309_s7 }
  0xcf   : > { %v677_v56 = vadd.f32 %v676_v47, %v675_v50  ;;  %v854_v30 = vadd.f32 %v853_v25, %v852_v27  ;;  %v748_v47 = vld [vmem:[%s3003_s30 + $0xf0] sm:$0x7]  ;;  %v749_v50 = vld [vmem:[%s3003_s30 + $0xf4] sm:$0x7]  ;;  %v1024_v25 = vstv %s3276_s2  ;;  %v916_v27 = vstv %s3280_s4  ;;  %s3384_s2 = sld [smem:[#allocation4 + $0x2e]]  ;;  %s3392_s5 = sld [smem:[#allocation4 + $0x2a]] }
  0xd0   : > { %v871_v52 = vsel %vm558_vm0, %v748_v47, 0.0  ;;  %v873_v55 = vsel %vm558_vm0, %v749_v50, 0.0  ;;  %v1130_v35 = vstv %s5022_s26  ;;  %s3420_s7 = sld [smem:[#allocation4 + $0x2f]]  ;;  %s3453_s23 = sld [smem:[#allocation4 + $0x35]]  ;;  %v1366_v44 = vstv %s3434_s10 }
  0xd1   : > { %v679_v62 = vadd.f32 %v678_v53, %v677_v56  ;;  %v856_v33 = vadd.f32 %v855_v28, %v854_v30  ;;  %v750_v53 = vld [vmem:[%s3003_s30 + $0xf8] sm:$0x7]  ;;  %v751_v56 = vld [vmem:[%s3003_s30 + $0xfc] sm:$0x7]  ;;  %s3288_s30 = sld [smem:[#allocation4 + $0x18]]  ;;  %v971_v28 = vstv %s3282_s6  ;;  %v1081_v30 = vstv %s3278_s3  ;;  %s3390_s3 = sld [smem:[#allocation6 + $0x6]] }
  0xd2   : > { %v875_v58 = vsel %vm558_vm0, %v750_v53, 0.0  ;;  %v877_v60 = vsel %vm558_vm0, %v751_v56, 0.0  ;;  %s3536_s10 = sld [smem:[#allocation4 + $0x39]]  ;;  %s3560_s0 = sld [smem:[#allocation4 + $0x3b]] }
  0xd3   : > { %v681_v3 = vadd.f32 %v680_v59, %v679_v62  ;;  %v858_v36 = vadd.f32 %v857_v31, %v856_v33  ;;  %s3573_s26 = sld [smem:[#allocation6 + $0x9]]  ;;  %s3597_s6 = sld [smem:[#allocation4 + $0x3e]] }
  0xd4   : > { %s5050_s4 = smov 127  }
  0xd5   : > { %v683_v8 = vadd.f32 %v682_v1, %v681_v3  ;;  %v860_v39 = vadd.f32 %v859_v34, %v858_v36  ;;  %v900_v1 = vstv %s3242_s15  ;;  %v3306_v3 = vand.u32 127, %v880_v0  ;;  %s3316_s15 = sld [smem:[#allocation4 + $0x1e]] }
  0xd6   : > { %v1244_v0 = vstv %s3364_s20  ;;  %s3470_s20 = sld [smem:[#allocation6 + $0x8]] }
  0xd7   : > { %v685_v12 = vadd.f32 %v684_v6, %v683_v8  ;;  %v862_v42 = vadd.f32 %v861_v37, %v860_v39  ;;  %v897_v6 = vstv %s3240_s14  ;;  %v952_v8 = vstv %s3244_s16  ;;  %s3338_s16 = sld [smem:[#allocation4 + $0x22]]  ;;  %s5023_s14 = sld [smem:[#allocation33_spill]] }
  0xd8   : > { %vm882_vm1 = vcmp.gt.s32.totalorder %v3306_v3, 0  ;;  %vm883_vm2 = vcmp.lt.s32.totalorder %v3306_v3, 127  ;;  %v1123_v33 = vstv %s3288_s30  ;;  %v975_v37 = vstv %s3298_s27  ;;  %s3550_s30 = sld [smem:[#allocation4 + $0x3d]]  ;;  %s3616_s27 = sld [smem:[#allocation6 + $0xa]] }
  0xd9   : > { %v3199_v16 = vmul.f32 0.015625, %v685_v12  ;;  %v864_v45 = vadd.f32 %v863_v40, %v862_v42  ;;  %v1134_v39 = vstv %s5025_s8  ;;  %v1142_v42 = vstv %s3311_s11  ;;  %s3492_s11 = sld [smem:[#allocation4 + $0x37]]  ;;  %5041 = sst [smem:[#allocation19_spill]] %s3573_s26 }
  0xda   : > { %s5051_s8 = smov 1  }
  0xdb   : > { %884 = vrot.lane.b32.xlu0 %v3199_v16, %s4934_s12  ;;  %v866_v48 = vadd.f32 %v865_v43, %v864_v45  ;;  %v3320_v7 = vmul.f32 %v900_v1, %v3199_v16  ;;  %v3324_v9 = vmul.f32 %v955_v2, %v3199_v16  ;;  %v3333_v12 = vmul.f32 %v1012_v4, %v3199_v16 }
  0xdc   : > { %v3344_v17 = vmul.f32 %v1069_v5, %v3199_v16  ;;  %v3379_v34 = vmul.f32 %v1126_v22, %v3199_v16  ;;  %v1183_v43 = vstv %s3326_s17  ;;  %v1180_v45 = vstv %s3316_s15  ;;  %s3432_s17 = sld [smem:[#allocation4 + $0x30]] }
  0xdd   : > { %v868_v51 = vadd.f32 %v867_v46, %v866_v48  ;;  %v920_v36 = vstv %s5023_s14  ;;  %v1187_v46 = vstv %s3328_s19  ;;  %v1195_v47 = vstv %s3338_s16  ;;  %s3404_s14 = sld [smem:[#allocation4 + $0x2d]]  ;;  %s3422_s16 = sld [smem:[#allocation6 + $0x7]] }
  0xde   : > { %v3428_v53 = vmul.f32 %v1183_v43, %v3199_v16  ;;  %s3451_s19 = sld [smem:[#allocation4 + $0x33]]  ;;  %v1297_v5 = vstv %s3382_s1  ;;  %v1309_v22 = vstv %s3384_s2  ;;  %s3482_s1 = sld [smem:[#allocation4 + $0x36]] }
  0xdf   : > { %887 = vrot.lane.b32.xlu0 %v3199_v16, %s4936_s13  ;;  %v870_v54 = vadd.f32 %v869_v49, %v868_v51  ;;  %s3585_s15 = sld [smem:[#allocation4 + $0x40]]  ;;  %s3652_s2 = sld [smem:[#allocation4 + $0x45]] }
  0xe1   : > { %v872_v57 = vadd.f32 %v871_v52, %v870_v54  ;;  %v1191_v54 = vstv %s3336_s22  ;;  %s3504_s22 = sld [smem:[#allocation4 + $0x38]] }
  0xe2   : > { %v1351_v4 = vstv %s3432_s17  ;;  %s5058_s17 = sld [smem:[#allocation43_spill]] }
  0xe3   : > { %v874_v59 = vadd.f32 %v873_v55, %v872_v57  ;;  %v1240_v55 = vstv %s3357_s25  ;;  %s3575_s25 = sld [smem:[#allocation4 + $0x3c]] }
  0xe4   : > { %v3456_v2 = vmul.f32 %v1240_v55, %v3199_v16  ;;  %v3485_v55 = vmul.f32 %v1297_v5, %v3199_v16 }
  0xe5   : > { %v876_v61 = vadd.f32 %v875_v58, %v874_v59  ;;  %v1362_v59 = vstv %s3451_s19  ;;  %s3760_s19 = sld [smem:[#allocation4 + $0x50]] }
  0xe7   : > { %v878_v62 = vadd.f32 %v877_v60, %v876_v61  ;;  %v1252_v60 = vstv %s3366_s29  ;;  %s3639_s29 = sld [smem:[#allocation4 + $0x44]] }
  0xe9   : > { %v3234_v63 = vmul.f32 0.015625, %v878_v62  ;;  %v1237_v62 = vstv %s3355_s18  ;;  %s3637_s18 = sld [smem:[#allocation4 + $0x43]] }
  0xeb   : > { %890 = vrot.lane.b32.xlu1 %v3234_v63, %s4934_s12  ;;  %s3268_s12 = sld [smem:[#allocation4 + $0xf]]  ;;  %v3409_v48 = vmul.f32 %v912_v23, %v3234_v63  ;;  %v3412_v49 = vmul.f32 %v967_v24, %v3234_v63  ;;  %v3415_v50 = vmul.f32 %v1024_v25, %v3234_v63  ;;  %v3418_v51 = vmul.f32 %v1081_v30, %v3234_v63 }
  0xec   : > { %v3425_v52 = vmul.f32 %v1138_v41, %v3234_v63  ;;  %v3437_v57 = vmul.f32 %v1195_v47, %v3234_v63  ;;  %v3466_v24 = vmul.f32 %v1252_v60, %v3234_v63  ;;  %v1294_v30 = vstv %s3392_s5  ;;  %s5052_s5 = sld [smem:[#allocation41_spill]] }
  0xed   : > { %v1301_v47 = vstv %s3398_s21  ;;  %v3489_v60 = vmul.f32 %v1309_v22, %v3234_v63  ;;  %v1370_v25 = vstv %s3453_s23  ;;  %s3692_s21 = sld [smem:[#allocation4 + $0x48]]  ;;  %s3809_s23 = sld [smem:[#allocation4 + $0x5a]] }
  0xef   : > { %893 = vrot.lane.b32.xlu1 %v3234_v63, %s4936_s13  ;;  %s3270_s13 = sld [smem:[#allocation4 + $0x15]] }
  0xf1   : > { %5006 = sst [smem:[#allocation28_spill]] %s3268_s12  ;;  %v1020_v21 = vstv %s3268_s12  ;;  %s3372_s12 = sld [smem:[#allocation4 + $0x27]] }
  0xf5   : > { %v1077_v26 = vstv %s3270_s13  ;;  %s3713_s13 = sld [smem:[#allocation4 + $0x4a]] }
  0xf7   : > { %5026 = sst [smem:[#allocation32_spill]] %s3372_s12  ;;  %v1248_v1 = vstv %s3372_s12 }
  0xf8   : > { %s3538_s12 = sld [smem:[#allocation4 + $0x3a]] }
 0x14d   : > { %v885_v31 = vpop.permute.xlu0 %884 }
 0x14e   : > { %v3446_v61 = vsel %vm882_vm1, %v885_v31, 0.0 }
 0x14f   : > { %v898_v31 = vmul.f32 %v897_v6, %v3446_v61  ;;  %v953_v41 = vmul.f32 %v952_v8, %v3446_v61  ;;  %v1010_v43 = vmul.f32 %v1009_v11, %v3446_v61  ;;  %v1354_v6 = vstv %s3406_s24  ;;  %s3607_s24 = sld [smem:[#allocation4 + $0x41]] }
 0x150   : > { %v1067_v22 = vmul.f32 %v1066_v13, %v3446_v61  ;;  %v3516_v40 = vmul.f32 %v1354_v6, %v3199_v16  ;;  %v1358_v13 = vstv %s3442_s9  ;;  %v1374_v6 = vstv %s3470_s20  ;;  %s5057_s9 = sld [smem:[#allocation38_spill]]  ;;  %s3873_s20 = sld [smem:[#allocation4 + $0x59]] }
 0x151   : > { %v888_v56 = vpop.permute.xlu0 %887 }
 0x152   : > { %v3463_v23 = vsel %vm883_vm2, %v888_v56, 0.0  ;;  %v902_v56 = vadd.f32 %v3320_v7, %v898_v31 }
 0x153   : > { %v905_v8 = vmul.f32 %v904_v10, %v3463_v23  ;;  %v960_v11 = vmul.f32 %v959_v14, %v3463_v23  ;;  %v1017_v5 = vmul.f32 %v1016_v15, %v3463_v23  ;;  %v957_v10 = vadd.f32 %v3324_v9, %v953_v41 }
 0x154   : > { %v1014_v14 = vadd.f32 %v3333_v12, %v1010_v43  ;;  %v1074_v15 = vmul.f32 %v1073_v18, %v3463_v23  ;;  %v3525_v12 = vmul.f32 %v1366_v44, %v3234_v63  ;;  %v1071_v18 = vadd.f32 %v3344_v17, %v1067_v22 }
 0x155   : > { %v906_v7 = vadd.f32 %v905_v8, %v902_v56  ;;  %v961_v31 = vadd.f32 %v960_v11, %v957_v10  ;;  %v1124_v43 = vmul.f32 %v1123_v33, %v3446_v61  ;;  %v1408_v17 = vstv %s3482_s1  ;;  %s3729_s1 = sld [smem:[#allocation4 + $0x4f]] }
 0x156   : > { %v1018_v9 = vadd.f32 %v1017_v5, %v1014_v14  ;;  %v1075_v33 = vadd.f32 %v1074_v15, %v1071_v18  ;;  %v1131_v11 = vmul.f32 %v1130_v35, %v3463_v23  ;;  %v1181_v35 = vmul.f32 %v1180_v45, %v3446_v61 }
 0x157   : > { %v1238_v15 = vmul.f32 %v1237_v62, %v3446_v61 }
 0x15d   : > { %v891_v58 = vpop.permute.xlu1 %890 }
 0x15e   : > { %v3529_v41 = vsel %vm882_vm1, %v891_v58, 0.0 }
 0x15f   : > { %v909_v56 = vmul.f32 %v908_v19, %v3529_v41  ;;  %v964_v44 = vmul.f32 %v963_v20, %v3529_v41  ;;  %v1021_v58 = vmul.f32 %v1020_v21, %v3529_v41  ;;  %v1078_v8 = vmul.f32 %v1077_v26, %v3529_v41 }
 0x160   : > { %v1411_v19 = vstv %s3492_s11  ;;  %v1415_v21 = vstv %s3504_s22  ;;  %v1128_v26 = vadd.f32 %v3379_v34, %v1124_v43  ;;  %v1135_v18 = vmul.f32 %v1134_v39, %v3529_v41  ;;  %s3605_s11 = sld [smem:[#allocation4 + $0x3f]]  ;;  %s5061_s22 = sld [smem:[#allocation42_spill]] }
 0x161   : > { %v894_v5 = vpop.permute.xlu1 %893  ;;  %v910_v20 = vadd.f32 %v909_v56, %v906_v7  ;;  %v965_v22 = vadd.f32 %v964_v44, %v961_v31  ;;  %v1022_v10 = vadd.f32 %v1021_v58, %v1018_v9  ;;  %v1079_v62 = vadd.f32 %v1078_v8, %v1075_v33 }
 0x162   : > { %v3564_v14 = vsel %vm883_vm2, %v894_v5, 0.0  ;;  %v1132_v9 = vadd.f32 %v1131_v11, %v1128_v26  ;;  %v1185_v56 = vadd.f32 %v3428_v53, %v1181_v35  ;;  %v3601_v44 = vmul.f32 %v1411_v19, %v3199_v16 }
 0x163   : > { %v914_v7 = vadd.f32 %v3409_v48, %v910_v20  ;;  %v917_v31 = vmul.f32 %v916_v27, %v3564_v14  ;;  %v969_v34 = vadd.f32 %v3412_v49, %v965_v22  ;;  %v972_v45 = vmul.f32 %v971_v28, %v3564_v14 }
 0x164   : > { %v1188_v48 = vmul.f32 %v1187_v46, %v3463_v23  ;;  %v1026_v49 = vadd.f32 %v3415_v50, %v1022_v10  ;;  %v1029_v28 = vmul.f32 %v1028_v29, %v3564_v14  ;;  %v1419_v39 = vstv %s3536_s10  ;;  %s3793_s10 = sld [smem:[#allocation4 + $0x56]] }
 0x165   : > { %v918_v27 = vadd.f32 %v917_v31, %v914_v7  ;;  %v973_v43 = vadd.f32 %v972_v45, %v969_v34  ;;  %v1423_v58 = vstv %s3538_s12  ;;  %v1242_v29 = vadd.f32 %v3456_v2, %v1238_v15  ;;  %s3629_s12 = sld [smem:[#allocation4 + $0x42]] }
 0x166   : > { %v1245_v50 = vmul.f32 %v1244_v0, %v3463_v23  ;;  %v1468_v53 = vstv %s3550_s30  ;;  %v1083_v33 = vadd.f32 %v3418_v51, %v1079_v62  ;;  %v1136_v8 = vadd.f32 %v1135_v18, %v1132_v9  ;;  %s3676_s30 = sld [smem:[#allocation4 + $0x47]] }
 0x167   : > { %v921_v46 = vadd.f32 %v920_v36, %v918_v27  ;;  %v1189_v11 = vadd.f32 %v1188_v48, %v1185_v56  ;;  %v1192_v19 = vmul.f32 %v1191_v54, %v3529_v41  ;;  %v976_v36 = vadd.f32 %v975_v37, %v973_v43 }
 0x168   : > { %v1030_v2 = vadd.f32 %v1029_v28, %v1026_v49  ;;  %v1086_v0 = vmul.f32 %v1085_v32, %v3564_v14  ;;  %v3632_v51 = vmul.f32 %v1423_v58, %v3234_v63  ;;  %v1427_v20 = vstv %s3560_s0  ;;  %s3837_s0 = sld [smem:[#allocation4 + $0x57]] }
 0x169   : > { %v3622_v5 = vmax.f32 %v921_v46, 0.0  ;;  %v1431_v22 = vstv %s3573_s26  ;;  %v1465_v10 = vstv %s3575_s25  ;;  %v1246_v32 = vadd.f32 %v1245_v50, %v1242_v29  ;;  %s3654_s26 = sld [smem:[#allocation4 + $0x46]]  ;;  %s3762_s25 = sld [smem:[#allocation4 + $0x51]] }
 0x16a   : > { %v1295_v37 = vmul.f32 %v1294_v30, %v3446_v61  ;;  %v3649_v54 = vmul.f32 %v1468_v53, %v3199_v16  ;;  %v1480_v26 = vstv %s3585_s15  ;;  %v1140_v35 = vadd.f32 %v3425_v52, %v1136_v8  ;;  %s5053_s15 = sld [smem:[#allocation36_spill]] }
 0x16b   : > { %940 = vrot.lane.b32.xlu1 %v3622_v5, %s5050_s4  ;;  %923 = vrot.lane.b32.xlu0 %v3622_v5, %s5051_s8  ;;  %v1143_v15 = vmul.f32 %v1142_v42, %v3564_v14  ;;  %v1193_v7 = vadd.f32 %v1192_v19, %v1189_v11  ;;  %v1249_v30 = vmul.f32 %v1248_v1, %v3529_v41  ;;  %v3663_v31 = vmax.f32 %v976_v36, 0.0 }
 0x16c   : > { %v1033_v34 = vadd.f32 %v1032_v38, %v1030_v2  ;;  %v1087_v45 = vadd.f32 %v1086_v0, %v1083_v33  ;;  %v1302_v62 = vmul.f32 %v1301_v47, %v3463_v23  ;;  %v1472_v9 = vstv %s3597_s6  ;;  %s3694_s6 = sld [smem:[#allocation4 + $0x49]] }
 0x16d   : > { %v1476_v52 = vstv %s3605_s11  ;;  %v3673_v42 = vmul.f32 %v1480_v26, %v3234_v63  ;;  %v1484_v18 = vstv %s3607_s24  ;;  %v1299_v38 = vadd.f32 %v3485_v55, %v1295_v37  ;;  %s3821_s11 = sld [smem:[#allocation4 + $0x5c]]  ;;  %s3865_s24 = sld [smem:[#allocation4 + $0x5d]] }
 0x16e   : > { %v1352_v1 = vmul.f32 %v1351_v4, %v3446_v61  ;;  %v1359_v47 = vmul.f32 %v1358_v13, %v3463_v23  ;;  %v1488_v48 = vstv %s3616_s27  ;;  %v1144_v27 = vadd.f32 %v1143_v15, %v1140_v35  ;;  %s2622_s27 = sld [smem:[#allocation6 + $0xe]] }
 0x16f   : > { %997 = vrot.lane.b32.xlu1 %v3663_v31, %s5050_s4  ;;  %978 = vrot.lane.b32.xlu0 %v3663_v31, %s5051_s8  ;;  %v1197_v43 = vadd.f32 %v3437_v57, %v1193_v7  ;;  %v5054_v49 = vstv %s5052_s5  ;;  %v1250_v28 = vadd.f32 %v1249_v30, %v1246_v32  ;;  %v3700_v4 = vmax.f32 %v1033_v34, 0.0  ;;  %s3715_s5 = sld [smem:[#allocation4 + $0x4b]] }
 0x170   : > { %v1200_v55 = vmul.f32 %v5054_v49, %v3564_v14  ;;  %v5055_v56 = vstv %s5053_s15  ;;  %v1303_v13 = vadd.f32 %v1302_v62, %v1299_v38  ;;  %v5056_v46 = vstv %s3404_s14  ;;  %s3727_s14 = sld [smem:[#allocation4 + $0x4c]] }
 0x171   : > { %v1090_v58 = vadd.f32 %v5055_v56, %v1087_v45  ;;  %v1306_v29 = vmul.f32 %v5056_v46, %v3529_v41  ;;  %v1409_v50 = vmul.f32 %v1408_v17, %v3446_v61  ;;  %v1522_v57 = vstv %s3629_s12  ;;  %s3748_s12 = sld [smem:[#allocation4 + $0x4d]]  ;;  %s3781_s15 = sld [smem:[#allocation4 + $0x54]] }
 0x172   : > { %v1525_v53 = vstv %s3637_s18  ;;  %v1529_v33 = vstv %s3639_s29  ;;  %v1356_v8 = vadd.f32 %v3516_v40, %v1352_v1  ;;  %v1416_v17 = vmul.f32 %v1415_v21, %v3463_v23  ;;  %s3750_s18 = sld [smem:[#allocation4 + $0x4e]]  ;;  %s3779_s29 = sld [smem:[#allocation4 + $0x52]] }
 0x173   : > { %1054 = vrot.lane.b32.xlu1 %v3700_v4, %s5050_s4  ;;  %1035 = vrot.lane.b32.xlu0 %v3700_v4, %s5051_s8  ;;  %v1533_v11 = vstv %s3652_s2  ;;  %v1537_v19 = vstv %s3654_s26  ;;  %v1201_v0 = vadd.f32 %v1200_v55, %v1197_v43  ;;  %v1254_v32 = vadd.f32 %v3466_v24, %v1250_v28  ;;  %s3851_s2 = sld [smem:[#allocation4 + $0x58]]  ;;  %s4022_s26 = sld [smem:[#allocation8 + $0xb]] }
 0x174   : > { %v5059_v36 = vstv %s5057_s9  ;;  %v5060_v37 = vstv %s5058_s17  ;;  %v3737_v26 = vmax.f32 %v1090_v58, 0.0  ;;  %v1307_v21 = vadd.f32 %v1306_v29, %v1303_v13  ;;  %s3910_s9 = sld [smem:[#allocation6 + $0xd]]  ;;  %s2443_s17 = sld [smem:[#allocation8 + $0x1]] }
 0x175   : > { %v1147_v2 = vadd.f32 %v5059_v36, %v1144_v27  ;;  %v1257_v40 = vmul.f32 %v5060_v37, %v3564_v14  ;;  %v1360_v35 = vadd.f32 %v1359_v47, %v1356_v8  ;;  %v1363_v15 = vmul.f32 %v1362_v59, %v3529_v41 }
 0x176   : > { %v1413_v7 = vadd.f32 %v3601_v44, %v1409_v50  ;;  %v1466_v30 = vmul.f32 %v1465_v10, %v3446_v61  ;;  %v1541_v34 = vstv %s3676_s30  ;;  %v1545_v24 = vstv %s3678_s28  ;;  %s3903_s30 = sld [smem:[#allocation4 + $0x5f]] }
 0x177   : > { %1111 = vrot.lane.b32.xlu1 %v3737_v26, %s5050_s4  ;;  %1092 = vrot.lane.b32.xlu0 %v3737_v26, %s5051_s8  ;;  %v1473_v59 = vmul.f32 %v1472_v9, %v3463_v23  ;;  %v1526_v44 = vmul.f32 %v1525_v53, %v3199_v16  ;;  %v1579_v10 = vstv %s3692_s21  ;;  %v1582_v45 = vstv %s3694_s6  ;;  %s3877_s21 = sld [smem:[#allocation4 + $0x5e]]  ;;  %s3887_s6 = sld [smem:[#allocation6 + $0xc]] }
 0x178   : > { %v3764_v62 = vmax.f32 %v1147_v2, 0.0  ;;  %v5062_v38 = vstv %s5061_s22  ;;  %v1258_v47 = vadd.f32 %v1257_v40, %v1254_v32  ;;  %v1417_v27 = vadd.f32 %v1416_v17, %v1413_v7  ;;  %s2635_s28 = sld [smem:[#allocation6 + $0xf]]  ;;  %s2446_s22 = sld [smem:[#allocation9 + $0x2]] }
 0x179   : > { %v1204_v1 = vadd.f32 %v5062_v38, %v1201_v0  ;;  %v1311_v9 = vadd.f32 %v3489_v60, %v1307_v21  ;;  %v5063_v43 = vstv %s3420_s7  ;;  %v1364_v55 = vadd.f32 %v1363_v15, %v1360_v35  ;;  %s3791_s7 = sld [smem:[#allocation4 + $0x55]] }
 0x17a   : > { %v1314_v49 = vmul.f32 %v5063_v43, %v3564_v14  ;;  %v1420_v28 = vmul.f32 %v1419_v39, %v3529_v41  ;;  %v1470_v56 = vadd.f32 %v3649_v54, %v1466_v30  ;;  %v1523_v58 = vmul.f32 %v1522_v57, %v3446_v61 }
 0x17b   : > { %v1586_v13 = vstv %s3713_s13  ;;  %v1590_v46 = vstv %s3715_s5  ;;  %1168 = vrot.lane.b32.xlu1 %v3764_v62, %s5050_s4  ;;  %1149 = vrot.lane.b32.xlu0 %v3764_v62, %s5051_s8  ;;  %v1530_v60 = vmul.f32 %v1529_v33, %v3463_v23  ;;  %v1583_v39 = vmul.f32 %v1582_v45, %v3199_v16  ;;  %s2444_s13 = sld [smem:[#allocation9 + $0x1]]  ;;  %s926_s5 = sld [smem:[#allocation8]] }
 0x17c   : > { %v1594_v54 = vstv %s3727_s14  ;;  %v1639_v29 = vstv %s3729_s1  ;;  %v3795_v50 = vmax.f32 %v1204_v1, 0.0  ;;  %v5064_v57 = vstv %s3390_s3  ;;  %s3819_s3 = sld [smem:[#allocation4 + $0x5b]]  ;;  %s929_s14 = sld [smem:[#allocation9]] }
 0x17d   : > { %v1261_v53 = vadd.f32 %v5064_v57, %v1258_v47  ;;  %v1371_v8 = vmul.f32 %v1370_v25, %v3564_v14  ;;  %v1474_v33 = vadd.f32 %v1473_v59, %v1470_v56  ;;  %v1315_v17 = vadd.f32 %v1314_v49, %v1311_v9  ;;  %s2445_s1 = sld [smem:[#allocation8 + $0x2]] }
 0x17e   : > { %v1368_v36 = vadd.f32 %v3525_v12, %v1364_v55  ;;  %v1421_v2 = vadd.f32 %v1420_v28, %v1417_v27  ;;  %v1477_v0 = vmul.f32 %v1476_v52, %v3529_v41  ;;  %v1527_v32 = vadd.f32 %v1526_v44, %v1523_v58 }
 0x17f   : > { %v1580_v37 = vmul.f32 %v1579_v10, %v3446_v61  ;;  %v1598_v40 = vstv %s3748_s12  ;;  %v1636_v21 = vstv %s3750_s18  ;;  %1225 = vrot.lane.b32.xlu1 %v3795_v50, %s5050_s4  ;;  %1206 = vrot.lane.b32.xlu0 %v3795_v50, %s5051_s8  ;;  %v1587_v25 = vmul.f32 %v1586_v13, %v3463_v23  ;;  %s3966_s12 = sld [smem:[#allocation8 + $0x3]] }
 0x180   : > { %v1640_v12 = vmul.f32 %v1639_v29, %v3199_v16  ;;  %v1643_v52 = vstv %s3760_s19  ;;  %v1647_v35 = vstv %s3762_s25  ;;  %v3823_v15 = vmax.f32 %v1261_v53, 0.0  ;;  %s3968_s18 = sld [smem:[#allocation9 + $0x3]]  ;;  %s3970_s19 = sld [smem:[#allocation8 + $0x4]] }
 0x181   : > { %v1428_v7 = vmul.f32 %v1427_v20, %v3564_v14  ;;  %v1531_v30 = vadd.f32 %v1530_v60, %v1527_v32  ;;  %v1534_v59 = vmul.f32 %v1533_v11, %v3529_v41  ;;  %v5065_v44 = vstv %s3422_s16  ;;  %s3847_s16 = sld [smem:[#allocation4 + $0x53]]  ;;  %s3972_s25 = sld [smem:[#allocation9 + $0x4]] }
 0x182   : > { %v1318_v10 = vadd.f32 %v5065_v44, %v1315_v17  ;;  %v1372_v45 = vadd.f32 %v1371_v8, %v1368_v36  ;;  %v1425_v38 = vadd.f32 %v3632_v51, %v1421_v2  ;;  %v1478_v1 = vadd.f32 %v1477_v0, %v1474_v33 }
 0x183   : > { %v1584_v47 = vadd.f32 %v1583_v39, %v1580_v37  ;;  %v1637_v27 = vmul.f32 %v1636_v21, %v3446_v61  ;;  %v1651_v9 = vstv %s3779_s29  ;;  %v1693_v43 = vstv %s3781_s15  ;;  %1282 = vrot.lane.b32.xlu1 %v3823_v15, %s5050_s4  ;;  %1263 = vrot.lane.b32.xlu0 %v3823_v15, %s5051_s8  ;;  %s3984_s29 = sld [smem:[#allocation8 + $0x6]] }
 0x184   : > { %v1538_v20 = vmul.f32 %v1537_v19, %v3234_v63  ;;  %v1644_v51 = vmul.f32 %v1643_v52, %v3463_v23  ;;  %v1696_v11 = vstv %s3791_s7  ;;  %v1700_v49 = vstv %s3793_s10  ;;  %s3986_s15 = sld [smem:[#allocation9 + $0x6]]  ;;  %s3990_s7 = sld [smem:[#allocation8 + $0x7]] }
 0x185   : > { %v1485_v55 = vmul.f32 %v1484_v18, %v3564_v14  ;;  %v1535_v28 = vadd.f32 %v1534_v59, %v1531_v30  ;;  %v1588_v56 = vadd.f32 %v1587_v25, %v1584_v47  ;;  %v1591_v58 = vmul.f32 %v1590_v46, %v3529_v41  ;;  %s3992_s10 = sld [smem:[#allocation9 + $0x7]] }
 0x186   : > { %v3857_v13 = vmax.f32 %v1318_v10, 0.0  ;;  %v1375_v19 = vadd.f32 %v1374_v6, %v1372_v45  ;;  %v1429_v60 = vadd.f32 %v1428_v7, %v1425_v38  ;;  %v1482_v39 = vadd.f32 %v3673_v42, %v1478_v1 }
 0x187   : > { %v1641_v29 = vadd.f32 %v1640_v12, %v1637_v27  ;;  %v1694_v57 = vmul.f32 %v1693_v43, %v3446_v61  ;;  %v1697_v53 = vmul.f32 %v1696_v11, %v3199_v16  ;;  %v1750_v18 = vstv %s3809_s23  ;;  %s3998_s23 = sld [smem:[#allocation8 + $0x8]] }
 0x188   : > { %1339 = vrot.lane.b32.xlu1 %v3857_v13, %s5050_s4  ;;  %1320 = vrot.lane.b32.xlu0 %v3857_v13, %s5051_s8  ;;  %v1595_v6 = vmul.f32 %v1594_v54, %v3234_v63  ;;  %v1701_v42 = vmul.f32 %v1700_v49, %v3463_v23  ;;  %v1753_v46 = vstv %s3819_s3  ;;  %v1757_v8 = vstv %s3821_s11  ;;  %s4000_s3 = sld [smem:[#allocation9 + $0x8]]  ;;  %s4006_s11 = sld [smem:[#allocation8 + $0x9]] }
 0x189   : > { %v1539_v33 = vadd.f32 %v1538_v20, %v1535_v28  ;;  %v1542_v17 = vmul.f32 %v1541_v34, %v3564_v14  ;;  %v1592_v36 = vadd.f32 %v1591_v58, %v1588_v56  ;;  %v1645_v2 = vadd.f32 %v1644_v51, %v1641_v29 }
 0x18a   : > { %v3882_v0 = vmax.f32 %v1375_v19, 0.0  ;;  %v1432_v54 = vadd.f32 %v1431_v22, %v1429_v60  ;;  %v1486_v32 = vadd.f32 %v1485_v55, %v1482_v39  ;;  %v1648_v37 = vmul.f32 %v1647_v35, %v3529_v41 }
 0x18b   : > { %v1698_v21 = vadd.f32 %v1697_v53, %v1694_v57  ;;  %v1704_v25 = vstv %s3837_s0  ;;  %v1751_v12 = vmul.f32 %v1750_v18, %v3446_v61  ;;  %v1754_v34 = vmul.f32 %v1753_v46, %v3199_v16  ;;  %s4008_s0 = sld [smem:[#allocation9 + $0x9]] }
 0x18c   : > { %1396 = vrot.lane.b32.xlu1 %v3882_v0, %s5050_s4  ;;  %1377 = vrot.lane.b32.xlu0 %v3882_v0, %s5051_s8  ;;  %v1652_v22 = vmul.f32 %v1651_v9, %v3234_v63  ;;  %v1655_v52 = vstv %s3847_s16  ;;  %v1708_v35 = vstv %s3851_s2  ;;  %v1758_v7 = vmul.f32 %v1757_v8, %v3463_v23  ;;  %s4016_s16 = sld [smem:[#allocation8 + $0xa]] }
 0x18d   : > { %v1543_v30 = vadd.f32 %v1542_v17, %v1539_v33  ;;  %v1596_v59 = vadd.f32 %v1595_v6, %v1592_v36  ;;  %v1599_v16 = vmul.f32 %v1598_v40, %v3564_v14  ;;  %v1702_v61 = vadd.f32 %v1701_v42, %v1698_v21  ;;  %s4018_s2 = sld [smem:[#allocation9 + $0xa]] }
 0x18e   : > { %v3905_v44 = vmax.f32 %v1432_v54, 0.0  ;;  %v1489_v10 = vadd.f32 %v1488_v48, %v1486_v32  ;;  %v1649_v45 = vadd.f32 %v1648_v37, %v1645_v2  ;;  %v1705_v38 = vmul.f32 %v1704_v25, %v3529_v41 }
 0x18f   : > { %v1755_v23 = vadd.f32 %v1754_v34, %v1751_v12  ;;  %v1761_v1 = vstv %s3865_s24  ;;  %v1709_v40 = vmul.f32 %v1708_v35, %v3234_v63  ;;  %v1712_v47 = vstv %s3873_s20  ;;  %s4024_s24 = sld [smem:[#allocation9 + $0xb]]  ;;  %s4030_s20 = sld [smem:[#allocation8 + $0xc]] }
 0x190   : > { %1453 = vrot.lane.b32.xlu1 %v3905_v44, %s5050_s4  ;;  %1434 = vrot.lane.b32.xlu0 %v3905_v44, %s5051_s8  ;;  %v1765_v27 = vstv %s3877_s21  ;;  %v1546_v48 = vadd.f32 %v1545_v24, %v1543_v30  ;;  %v1600_v9 = vadd.f32 %v1599_v16, %v1596_v59  ;;  %v1656_v43 = vmul.f32 %v1655_v52, %v3564_v14  ;;  %s4032_s21 = sld [smem:[#allocation9 + $0xc]] }
 0x191   : > { %v1759_v20 = vadd.f32 %v1758_v7, %v1755_v23  ;;  %v3923_v51 = vmax.f32 %v1489_v10, 0.0  ;;  %v1653_v11 = vadd.f32 %v1652_v22, %v1649_v45  ;;  %v1706_v49 = vadd.f32 %v1705_v38, %v1702_v61 }
 0x192   : > { %v1762_v55 = vmul.f32 %v1761_v1, %v3529_v41  ;;  %v1602_v28 = vstv %s3887_s6  ;;  %v3931_v24 = vmax.f32 %v1546_v48, 0.0  ;;  %v1713_v56 = vmul.f32 %v1712_v47, %v3564_v14  ;;  %s4040_s6 = sld [smem:[#allocation8 + $0xd]] }
 0x193   : > { %v1766_v58 = vmul.f32 %v1765_v27, %v3234_v63  ;;  %v1769_v19 = vstv %s3903_s30  ;;  %v1603_v60 = vadd.f32 %v1602_v28, %v1600_v9  ;;  %v1657_v39 = vadd.f32 %v1656_v43, %v1653_v11  ;;  %s4042_s30 = sld [smem:[#allocation9 + $0xd]] }
 0x194   : > { %1510 = vrot.lane.b32.xlu1 %v3923_v51, %s5050_s4  ;;  %1491 = vrot.lane.b32.xlu0 %v3923_v51, %s5051_s8  ;;  %v1710_v29 = vadd.f32 %v1709_v40, %v1706_v49  ;;  %v1763_v57 = vadd.f32 %v1762_v55, %v1759_v20  ;;  %v1659_v41 = vstv %s3910_s9  ;;  %v1770_v53 = vmul.f32 %v1769_v19, %v3564_v14  ;;  %s4046_s9 = sld [smem:[#allocation8 + $0xe]] }
 0x195   : > { %v3942_v18 = vmax.f32 %v1603_v60, 0.0  ;;  %v1660_v6 = vadd.f32 %v1659_v41, %v1657_v39  ;;  %v1716_v46 = vstv %s2622_s27  ;;  %v1773_v36 = vstv %s2635_s28  ;;  %s4048_s27 = sld [smem:[#allocation9 + $0xe]]  ;;  %s4054_s28 = sld [smem:[#allocation8 + $0xf]] }
 0x196   : > { %v1714_v42 = vadd.f32 %v1713_v56, %v1710_v29  ;;  %v1767_v63 = vadd.f32 %v1766_v58, %v1763_v57  ;;  %v927_v32 = vstv %s926_s5  ;;  %v930_v37 = vstv %s929_s14  ;;  %s4066_s5 = sld [smem:[#allocation9 + $0x10]]  ;;  %s4070_s14 = sld [smem:[#allocation8 + $0x11]] }
 0x197   : > { %v3948_v8 = vmax.f32 %v1660_v6, 0.0  ;;  %v933_v21 = vstv %s2443_s17  ;;  %v936_v25 = vstv %s2444_s13  ;;  %v944_v22 = vstv %s2445_s1  ;;  %s4056_s17 = sld [smem:[#allocation9 + $0xf]]  ;;  %s4064_s13 = sld [smem:[#allocation8 + $0x10]] }
 0x198   : > { %1567 = vrot.lane.b32.xlu1 %v3931_v24, %s5050_s4  ;;  %1548 = vrot.lane.b32.xlu0 %v3931_v24, %s5051_s8  ;;  %v1717_v33 = vadd.f32 %v1716_v46, %v1714_v42  ;;  %v1771_v17 = vadd.f32 %v1770_v53, %v1767_v63  ;;  %v947_v52 = vstv %s2446_s22  ;;  %v934_v16 = vmul.f32 %v933_v21, %v3622_v5  ;;  %s4072_s1 = sld [smem:[#allocation9 + $0x11]]  ;;  %s4078_s22 = sld [smem:[#allocation8 + $0x12]] }
 0x199   : > { %v937_v61 = vmul.f32 %v936_v25, %v3622_v5  ;;  %v982_v10 = vstv %s3966_s12  ;;  %v985_v45 = vstv %s3968_s18  ;;  %v990_v48 = vstv %s3970_s19  ;;  %s4080_s12 = sld [smem:[#allocation9 + $0x12]]  ;;  %s4088_s18 = sld [smem:[#allocation8 + $0x13]] }
 0x19a   : > { %v3954_v14 = vmax.f32 %v1717_v33, 0.0  ;;  %v1774_v2 = vadd.f32 %v1773_v36, %v1771_v17  ;;  %v993_v9 = vstv %s3972_s25  ;;  %v991_v19 = vmul.f32 %v990_v48, %v3663_v31  ;;  %s4090_s19 = sld [smem:[#allocation9 + $0x13]]  ;;  %s4094_s25 = sld [smem:[#allocation8 + $0x14]] }
 0x19b   : > { %v994_v60 = vmul.f32 %v993_v9, %v3663_v31  ;;  %v1039_v57 = vstv %s3984_s29  ;;  %v1042_v41 = vstv %s3986_s15  ;;  %v1047_v17 = vstv %s3990_s7  ;;  %s4104_s29 = sld [smem:[#allocation9 + $0x15]]  ;;  %s4112_s15 = sld [smem:[#allocation8 + $0x16]] }
 0x19c   : > { %1624 = vrot.lane.b32.xlu1 %v3942_v18, %s5050_s4  ;;  %1605 = vrot.lane.b32.xlu0 %v3942_v18, %s5051_s8  ;;  %v3960_v54 = vmax.f32 %v1774_v2, 0.0  ;;  %v1050_v31 = vstv %s3992_s10  ;;  %v1058_v25 = vstv %s3998_s23  ;;  %s4114_s7 = sld [smem:[#allocation9 + $0x16]]  ;;  %s4118_s10 = sld [smem:[#allocation8 + $0x17]] }
 0x19d   : > { %v1115_v9 = vstv %s4022_s26  ;;  %s4120_s23 = sld [smem:[#allocation9 + $0x17]]  ;;  %s4144_s26 = sld [smem:[#allocation9 + $0x1a]] }
 0x1a0   : > { %1681 = vrot.lane.b32.xlu1 %v3948_v8, %s5050_s4  ;;  %1662 = vrot.lane.b32.xlu0 %v3948_v8, %s5051_s8 }
 0x1a4   : > { %1738 = vrot.lane.b32.xlu1 %v3954_v14, %s5050_s4  ;;  %1719 = vrot.lane.b32.xlu0 %v3954_v14, %s5051_s8 }
 0x1a8   : > { %1795 = vrot.lane.b32.xlu1 %v3960_v54, %s5050_s4  ;;  %1776 = vrot.lane.b32.xlu0 %v3960_v54, %s5051_s8  ;;  %s3974_s4 = sld [smem:[#allocation8 + $0x5]] }
 0x1a9   : > { %s3976_s8 = sld [smem:[#allocation9 + $0x5]] }
 0x1ae   : > { %v1001_v55 = vstv %s3974_s4  ;;  %s4096_s4 = sld [smem:[#allocation9 + $0x14]] }
 0x1af   : > { %v1004_v28 = vstv %s3976_s8  ;;  %s4102_s8 = sld [smem:[#allocation8 + $0x15]] }
 0x1dd   : > { %v941_v12 = vpop.permute.xlu1 %940  ;;  %v924_v34 = vpop.permute.xlu0 %923 }
 0x1de   : > { %v942_v35 = vsel %vm883_vm2, %v941_v12, 0.0  ;;  %v925_v7 = vsel %vm882_vm1, %v924_v34, 0.0  ;;  %v1061_v12 = vstv %s4000_s3  ;;  %s4126_s3 = sld [smem:[#allocation8 + $0x18]] }
 0x1df   : > { %v928_v30 = vmul.f32 %v927_v32, %v925_v7  ;;  %v931_v59 = vmul.f32 %v930_v37, %v925_v7  ;;  %v945_v38 = vmul.f32 %v944_v22, %v942_v35  ;;  %v948_v23 = vmul.f32 %v947_v52, %v942_v35 }
 0x1e0   : > { %v1048_v22 = vmul.f32 %v1047_v17, %v3700_v4  ;;  %v1051_v52 = vmul.f32 %v1050_v31, %v3700_v4  ;;  %v1107_v4 = vstv %s4018_s2  ;;  %v1172_v17 = vstv %s4046_s9  ;;  %s4142_s2 = sld [smem:[#allocation8 + $0x1a]]  ;;  %s4168_s9 = sld [smem:[#allocation9 + $0x1d]] }
 0x1e1   : > { %v938_v1 = vadd.f32 %v934_v16, %v928_v30  ;;  %v939_v40 = vadd.f32 %v937_v61, %v931_v59  ;;  %v979_v47 = vpop.permute.xlu0 %978  ;;  %v998_v27 = vpop.permute.xlu1 %997  ;;  %v1096_v30 = vstv %s4006_s11  ;;  %v1099_v59 = vstv %s4008_s0  ;;  %s4128_s11 = sld [smem:[#allocation9 + $0x18]]  ;;  %s4136_s0 = sld [smem:[#allocation8 + $0x19]] }
 0x1e2   : > { %v980_v5 = vsel %vm882_vm1, %v979_v47, 0.0  ;;  %v999_v56 = vsel %vm883_vm2, %v998_v27, 0.0  ;;  %v1175_v31 = vstv %s4048_s27  ;;  %s4174_s27 = sld [smem:[#allocation8 + $0x1e]] }
 0x1e3   : > { %v949_v43 = vadd.f32 %v945_v38, %v938_v1  ;;  %v950_v20 = vadd.f32 %v948_v23, %v939_v40  ;;  %v983_v11 = vmul.f32 %v982_v10, %v980_v5  ;;  %v986_v49 = vmul.f32 %v985_v45, %v980_v5 }
 0x1e4   : > { %v1002_v6 = vmul.f32 %v1001_v55, %v999_v56  ;;  %v1005_v42 = vmul.f32 %v1004_v28, %v999_v56  ;;  %v1104_v1 = vstv %s4016_s16  ;;  %v1153_v56 = vstv %s4030_s20  ;;  %s4138_s16 = sld [smem:[#allocation9 + $0x19]]  ;;  %s4152_s20 = sld [smem:[#allocation9 + $0x1b]] }
 0x1e5   : > { %v1036_v58 = vpop.permute.xlu0 %1035  ;;  %v987_v39 = vadd.f32 %v983_v11, %v949_v43  ;;  %v988_v29 = vadd.f32 %v986_v49, %v950_v20  ;;  %v1055_v33 = vpop.permute.xlu1 %1054  ;;  %v1118_v43 = vstv %s4024_s24  ;;  %v1105_v11 = vmul.f32 %v1104_v1, %v3737_v26  ;;  %s4150_s24 = sld [smem:[#allocation8 + $0x1b]] }
 0x1e6   : > { %v1037_v53 = vsel %vm882_vm1, %v1036_v58, 0.0  ;;  %v1056_v34 = vsel %vm883_vm2, %v1055_v33, 0.0  ;;  %v1108_v49 = vmul.f32 %v1107_v4, %v3737_v26  ;;  %v1156_v58 = vstv %s4032_s21  ;;  %s4160_s21 = sld [smem:[#allocation8 + $0x1c]] }
 0x1e7   : > { %v995_v63 = vadd.f32 %v991_v19, %v987_v39  ;;  %v996_v46 = vadd.f32 %v994_v60, %v988_v29  ;;  %v1040_v32 = vmul.f32 %v1039_v57, %v1037_v53  ;;  %v1043_v37 = vmul.f32 %v1042_v41, %v1037_v53 }
 0x1e8   : > { %v1059_v61 = vmul.f32 %v1058_v25, %v1056_v34  ;;  %v1062_v10 = vmul.f32 %v1061_v12, %v1056_v34  ;;  %v1161_v53 = vstv %s4040_s6  ;;  %v1164_v26 = vstv %s4042_s30  ;;  %s4162_s6 = sld [smem:[#allocation9 + $0x1c]]  ;;  %s4166_s30 = sld [smem:[#allocation8 + $0x1d]] }
 0x1e9   : > { %v1006_v36 = vadd.f32 %v1002_v6, %v995_v63  ;;  %v1007_v2 = vadd.f32 %v1005_v42, %v996_v46  ;;  %v1093_v21 = vpop.permute.xlu0 %1092  ;;  %v1112_v23 = vpop.permute.xlu1 %1111  ;;  %v1210_v25 = vstv %s4054_s28  ;;  %v1213_v12 = vstv %s4056_s17  ;;  %s4176_s28 = sld [smem:[#allocation9 + $0x1e]]  ;;  %s4184_s17 = sld [smem:[#allocation8 + $0x1f]] }
 0x1ea   : > { %v1094_v16 = vsel %vm882_vm1, %v1093_v21, 0.0  ;;  %v1113_v20 = vsel %vm883_vm2, %v1112_v23, 0.0  ;;  %v1229_v23 = vstv %s4070_s14  ;;  %v1232_v1 = vstv %s4072_s1  ;;  %s4192_s14 = sld [smem:[#allocation9 + $0x20]]  ;;  %s4198_s1 = sld [smem:[#allocation8 + $0x21]] }
 0x1eb   : > { %v1044_v35 = vadd.f32 %v1040_v32, %v1006_v36  ;;  %v1045_v7 = vadd.f32 %v1043_v37, %v1007_v2  ;;  %v1097_v27 = vmul.f32 %v1096_v30, %v1094_v16  ;;  %v1100_v5 = vmul.f32 %v1099_v59, %v1094_v16 }
 0x1ec   : > { %v1116_v60 = vmul.f32 %v1115_v9, %v1113_v20  ;;  %v1119_v39 = vmul.f32 %v1118_v43, %v1113_v20  ;;  %v1162_v2 = vmul.f32 %v1161_v53, %v3764_v62  ;;  %v1165_v32 = vmul.f32 %v1164_v26, %v3764_v62 }
 0x1ed   : > { %v1052_v45 = vadd.f32 %v1048_v22, %v1044_v35  ;;  %v1053_v38 = vadd.f32 %v1051_v52, %v1045_v7  ;;  %v1150_v48 = vpop.permute.xlu0 %1149  ;;  %v1169_v41 = vpop.permute.xlu1 %1168  ;;  %v1218_v59 = vstv %s4064_s13  ;;  %v1221_v62 = vstv %s4066_s5  ;;  %s4186_s13 = sld [smem:[#allocation9 + $0x1f]]  ;;  %s4190_s5 = sld [smem:[#allocation8 + $0x20]] }
 0x1ee   : > { %v1151_v19 = vsel %vm882_vm1, %v1150_v48, 0.0  ;;  %v1170_v36 = vsel %vm883_vm2, %v1169_v41, 0.0  ;;  %v1267_v48 = vstv %s4078_s22  ;;  %v1270_v9 = vstv %s4080_s12  ;;  %s4200_s22 = sld [smem:[#allocation9 + $0x21]]  ;;  %s4208_s12 = sld [smem:[#allocation8 + $0x22]] }
 0x1ef   : > { %v1063_v40 = vadd.f32 %v1059_v61, %v1052_v45  ;;  %v1064_v47 = vadd.f32 %v1062_v10, %v1053_v38  ;;  %v1154_v63 = vmul.f32 %v1153_v56, %v1151_v19  ;;  %v1157_v46 = vmul.f32 %v1156_v58, %v1151_v19 }
 0x1f0   : > { %v1173_v22 = vmul.f32 %v1172_v17, %v1170_v36  ;;  %v1176_v52 = vmul.f32 %v1175_v31, %v1170_v36  ;;  %v1275_v56 = vstv %s4088_s18  ;;  %v1289_v41 = vstv %s4096_s4  ;;  %s4210_s18 = sld [smem:[#allocation9 + $0x22]]  ;;  %s4222_s4 = sld [smem:[#allocation8 + $0x24]] }
 0x1f1   : > { %v1101_v55 = vadd.f32 %v1097_v27, %v1063_v40  ;;  %v1102_v28 = vadd.f32 %v1100_v5, %v1064_v47  ;;  %v1207_v33 = vpop.permute.xlu0 %1206  ;;  %v1226_v30 = vpop.permute.xlu1 %1225  ;;  %v1219_v40 = vmul.f32 %v1218_v59, %v3795_v50  ;;  %v1222_v47 = vmul.f32 %v1221_v62, %v3795_v50 }
 0x1f2   : > { %v1208_v34 = vsel %vm882_vm1, %v1207_v33, 0.0  ;;  %v1227_v4 = vsel %vm883_vm2, %v1226_v30, 0.0  ;;  %v1278_v50 = vstv %s4090_s19  ;;  %v1276_v26 = vmul.f32 %v1275_v56, %v3823_v15  ;;  %s4214_s19 = sld [smem:[#allocation8 + $0x23]] }
 0x1f3   : > { %v1109_v29 = vadd.f32 %v1105_v11, %v1101_v55  ;;  %v1110_v57 = vadd.f32 %v1108_v49, %v1102_v28  ;;  %v1211_v10 = vmul.f32 %v1210_v25, %v1208_v34  ;;  %v1214_v45 = vmul.f32 %v1213_v12, %v1208_v34 }
 0x1f4   : > { %v1230_v20 = vmul.f32 %v1229_v23, %v1227_v4  ;;  %v1233_v11 = vmul.f32 %v1232_v1, %v1227_v4  ;;  %v1327_v33 = vstv %s4104_s29  ;;  %s4232_s29 = sld [smem:[#allocation8 + $0x25]] }
 0x1f5   : > { %v1120_v6 = vadd.f32 %v1116_v60, %v1109_v29  ;;  %v1121_v42 = vadd.f32 %v1119_v39, %v1110_v57  ;;  %v1264_v38 = vpop.permute.xlu0 %1263  ;;  %v1283_v28 = vpop.permute.xlu1 %1282  ;;  %v1286_v57 = vstv %s4094_s25  ;;  %s4216_s25 = sld [smem:[#allocation9 + $0x23]] }
 0x1f6   : > { %v1265_v43 = vsel %vm882_vm1, %v1264_v38, 0.0  ;;  %v1284_v53 = vsel %vm883_vm2, %v1283_v28, 0.0 }
 0x1f7   : > { %v1158_v37 = vadd.f32 %v1154_v63, %v1120_v6  ;;  %v1159_v21 = vadd.f32 %v1157_v46, %v1121_v42  ;;  %v1268_v60 = vmul.f32 %v1267_v48, %v1265_v43  ;;  %v1271_v39 = vmul.f32 %v1270_v9, %v1265_v43 }
 0x1f8   : > { %v1279_v6 = vmul.f32 %v1278_v50, %v3823_v15  ;;  %v1324_v46 = vstv %s4102_s8  ;;  %v1287_v31 = vmul.f32 %v1286_v57, %v1284_v53  ;;  %v1290_v36 = vmul.f32 %v1289_v41, %v1284_v53  ;;  %s4224_s8 = sld [smem:[#allocation9 + $0x24]] }
 0x1f9   : > { %v1166_v35 = vadd.f32 %v1162_v2, %v1158_v37  ;;  %v1167_v7 = vadd.f32 %v1165_v32, %v1159_v21  ;;  %v1332_v21 = vstv %s4112_s15  ;;  %v1335_v15 = vstv %s4114_s7  ;;  %s4234_s15 = sld [smem:[#allocation9 + $0x25]]  ;;  %s4238_s7 = sld [smem:[#allocation8 + $0x26]] }
 0x1fa   : > { %v1321_v29 = vpop.permute.xlu0 %1320  ;;  %v1340_v37 = vpop.permute.xlu1 %1339  ;;  %v1333_v59 = vmul.f32 %v1332_v21, %v3857_v13  ;;  %v1336_v62 = vmul.f32 %v1335_v15, %v3857_v13  ;;  %v1392_v13 = vstv %s4138_s16  ;;  %s4262_s16 = sld [smem:[#allocation8 + $0x29]] }
 0x1fb   : > { %v1177_v16 = vadd.f32 %v1173_v22, %v1166_v35  ;;  %v1178_v61 = vadd.f32 %v1176_v52, %v1167_v7  ;;  %v1322_v17 = vsel %vm882_vm1, %v1321_v29, 0.0  ;;  %v1343_v35 = vstv %s4118_s10  ;;  %s4240_s10 = sld [smem:[#allocation9 + $0x26]] }
 0x1fc   : > { %v1325_v34 = vmul.f32 %v1324_v46, %v1322_v17  ;;  %v1328_v22 = vmul.f32 %v1327_v33, %v1322_v17  ;;  %v1346_v7 = vstv %s4120_s23  ;;  %v1341_v30 = vsel %vm883_vm2, %v1340_v37, 0.0  ;;  %s4246_s23 = sld [smem:[#allocation8 + $0x27]] }
 0x1fd   : > { %v1215_v27 = vadd.f32 %v1211_v10, %v1177_v16  ;;  %v1216_v5 = vadd.f32 %v1214_v45, %v1178_v61  ;;  %v1381_v10 = vstv %s4126_s3  ;;  %v1384_v45 = vstv %s4128_s11  ;;  %s4248_s3 = sld [smem:[#allocation9 + $0x27]]  ;;  %s4256_s11 = sld [smem:[#allocation8 + $0x28]] }
 0x1fe   : > { %v1378_v52 = vpop.permute.xlu0 %1377  ;;  %v1344_v23 = vmul.f32 %v1343_v35, %v1341_v30  ;;  %v1347_v1 = vmul.f32 %v1346_v7, %v1341_v30  ;;  %v1393_v56 = vmul.f32 %v1392_v13, %v3882_v0  ;;  %v1552_v13 = vstv %s4198_s1  ;;  %s1815_s1 = sld [smem:[#allocation3]] }
 0x1ff   : > { %v1223_v49 = vadd.f32 %v1219_v40, %v1215_v27  ;;  %v1224_v55 = vadd.f32 %v1222_v47, %v1216_v5  ;;  %v1379_v38 = vsel %vm882_vm1, %v1378_v52, 0.0  ;;  %v1397_v47 = vpop.permute.xlu1 %1396  ;;  %v1389_v27 = vstv %s4136_s0  ;;  %s4258_s0 = sld [smem:[#allocation9 + $0x28]] }
 0x200   : > { %v1382_v9 = vmul.f32 %v1381_v10, %v1379_v38  ;;  %v1385_v43 = vmul.f32 %v1384_v45, %v1379_v38  ;;  %v1390_v28 = vmul.f32 %v1389_v27, %v3882_v0  ;;  %v1449_v0 = vstv %s4162_s6  ;;  %s4286_s6 = sld [smem:[#allocation8 + $0x2c]] }
 0x201   : > { %v1234_v58 = vadd.f32 %v1230_v20, %v1223_v49  ;;  %v1235_v19 = vadd.f32 %v1233_v11, %v1224_v55  ;;  %v1400_v11 = vstv %s4142_s2  ;;  %v1403_v49 = vstv %s4144_s26  ;;  %s4264_s2 = sld [smem:[#allocation9 + $0x29]]  ;;  %s4270_s26 = sld [smem:[#allocation8 + $0x2a]] }
 0x202   : > { %v1435_v20 = vpop.permute.xlu0 %1434  ;;  %v1398_v55 = vsel %vm883_vm2, %v1397_v47, 0.0  ;;  %v1450_v37 = vmul.f32 %v1449_v0, %v3905_v44  ;;  %v1514_v38 = vstv %s4190_s5  ;;  %v1612_v0 = vstv %s4224_s8  ;;  %s4312_s5 = sld [smem:[#allocation9 + $0x2f]] }
 0x203   : > { %v1272_v42 = vadd.f32 %v1268_v60, %v1234_v58  ;;  %v1273_v63 = vadd.f32 %v1271_v39, %v1235_v19  ;;  %v1438_v19 = vstv %s4150_s24  ;;  %v1441_v60 = vstv %s4152_s20  ;;  %s4272_s24 = sld [smem:[#allocation9 + $0x2a]]  ;;  %s4280_s20 = sld [smem:[#allocation8 + $0x2b]] }
 0x204   : > { %v1436_v39 = vsel %vm882_vm1, %v1435_v20, 0.0  ;;  %v1401_v29 = vmul.f32 %v1400_v11, %v1398_v55  ;;  %v1404_v57 = vmul.f32 %v1403_v49, %v1398_v55  ;;  %v1560_v55 = vstv %s4208_s12  ;;  %s5068_s12 = sld [smem:[#allocation17_spill]] }
 0x205   : > { %v1280_v2 = vadd.f32 %v1276_v26, %v1272_v42  ;;  %v1281_v32 = vadd.f32 %v1279_v6, %v1273_v63  ;;  %v1454_v26 = vpop.permute.xlu1 %1453  ;;  %v1446_v6 = vstv %s4160_s21  ;;  %v1439_v46 = vmul.f32 %v1438_v19, %v1436_v39  ;;  %s4282_s21 = sld [smem:[#allocation9 + $0x2b]] }
 0x206   : > { %v1442_v33 = vmul.f32 %v1441_v60, %v1436_v39  ;;  %v1492_v17 = vpop.permute.xlu0 %1491  ;;  %v1571_v60 = vstv %s4214_s19  ;;  %v1574_v39 = vstv %s4216_s25 }
 0x207   : > { %v1291_v25 = vadd.f32 %v1287_v31, %v1280_v2  ;;  %v1292_v12 = vadd.f32 %v1290_v36, %v1281_v32  ;;  %v1457_v31 = vstv %s4166_s30  ;;  %v1460_v36 = vstv %s4168_s9  ;;  %s4288_s30 = sld [smem:[#allocation9 + $0x2c]]  ;;  %s4294_s9 = sld [smem:[#allocation8 + $0x2d]] }
 0x208   : > { %v1455_v2 = vsel %vm883_vm2, %v1454_v26, 0.0  ;;  %v1447_v32 = vmul.f32 %v1446_v6, %v3905_v44  ;;  %v1506_v44 = vstv %s4186_s13  ;;  %v1609_v6 = vstv %s4222_s4  ;;  %s4310_s13 = sld [smem:[#allocation8 + $0x2f]]  ;;  %s5069_s4 = sld [smem:[#allocation52_spill]] }
 0x209   : > { %v1329_v16 = vadd.f32 %v1325_v34, %v1291_v25  ;;  %v1330_v61 = vadd.f32 %v1328_v22, %v1292_v12  ;;  %v1495_v25 = vstv %s4174_s27  ;;  %v1498_v12 = vstv %s4176_s28  ;;  %v1511_v30 = vpop.permute.xlu1 %1510  ;;  %s4296_s27 = sld [smem:[#allocation9 + $0x2d]]  ;;  %s4304_s28 = sld [smem:[#allocation8 + $0x2e]] }
 0x20a   : > { %v1493_v34 = vsel %vm882_vm1, %v1492_v17, 0.0  ;;  %v1458_v22 = vmul.f32 %v1457_v31, %v1455_v2  ;;  %v1461_v52 = vmul.f32 %v1460_v36, %v1455_v2  ;;  %v1549_v45 = vpop.permute.xlu0 %1548  ;;  %v1617_v36 = vstv %s4232_s29 }
 0x20b   : > { %v1337_v4 = vadd.f32 %v1333_v59, %v1329_v16  ;;  %v1338_v40 = vadd.f32 %v1336_v62, %v1330_v61  ;;  %v1503_v59 = vstv %s4184_s17  ;;  %v1496_v61 = vmul.f32 %v1495_v25, %v1493_v34  ;;  %s4306_s17 = sld [smem:[#allocation9 + $0x2e]] }
 0x20c   : > { %v1499_v10 = vmul.f32 %v1498_v12, %v1493_v34  ;;  %v1628_v25 = vstv %s4238_s7  ;;  %v1631_v12 = vstv %s4240_s10  ;;  %s5070_s7 = sld [smem:[#allocation53_spill]] }
 0x20d   : > { %v1348_v5 = vadd.f32 %v1344_v23, %v1337_v4  ;;  %v1349_v48 = vadd.f32 %v1347_v1, %v1338_v40  ;;  %v1517_v23 = vstv %s4192_s14  ;;  %v1512_v1 = vsel %vm883_vm2, %v1511_v30, 0.0  ;;  %v1568_v49 = vpop.permute.xlu1 %1567  ;;  %s1806_s14 = sld [smem:[#allocation2]] }
 0x20e   : > { %v1504_v4 = vmul.f32 %v1503_v59, %v3923_v51  ;;  %v1507_v40 = vmul.f32 %v1506_v44, %v3923_v51  ;;  %v1563_v51 = vstv %s4210_s18  ;;  %v1606_v19 = vpop.permute.xlu0 %1605  ;;  %v1666_v30 = vstv %s4246_s23  ;;  %s5071_s23 = sld [smem:[#allocation16_spill]] }
 0x20f   : > { %v1386_v50 = vadd.f32 %v1382_v9, %v1348_v5  ;;  %v1387_v58 = vadd.f32 %v1385_v43, %v1349_v48  ;;  %v1555_v5 = vstv %s4200_s22  ;;  %v1550_v48 = vsel %vm882_vm1, %v1549_v45, 0.0  ;;  %s5067_s22 = sld [smem:[#allocation15_spill]] }
 0x210   : > { %v1515_v9 = vmul.f32 %v1514_v38, %v1512_v1  ;;  %v1518_v43 = vmul.f32 %v1517_v23, %v1512_v1  ;;  %v1669_v59 = vstv %s4248_s3  ;;  %v1674_v38 = vstv %s4256_s11 }
 0x211   : > { %v1394_v41 = vadd.f32 %v1390_v28, %v1386_v50  ;;  %v1395_v53 = vadd.f32 %v1393_v56, %v1387_v58  ;;  %v1553_v50 = vmul.f32 %v1552_v13, %v1550_v48  ;;  %v1556_v58 = vmul.f32 %v1555_v5, %v1550_v48  ;;  %v1625_v31 = vpop.permute.xlu1 %1624 }
 0x212   : > { %v1626_v34 = vsel %vm883_vm2, %v1625_v31, 0.0  ;;  %v1688_v13 = vstv %s4264_s2  ;;  %v1675_v48 = vmul.f32 %v1674_v38, %v3948_v8  ;;  %v1816_v38 = vstv %s1815_s1  ;;  %s5073_s2 = sld [smem:[#allocation18_spill]] }
 0x213   : > { %v1405_v42 = vadd.f32 %v1401_v29, %v1394_v41  ;;  %v1406_v63 = vadd.f32 %v1404_v57, %v1395_v53  ;;  %v1569_v29 = vsel %vm883_vm2, %v1568_v49, 0.0  ;;  %v1561_v57 = vmul.f32 %v1560_v55, %v3931_v24 }
 0x214   : > { %v1564_v41 = vmul.f32 %v1563_v51, %v3931_v24  ;;  %v1620_v24 = vstv %s4234_s15  ;;  %v1726_v49 = vstv %s4272_s24 }
 0x215   : > { %v1443_v21 = vadd.f32 %v1439_v46, %v1405_v42  ;;  %v1444_v15 = vadd.f32 %v1442_v33, %v1406_v63  ;;  %v1607_v42 = vsel %vm882_vm1, %v1606_v19, 0.0  ;;  %v1572_v63 = vmul.f32 %v1571_v60, %v1569_v29  ;;  %v1682_v45 = vpop.permute.xlu1 %1681  ;;  %s2436_s18 = sshll.u32 %s5067_s22, 2 }
 0x216   : > { %v1575_v46 = vmul.f32 %v1574_v39, %v1569_v29  ;;  %v1683_v5 = vsel %vm883_vm2, %v1682_v45, 0.0  ;;  %v1731_v19 = vstv %s4280_s20  ;;  %v1807_v45 = vstv %s1806_s14  ;;  %s489_s8 = scalar_lea.vmem %s5069_s4, %s2436_s18  ;;  %s493_s10 = scalar_lea.vmem %s5070_s7, %s2436_s18 }
 0x217   : > { %v1451_v35 = vadd.f32 %v1447_v32, %v1443_v21  ;;  %v1452_v7 = vadd.f32 %v1450_v37, %v1444_v15  ;;  %v1610_v37 = vmul.f32 %v1609_v6, %v1607_v42  ;;  %v1613_v21 = vmul.f32 %v1612_v0, %v1607_v42  ;;  %v1663_v15 = vpop.permute.xlu0 %1662  ;;  %s5074_s20 = sld [smem:[#allocation51_spill]] }
 0x218   : > { %v1664_v44 = vsel %vm882_vm1, %v1663_v15, 0.0  ;;  %v1732_v0 = vmul.f32 %v1731_v19, %v3954_v14  ;;  %v1791_v15 = vstv %s4306_s17 }
 0x219   : > { %v1462_v62 = vadd.f32 %v1458_v22, %v1451_v35  ;;  %v1463_v16 = vadd.f32 %v1461_v52, %v1452_v7  ;;  %v1618_v22 = vmul.f32 %v1617_v36, %v3942_v18  ;;  %v1621_v52 = vmul.f32 %v1620_v24, %v3942_v18 }
 0x21a   : > { %v1677_v18 = vstv %s4258_s0  ;;  %s5072_s0 = sld [smem:[#allocation50_spill]] }
 0x21b   : > { %v1500_v47 = vadd.f32 %v1496_v61, %v1462_v62  ;;  %v1501_v27 = vadd.f32 %v1499_v10, %v1463_v16  ;;  %v1629_v62 = vmul.f32 %v1628_v25, %v1626_v34  ;;  %v1632_v16 = vmul.f32 %v1631_v12, %v1626_v34 }
 0x21d   : > { %v1508_v20 = vadd.f32 %v1504_v4, %v1500_v47  ;;  %v1509_v11 = vadd.f32 %v1507_v40, %v1501_v27  ;;  %v1667_v4 = vmul.f32 %v1666_v30, %v1664_v44  ;;  %v1670_v40 = vmul.f32 %v1669_v59, %v1664_v44  ;;  %v1720_v47 = vpop.permute.xlu0 %1719 }
 0x21e   : > { %v1685_v27 = vstv %s4262_s16  ;;  %v1721_v55 = vsel %vm882_vm1, %v1720_v47, 0.0  ;;  %v1792_v30 = vmul.f32 %v1791_v15, %v3960_v54 }
 0x21f   : > { %v1519_v28 = vadd.f32 %v1515_v9, %v1508_v20  ;;  %v1520_v56 = vadd.f32 %v1518_v43, %v1509_v11  ;;  %v1678_v9 = vmul.f32 %v1677_v18, %v3948_v8  ;;  %v1723_v11 = vstv %s4270_s26 }
 0x220   : > { %v1686_v51 = vmul.f32 %v1685_v27, %v1683_v5  ;;  %v1734_v8 = vstv %s4282_s21  ;;  %v1724_v29 = vmul.f32 %v1723_v11, %v1721_v55  ;;  %v1831_v11 = vld [vmem:[%s5068_s12 + $0x14] sm:$0x7]  ;;  %s4361_s16 = scalar_lea.vmem %s5072_s0, %s5071_s23  ;;  %s4681_s21 = scalar_lea.vmem %s5074_s20, %s5071_s23 }
 0x221   : > { %v1557_v53 = vadd.f32 %v1553_v50, %v1519_v28  ;;  %v1558_v26 = vadd.f32 %v1556_v58, %v1520_v56  ;;  %v1689_v28 = vmul.f32 %v1688_v13, %v1683_v5  ;;  %v1739_v58 = vpop.permute.xlu1 %1738  ;;  %v1735_v42 = vmul.f32 %v1734_v8, %v3954_v14  ;;  %v1826_v5 = vld [vmem:[%s5068_s12] sm:$0x7]  ;;  %v1838_v8 = vld [vmem:[%s5068_s12 + $0x30] sm:$0x7] }
 0x222   : > { %v1740_v6 = vsel %vm883_vm2, %v1739_v58, 0.0  ;;  %v1837_v58 = vld [vmem:[%s5068_s12 + $0x2c] sm:$0x7] }
 0x223   : > { %v1565_v33 = vadd.f32 %v1561_v57, %v1557_v53  ;;  %v1566_v17 = vadd.f32 %v1564_v41, %v1558_v26  ;;  %v1727_v57 = vmul.f32 %v1726_v49, %v1721_v55  ;;  %v1777_v41 = vpop.permute.xlu0 %1776  ;;  %v1742_v53 = vstv %s4286_s6  ;;  %v1832_v49 = vld [vmem:[%s5068_s12 + $0x18] sm:$0x7]  ;;  %v1833_v55 = vld [vmem:[%s5068_s12 + $0x1c] sm:$0x7] }
 0x224   : > { %v1745_v26 = vstv %s4288_s30  ;;  %v1778_v31 = vsel %vm882_vm1, %v1777_v41, 0.0  ;;  %v1743_v36 = vmul.f32 %v1742_v53, %v1740_v6  ;;  %v1842_v41 = vld [vmem:[%s5068_s12 + $0x40] sm:$0x7]  ;;  %v1843_v53 = vld [vmem:[%s5068_s12 + $0x44] sm:$0x7] }
 0x225   : > { %v1576_v2 = vadd.f32 %v1572_v63, %v1565_v33  ;;  %v1577_v32 = vadd.f32 %v1575_v46, %v1566_v17  ;;  %v1780_v33 = vstv %s4294_s9  ;;  %v1783_v17 = vstv %s4296_s27 }
 0x226   : > { %v1746_v24 = vmul.f32 %v1745_v26, %v1740_v6  ;;  %v1781_v12 = vmul.f32 %v1780_v33, %v1778_v31  ;;  %v1784_v34 = vmul.f32 %v1783_v17, %v1778_v31  ;;  %v1844_v26 = vld [vmem:[%s5068_s12 + $0x48] sm:$0x7]  ;;  %v1845_v6 = vld [vmem:[%s5068_s12 + $0x4c] sm:$0x7]  ;;  %v1849_v33 = vld [vmem:[%s5068_s12 + $0x5c] sm:$0x7] }
 0x227   : > { %v1614_v35 = vadd.f32 %v1610_v37, %v1576_v2  ;;  %v1615_v7 = vadd.f32 %v1613_v21, %v1577_v32  ;;  %v1796_v37 = vpop.permute.xlu1 %1795  ;;  %v1788_v21 = vstv %s4304_s28 }
 0x229   : > { %v1622_v61 = vadd.f32 %v1618_v22, %v1614_v35  ;;  %v1623_v10 = vadd.f32 %v1621_v52, %v1615_v7  ;;  %v1799_v22 = vstv %s4310_s13  ;;  %v1802_v52 = vstv %s4312_s5 }
 0x22a   : > { %v1797_v35 = vsel %vm883_vm2, %v1796_v37, 0.0  ;;  %v1789_v7 = vmul.f32 %v1788_v21, %v3960_v54  ;;  %v1852_v37 = vld [vmem:[%s5068_s12 + $0x68] sm:$0x7]  ;;  %v1853_v21 = vld [vmem:[%s5068_s12 + $0x6c] sm:$0x7] }
 0x22b   : > { %v1633_v23 = vadd.f32 %v1629_v62, %v1622_v61  ;;  %v1634_v1 = vadd.f32 %v1632_v16, %v1623_v10  ;;  %v1800_v62 = vmul.f32 %v1799_v22, %v1797_v35  ;;  %v1803_v16 = vmul.f32 %v1802_v52, %v1797_v35  ;;  %v4389_v22 = vld [vmem:[%s5068_s12 + $0x74] sm:$0x7]  ;;  %v4392_v52 = vld [vmem:[%s5068_s12 + $0x78] sm:$0x7]  ;;  %v4395_v35 = vld [vmem:[%s5068_s12 + $0x7c] sm:$0x7] }
 0x22d   : > { %v1671_v43 = vadd.f32 %v1667_v4, %v1633_v23  ;;  %v1672_v20 = vadd.f32 %v1670_v40, %v1634_v1 }
 0x22f   : > { %v1679_v56 = vadd.f32 %v1675_v48, %v1671_v43  ;;  %v1680_v50 = vadd.f32 %v1678_v9, %v1672_v20  ;;  %v1827_v48 = vld [vmem:[%s5068_s12 + $0x4] sm:$0x7]  ;;  %v1828_v9 = vld [vmem:[%s5068_s12 + $0x8] sm:$0x7]  ;;  %v1829_v43 = vld [vmem:[%s5068_s12 + $0xc] sm:$0x7] }
 0x230   : > { %v1830_v20 = vld [vmem:[%s5068_s12 + $0x10] sm:$0x7] }
 0x231   : > { %v1690_v60 = vadd.f32 %v1686_v51, %v1679_v56  ;;  %v1691_v39 = vadd.f32 %v1689_v28, %v1680_v50  ;;  %v1834_v28 = vld [vmem:[%s5068_s12 + $0x20] sm:$0x7]  ;;  %v1835_v56 = vld [vmem:[%s5068_s12 + $0x24] sm:$0x7]  ;;  %v1836_v50 = vld [vmem:[%s5068_s12 + $0x28] sm:$0x7] }
 0x233   : > { %v1728_v63 = vadd.f32 %v1724_v29, %v1690_v60  ;;  %v1729_v46 = vadd.f32 %v1727_v57, %v1691_v39  ;;  %v1839_v60 = vld [vmem:[%s5068_s12 + $0x34] sm:$0x7]  ;;  %v1840_v39 = vld [vmem:[%s5068_s12 + $0x38] sm:$0x7]  ;;  %v1841_v29 = vld [vmem:[%s5068_s12 + $0x3c] sm:$0x7] }
 0x235   : > { %v1736_v2 = vadd.f32 %v1732_v0, %v1728_v63  ;;  %v1737_v32 = vadd.f32 %v1735_v42, %v1729_v46  ;;  %v1846_v42 = vld [vmem:[%s5068_s12 + $0x50] sm:$0x7]  ;;  %v1847_v63 = vld [vmem:[%s5068_s12 + $0x54] sm:$0x7]  ;;  %v1848_v46 = vld [vmem:[%s5068_s12 + $0x58] sm:$0x7] }
 0x237   : > { %v1747_v25 = vadd.f32 %v1743_v36, %v1736_v2  ;;  %v1748_v14 = vadd.f32 %v1746_v24, %v1737_v32  ;;  %v1850_v2 = vld [vmem:[%s5068_s12 + $0x60] sm:$0x7]  ;;  %v1851_v32 = vld [vmem:[%s5068_s12 + $0x64] sm:$0x7] }
 0x239   : > { %v1785_v59 = vadd.f32 %v1781_v12, %v1747_v25  ;;  %v1786_v44 = vadd.f32 %v1784_v34, %v1748_v14  ;;  %v4386_v34 = vld [vmem:[%s5068_s12 + $0x70] sm:$0x7] }
 0x23b   : > { %v1793_v61 = vadd.f32 %v1789_v7, %v1785_v59  ;;  %v1794_v10 = vadd.f32 %v1792_v30, %v1786_v44 }
 0x23d   : > { %v1804_v18 = vadd.f32 %v1800_v62, %v1793_v61  ;;  %v1805_v23 = vadd.f32 %v1803_v16, %v1794_v10  ;;  %v4406_v62 = vld [vmem:[%s5068_s12 + $0x80] sm:$0x7]  ;;  %v4409_v16 = vld [vmem:[%s5068_s12 + $0x84] sm:$0x7]  ;;  %v4412_v61 = vld [vmem:[%s5068_s12 + $0x88] sm:$0x7] }
 0x23e   : > { %v4415_v10 = vld [vmem:[%s5068_s12 + $0x8c] sm:$0x7] }
 0x23f   : > { %v1808_v1 = vadd.f32 %v1807_v45, %v1804_v18  ;;  %v1817_v3 = vadd.f32 %v1816_v38, %v1805_v23 }
 0x241   : > { %v2642_v4 = vmul.f32 -1.442695, %v1808_v1  ;;  %v2643_v40 = vmul.f32 -1.442695, %v1817_v3  ;;  %v4426_v1 = vld [vmem:[%s5068_s12 + $0x90] sm:$0x7] }
 0x242   : > { %v4429_v3 = vld [vmem:[%s5068_s12 + $0x94] sm:$0x7] }
 0x243   : > { %2701 = vpow2.f32 %v2642_v4  ;;  %v4432_v4 = vld [vmem:[%s5068_s12 + $0x98] sm:$0x7] }
 0x244   : > { %2703 = vpow2.f32 %v2643_v40  ;;  %v4435_v40 = vld [vmem:[%s5068_s12 + $0x9c] sm:$0x7] }
 0x24d   : > { %v2702_v54 = vpop.eup %2701 }
 0x24e   : > { %v2704_v47 = vpop.eup %2703  ;;  %v1812_v27 = vadd.f32 1.0, %v2702_v54 }
 0x24f   : > { %v1821_v13 = vadd.f32 1.0, %v2704_v47 }
 0x250   : > { %2705 = vrcp.f32 %v1812_v27 }
 0x251   : > { %2707 = vrcp.f32 %v1821_v13 }
 0x25a   : > { %v2706_v51 = vpop.eup %2705 }
 0x25b   : > { %v2708_v19 = vpop.eup %2707  ;;  %1824 = vst [vmem:[%s489_s8] sm:$0x7] %v2706_v51  ;;  %v4355_v57 = vadd.f32 1.0, %v2706_v51  ;;  %v4466_v51 = vld [vmem:[%s5068_s12 + $0xb0] sm:$0x7] }
 0x25c   : > { %1825 = vst [vmem:[%s493_s10] sm:$0x7] %v2708_v19  ;;  %v4367_v0 = vadd.f32 1.0, %v2708_v19 }
 0x25d   : > { %v1891_v17 = vmul.f32 %v4355_v57, %v1826_v5  ;;  %v1892_v31 = vmul.f32 %v4355_v57, %v1827_v48  ;;  %v1893_v36 = vmul.f32 %v4355_v57, %v1828_v9  ;;  %v1894_v24 = vmul.f32 %v4355_v57, %v1829_v43  ;;  %v4446_v5 = vld [vmem:[%s5068_s12 + $0xa0] sm:$0x7]  ;;  %v4449_v48 = vld [vmem:[%s5068_s12 + $0xa4] sm:$0x7]  ;;  %v4452_v9 = vld [vmem:[%s5068_s12 + $0xa8] sm:$0x7] }
 0x25e   : > { %v1895_v15 = vmul.f32 %v4355_v57, %v1830_v20  ;;  %v1896_v25 = vmul.f32 %v4355_v57, %v1831_v11  ;;  %v1897_v14 = vmul.f32 %v4355_v57, %v1832_v49  ;;  %v1898_v12 = vmul.f32 %v4355_v57, %v1833_v55  ;;  %v4455_v43 = vld [vmem:[%s5068_s12 + $0xac] sm:$0x7] }
 0x25f   : > { %v1899_v7 = vmul.f32 %v4355_v57, %v1834_v28  ;;  %v1900_v30 = vmul.f32 %v4355_v57, %v1835_v56  ;;  %v1901_v59 = vmul.f32 %v4355_v57, %v1836_v50  ;;  %v1902_v44 = vmul.f32 %v4355_v57, %v1837_v58  ;;  %1955 = vst [vmem:[%s4361_s16] sm:$0x7] %v1891_v17  ;;  %v4469_v28 = vld [vmem:[%s5068_s12 + $0xb4] sm:$0x7]  ;;  %v4472_v56 = vld [vmem:[%s5068_s12 + $0xb8] sm:$0x7] }
 0x260   : > { %1956 = vst [vmem:[%s4361_s16 + $0x4] sm:$0x7] %v1892_v31  ;;  %1957 = vst [vmem:[%s4361_s16 + $0x8] sm:$0x7] %v1893_v36  ;;  %v1903_v45 = vmul.f32 %v4355_v57, %v1838_v8  ;;  %v1904_v38 = vmul.f32 %v4355_v57, %v1839_v60  ;;  %v1905_v18 = vmul.f32 %v4355_v57, %v1840_v39  ;;  %v4475_v50 = vld [vmem:[%s5068_s12 + $0xbc] sm:$0x7] }
 0x261   : > { %1958 = vst [vmem:[%s4361_s16 + $0xc] sm:$0x7] %v1894_v24  ;;  %v1906_v23 = vmul.f32 %v4355_v57, %v1841_v29  ;;  %1959 = vst [vmem:[%s4361_s16 + $0x10] sm:$0x7] %v1895_v15  ;;  %v1907_v54 = vmul.f32 %v4355_v57, %v1842_v41  ;;  %v1908_v47 = vmul.f32 %v4355_v57, %v1843_v53  ;;  %v4486_v39 = vld [vmem:[%s5068_s12 + $0xc0] sm:$0x7] }
 0x262   : > { %1960 = vst [vmem:[%s4361_s16 + $0x14] sm:$0x7] %v1896_v25  ;;  %1961 = vst [vmem:[%s4361_s16 + $0x18] sm:$0x7] %v1897_v14  ;;  %v1909_v27 = vmul.f32 %v4355_v57, %v1844_v26  ;;  %v1910_v13 = vmul.f32 %v4355_v57, %v1845_v6  ;;  %v1911_v20 = vmul.f32 %v4355_v57, %v1846_v42  ;;  %v4489_v29 = vld [vmem:[%s5068_s12 + $0xc4] sm:$0x7] }
 0x263   : > { %1962 = vst [vmem:[%s4361_s16 + $0x1c] sm:$0x7] %v1898_v12  ;;  %1963 = vst [vmem:[%s4361_s16 + $0x20] sm:$0x7] %v1899_v7  ;;  %v1912_v11 = vmul.f32 %v4355_v57, %v1847_v63  ;;  %v1913_v49 = vmul.f32 %v4355_v57, %v1848_v46  ;;  %v1914_v55 = vmul.f32 %v4355_v57, %v1849_v33  ;;  %v4492_v41 = vld [vmem:[%s5068_s12 + $0xc8] sm:$0x7] }
 0x264   : > { %1964 = vst [vmem:[%s4361_s16 + $0x24] sm:$0x7] %v1900_v30  ;;  %1965 = vst [vmem:[%s4361_s16 + $0x28] sm:$0x7] %v1901_v59  ;;  %v1915_v58 = vmul.f32 %v4355_v57, %v1850_v2  ;;  %v1916_v19 = vmul.f32 %v4355_v57, %v1851_v32  ;;  %v1917_v8 = vmul.f32 %v4355_v57, %v1852_v37  ;;  %v4495_v53 = vld [vmem:[%s5068_s12 + $0xcc] sm:$0x7] }
 0x265   : > { %1966 = vst [vmem:[%s4361_s16 + $0x2c] sm:$0x7] %v1902_v44  ;;  %1967 = vst [vmem:[%s4361_s16 + $0x30] sm:$0x7] %v1903_v45  ;;  %v1918_v60 = vmul.f32 %v4355_v57, %v1853_v21  ;;  %v1919_v26 = vmul.f32 %v4355_v57, %v4386_v34  ;;  %v1920_v6 = vmul.f32 %v4355_v57, %v4389_v22  ;;  %v4510_v46 = vld [vmem:[%s5068_s12 + $0xd0] sm:$0x7] }
 0x266   : > { %1968 = vst [vmem:[%s4361_s16 + $0x34] sm:$0x7] %v1904_v38  ;;  %1969 = vst [vmem:[%s4361_s16 + $0x38] sm:$0x7] %v1905_v18  ;;  %v1921_v42 = vmul.f32 %v4355_v57, %v4392_v52  ;;  %v1922_v63 = vmul.f32 %v4355_v57, %v4395_v35  ;;  %v4513_v33 = vld [vmem:[%s5068_s12 + $0xd4] sm:$0x7]  ;;  %v1923_v36 = vmul.f32 %v4355_v57, %v4406_v62 }
 0x267   : > { %1970 = vst [vmem:[%s4361_s16 + $0x3c] sm:$0x7] %v1906_v23  ;;  %1971 = vst [vmem:[%s4361_s16 + $0x40] sm:$0x7] %v1907_v54  ;;  %v4516_v17 = vld [vmem:[%s5068_s12 + $0xd8] sm:$0x7]  ;;  %v1924_v24 = vmul.f32 %v4355_v57, %v4409_v16  ;;  %v1925_v2 = vmul.f32 %v4355_v57, %v4412_v61  ;;  %v1926_v32 = vmul.f32 %v4355_v57, %v4415_v10 }
 0x268   : > { %1972 = vst [vmem:[%s4361_s16 + $0x44] sm:$0x7] %v1908_v47  ;;  %1973 = vst [vmem:[%s4361_s16 + $0x48] sm:$0x7] %v1909_v27  ;;  %v4519_v31 = vld [vmem:[%s5068_s12 + $0xdc] sm:$0x7]  ;;  %v1927_v14 = vmul.f32 %v4355_v57, %v4426_v1  ;;  %v1928_v12 = vmul.f32 %v4355_v57, %v4429_v3  ;;  %v1929_v34 = vmul.f32 %v4355_v57, %v4432_v4 }
 0x269   : > { %1974 = vst [vmem:[%s4361_s16 + $0x4c] sm:$0x7] %v1910_v13  ;;  %1975 = vst [vmem:[%s4361_s16 + $0x50] sm:$0x7] %v1911_v20  ;;  %v4534_v37 = vld [vmem:[%s5068_s12 + $0xe0] sm:$0x7]  ;;  %v1930_v22 = vmul.f32 %v4355_v57, %v4435_v40  ;;  %v1931_v59 = vmul.f32 %v4355_v57, %v4446_v5  ;;  %v1932_v44 = vmul.f32 %v4355_v57, %v4449_v48 }
 0x26a   : > { %1976 = vst [vmem:[%s4361_s16 + $0x54] sm:$0x7] %v1912_v11  ;;  %1977 = vst [vmem:[%s4361_s16 + $0x58] sm:$0x7] %v1913_v49  ;;  %v4537_v21 = vld [vmem:[%s5068_s12 + $0xe4] sm:$0x7]  ;;  %v1933_v62 = vmul.f32 %v4355_v57, %v4452_v9  ;;  %v1934_v16 = vmul.f32 %v4355_v57, %v4455_v43  ;;  %v1935_v18 = vmul.f32 %v4355_v57, %v4466_v51 }
 0x26b   : > { %1978 = vst [vmem:[%s4361_s16 + $0x5c] sm:$0x7] %v1914_v55  ;;  %1979 = vst [vmem:[%s4361_s16 + $0x60] sm:$0x7] %v1915_v58  ;;  %v4540_v15 = vld [vmem:[%s5068_s12 + $0xe8] sm:$0x7]  ;;  %v1936_v23 = vmul.f32 %v4355_v57, %v4469_v28  ;;  %v1937_v1 = vmul.f32 %v4355_v57, %v4472_v56  ;;  %v1938_v3 = vmul.f32 %v4355_v57, %v4475_v50 }
 0x26c   : > { %1980 = vst [vmem:[%s4361_s16 + $0x64] sm:$0x7] %v1916_v19  ;;  %1981 = vst [vmem:[%s4361_s16 + $0x68] sm:$0x7] %v1917_v8  ;;  %v4543_v25 = vld [vmem:[%s5068_s12 + $0xec] sm:$0x7]  ;;  %v1939_v27 = vmul.f32 %v4355_v57, %v4486_v39  ;;  %v1940_v13 = vmul.f32 %v4355_v57, %v4489_v29  ;;  %v1941_v5 = vmul.f32 %v4355_v57, %v4492_v41 }
 0x26d   : > { %1982 = vst [vmem:[%s4361_s16 + $0x6c] sm:$0x7] %v1918_v60  ;;  %1983 = vst [vmem:[%s4361_s16 + $0x70] sm:$0x7] %v1919_v26  ;;  %v4558_v52 = vld [vmem:[%s5068_s12 + $0xf0] sm:$0x7]  ;;  %v1942_v48 = vmul.f32 %v4355_v57, %v4495_v53  ;;  %v1943_v49 = vmul.f32 %v4355_v57, %v4510_v46  ;;  %v1944_v55 = vmul.f32 %v4355_v57, %v4513_v33 }
 0x26e   : > { %1984 = vst [vmem:[%s4361_s16 + $0x74] sm:$0x7] %v1920_v6  ;;  %1985 = vst [vmem:[%s4361_s16 + $0x78] sm:$0x7] %v1921_v42  ;;  %v4561_v35 = vld [vmem:[%s5068_s12 + $0xf4] sm:$0x7]  ;;  %v1945_v51 = vmul.f32 %v4355_v57, %v4516_v17  ;;  %v1946_v28 = vmul.f32 %v4355_v57, %v4519_v31  ;;  %v1947_v8 = vmul.f32 %v4355_v57, %v4534_v37 }
 0x26f   : > { %1986 = vst [vmem:[%s4361_s16 + $0x7c] sm:$0x7] %v1922_v63  ;;  %v4564_v7 = vld [vmem:[%s5068_s12 + $0xf8] sm:$0x7]  ;;  %v4567_v30 = vld [vmem:[%s5068_s12 + $0xfc] sm:$0x7]  ;;  %v1948_v60 = vmul.f32 %v4355_v57, %v4537_v21  ;;  %v1949_v39 = vmul.f32 %v4355_v57, %v4540_v15  ;;  %v1950_v29 = vmul.f32 %v4355_v57, %v4543_v25  ;;  %v1951_v42 = vmul.f32 %v4355_v57, %v4558_v52 }
 0x270   : > { %1987 = vst [vmem:[%s4361_s16 + $0x80] sm:$0x7] %v1923_v36  ;;  %1988 = vst [vmem:[%s4361_s16 + $0x84] sm:$0x7] %v1924_v24  ;;  %v4582_v61 = vld [vmem:[%s5073_s2] sm:$0x7]  ;;  %v1952_v63 = vmul.f32 %v4355_v57, %v4561_v35  ;;  %v1953_v46 = vmul.f32 %v4355_v57, %v4564_v7  ;;  %v1954_v33 = vmul.f32 %v4355_v57, %v4567_v30 }
 0x271   : > { %1989 = vst [vmem:[%s4361_s16 + $0x88] sm:$0x7] %v1925_v2  ;;  %1990 = vst [vmem:[%s4361_s16 + $0x8c] sm:$0x7] %v1926_v32  ;;  %v4585_v10 = vld [vmem:[%s5073_s2 + $0x4] sm:$0x7]  ;;  %v2084_v57 = vmul.f32 %v4367_v0, %v4582_v61 }
 0x272   : > { %v4588_v45 = vld [vmem:[%s5073_s2 + $0x8] sm:$0x7]  ;;  %v4591_v38 = vld [vmem:[%s5073_s2 + $0xc] sm:$0x7]  ;;  %1991 = vst [vmem:[%s4361_s16 + $0x90] sm:$0x7] %v1927_v14  ;;  %v2085_v2 = vmul.f32 %v4367_v0, %v4585_v10 }
 0x273   : > { %1992 = vst [vmem:[%s4361_s16 + $0x94] sm:$0x7] %v1928_v12  ;;  %1993 = vst [vmem:[%s4361_s16 + $0x98] sm:$0x7] %v1929_v34  ;;  %v4606_v4 = vld [vmem:[%s5073_s2 + $0x10] sm:$0x7]  ;;  %v2086_v32 = vmul.f32 %v4367_v0, %v4588_v45  ;;  %v2087_v37 = vmul.f32 %v4367_v0, %v4591_v38 }
 0x274   : > { %1994 = vst [vmem:[%s4361_s16 + $0x9c] sm:$0x7] %v1930_v22  ;;  %v4609_v40 = vld [vmem:[%s5073_s2 + $0x14] sm:$0x7]  ;;  %v4612_v54 = vld [vmem:[%s5073_s2 + $0x18] sm:$0x7]  ;;  %v2088_v12 = vmul.f32 %v4367_v0, %v4606_v4 }
 0x275   : > { %v4615_v47 = vld [vmem:[%s5073_s2 + $0x1c] sm:$0x7]  ;;  %1995 = vst [vmem:[%s4361_s16 + $0xa0] sm:$0x7] %v1931_v59  ;;  %1996 = vst [vmem:[%s4361_s16 + $0xa4] sm:$0x7] %v1932_v44  ;;  %v2089_v34 = vmul.f32 %v4367_v0, %v4609_v40  ;;  %v2090_v22 = vmul.f32 %v4367_v0, %v4612_v54 }
 0x276   : > { %1997 = vst [vmem:[%s4361_s16 + $0xa8] sm:$0x7] %v1933_v62  ;;  %1998 = vst [vmem:[%s4361_s16 + $0xac] sm:$0x7] %v1934_v16  ;;  %v4630_v9 = vld [vmem:[%s5073_s2 + $0x20] sm:$0x7]  ;;  %v2091_v52 = vmul.f32 %v4367_v0, %v4615_v47 }
 0x277   : > { %v4633_v43 = vld [vmem:[%s5073_s2 + $0x24] sm:$0x7]  ;;  %v4636_v20 = vld [vmem:[%s5073_s2 + $0x28] sm:$0x7]  ;;  %v4639_v11 = vld [vmem:[%s5073_s2 + $0x2c] sm:$0x7]  ;;  %v2092_v44 = vmul.f32 %v4367_v0, %v4630_v9 }
 0x278   : > { %1999 = vst [vmem:[%s4361_s16 + $0xb0] sm:$0x7] %v1935_v18  ;;  %2000 = vst [vmem:[%s4361_s16 + $0xb4] sm:$0x7] %v1936_v23  ;;  %v4654_v56 = vld [vmem:[%s5073_s2 + $0x30] sm:$0x7]  ;;  %v2093_v62 = vmul.f32 %v4367_v0, %v4633_v43  ;;  %v2094_v16 = vmul.f32 %v4367_v0, %v4636_v20  ;;  %v2095_v61 = vmul.f32 %v4367_v0, %v4639_v11 }
 0x279   : > { %2001 = vst [vmem:[%s4361_s16 + $0xb8] sm:$0x7] %v1937_v1  ;;  %2002 = vst [vmem:[%s4361_s16 + $0xbc] sm:$0x7] %v1938_v3  ;;  %v4657_v50 = vld [vmem:[%s5073_s2 + $0x34] sm:$0x7]  ;;  %v2096_v23 = vmul.f32 %v4367_v0, %v4654_v56 }
 0x27a   : > { %v4660_v58 = vld [vmem:[%s5073_s2 + $0x38] sm:$0x7]  ;;  %v4663_v19 = vld [vmem:[%s5073_s2 + $0x3c] sm:$0x7]  ;;  %2003 = vst [vmem:[%s4361_s16 + $0xc0] sm:$0x7] %v1939_v27  ;;  %v2097_v1 = vmul.f32 %v4367_v0, %v4657_v50 }
 0x27b   : > { %2004 = vst [vmem:[%s4361_s16 + $0xc4] sm:$0x7] %v1940_v13  ;;  %2005 = vst [vmem:[%s4361_s16 + $0xc8] sm:$0x7] %v1941_v5  ;;  %v4684_v41 = vld [vmem:[%s5073_s2 + $0x40] sm:$0x7]  ;;  %v2098_v3 = vmul.f32 %v4367_v0, %v4660_v58  ;;  %v2099_v4 = vmul.f32 %v4367_v0, %v4663_v19 }
 0x27c   : > { %2006 = vst [vmem:[%s4361_s16 + $0xcc] sm:$0x7] %v1942_v48  ;;  %v4687_v53 = vld [vmem:[%s5073_s2 + $0x44] sm:$0x7]  ;;  %v4690_v26 = vld [vmem:[%s5073_s2 + $0x48] sm:$0x7]  ;;  %v2100_v13 = vmul.f32 %v4367_v0, %v4684_v41 }
 0x27d   : > { %v4693_v6 = vld [vmem:[%s5073_s2 + $0x4c] sm:$0x7]  ;;  %2007 = vst [vmem:[%s4361_s16 + $0xd0] sm:$0x7] %v1943_v49  ;;  %2008 = vst [vmem:[%s4361_s16 + $0xd4] sm:$0x7] %v1944_v55  ;;  %v2101_v5 = vmul.f32 %v4367_v0, %v4687_v53  ;;  %v2102_v48 = vmul.f32 %v4367_v0, %v4690_v26 }
 0x27e   : > { %2009 = vst [vmem:[%s4361_s16 + $0xd8] sm:$0x7] %v1945_v51  ;;  %2010 = vst [vmem:[%s4361_s16 + $0xdc] sm:$0x7] %v1946_v28  ;;  %v4708_v17 = vld [vmem:[%s5073_s2 + $0x50] sm:$0x7]  ;;  %v2103_v9 = vmul.f32 %v4367_v0, %v4693_v6 }
 0x27f   : > { %v4711_v31 = vld [vmem:[%s5073_s2 + $0x54] sm:$0x7]  ;;  %v4714_v36 = vld [vmem:[%s5073_s2 + $0x58] sm:$0x7]  ;;  %v4717_v24 = vld [vmem:[%s5073_s2 + $0x5c] sm:$0x7]  ;;  %v2104_v49 = vmul.f32 %v4367_v0, %v4708_v17 }
 0x280   : > { %2011 = vst [vmem:[%s4361_s16 + $0xe0] sm:$0x7] %v1947_v8  ;;  %2012 = vst [vmem:[%s4361_s16 + $0xe4] sm:$0x7] %v1948_v60  ;;  %v2043_v21 = vld [vmem:[%s5073_s2 + $0x60] sm:$0x7]  ;;  %v2105_v55 = vmul.f32 %v4367_v0, %v4711_v31  ;;  %v2106_v51 = vmul.f32 %v4367_v0, %v4714_v36  ;;  %v2107_v28 = vmul.f32 %v4367_v0, %v4717_v24 }
 0x281   : > { %2013 = vst [vmem:[%s4361_s16 + $0xe8] sm:$0x7] %v1949_v39  ;;  %2014 = vst [vmem:[%s4361_s16 + $0xec] sm:$0x7] %v1950_v29  ;;  %v2044_v15 = vld [vmem:[%s5073_s2 + $0x64] sm:$0x7]  ;;  %v2108_v19 = vmul.f32 %v4367_v0, %v2043_v21 }
 0x282   : > { %v2045_v25 = vld [vmem:[%s5073_s2 + $0x68] sm:$0x7]  ;;  %v2046_v14 = vld [vmem:[%s5073_s2 + $0x6c] sm:$0x7]  ;;  %2015 = vst [vmem:[%s4361_s16 + $0xf0] sm:$0x7] %v1951_v42  ;;  %v2109_v8 = vmul.f32 %v4367_v0, %v2044_v15 }
 0x283   : > { %2016 = vst [vmem:[%s4361_s16 + $0xf4] sm:$0x7] %v1952_v63  ;;  %2017 = vst [vmem:[%s4361_s16 + $0xf8] sm:$0x7] %v1953_v46  ;;  %v2047_v35 = vld [vmem:[%s5073_s2 + $0x70] sm:$0x7]  ;;  %v2110_v60 = vmul.f32 %v4367_v0, %v2045_v25  ;;  %v2111_v39 = vmul.f32 %v4367_v0, %v2046_v14 }
 0x284   : > { %2018 = vst [vmem:[%s4361_s16 + $0xfc] sm:$0x7] %v1954_v33  ;;  %v2048_v7 = vld [vmem:[%s5073_s2 + $0x74] sm:$0x7]  ;;  %v2049_v30 = vld [vmem:[%s5073_s2 + $0x78] sm:$0x7]  ;;  %v2112_v26 = vmul.f32 %v4367_v0, %v2047_v35 }
 0x285   : > { %v2050_v59 = vld [vmem:[%s5073_s2 + $0x7c] sm:$0x7]  ;;  %2148 = vst [vmem:[%s4681_s21] sm:$0x7] %v2084_v57  ;;  %2149 = vst [vmem:[%s4681_s21 + $0x4] sm:$0x7] %v2085_v2  ;;  %v2113_v6 = vmul.f32 %v4367_v0, %v2048_v7  ;;  %v2114_v42 = vmul.f32 %v4367_v0, %v2049_v30 }
 0x286   : > { %2150 = vst [vmem:[%s4681_s21 + $0x8] sm:$0x7] %v2086_v32  ;;  %2151 = vst [vmem:[%s4681_s21 + $0xc] sm:$0x7] %v2087_v37  ;;  %v2051_v10 = vld [vmem:[%s5073_s2 + $0x80] sm:$0x7]  ;;  %v2115_v63 = vmul.f32 %v4367_v0, %v2050_v59 }
 0x287   : > { %v2052_v45 = vld [vmem:[%s5073_s2 + $0x84] sm:$0x7]  ;;  %v2053_v38 = vld [vmem:[%s5073_s2 + $0x88] sm:$0x7]  ;;  %v2054_v18 = vld [vmem:[%s5073_s2 + $0x8c] sm:$0x7]  ;;  %v2116_v31 = vmul.f32 %v4367_v0, %v2051_v10 }
 0x288   : > { %2152 = vst [vmem:[%s4681_s21 + $0x10] sm:$0x7] %v2088_v12  ;;  %2153 = vst [vmem:[%s4681_s21 + $0x14] sm:$0x7] %v2089_v34  ;;  %v2055_v40 = vld [vmem:[%s5073_s2 + $0x90] sm:$0x7]  ;;  %v2117_v36 = vmul.f32 %v4367_v0, %v2052_v45  ;;  %v2118_v24 = vmul.f32 %v4367_v0, %v2053_v38  ;;  %v2119_v57 = vmul.f32 %v4367_v0, %v2054_v18 }
 0x289   : > { %2154 = vst [vmem:[%s4681_s21 + $0x18] sm:$0x7] %v2090_v22  ;;  %2155 = vst [vmem:[%s4681_s21 + $0x1c] sm:$0x7] %v2091_v52  ;;  %v2056_v54 = vld [vmem:[%s5073_s2 + $0x94] sm:$0x7]  ;;  %v2120_v21 = vmul.f32 %v4367_v0, %v2055_v40 }
 0x28a   : > { %v2057_v47 = vld [vmem:[%s5073_s2 + $0x98] sm:$0x7]  ;;  %v2058_v27 = vld [vmem:[%s5073_s2 + $0x9c] sm:$0x7]  ;;  %2156 = vst [vmem:[%s4681_s21 + $0x20] sm:$0x7] %v2092_v44  ;;  %v2121_v15 = vmul.f32 %v4367_v0, %v2056_v54 }
 0x28b   : > { %2157 = vst [vmem:[%s4681_s21 + $0x24] sm:$0x7] %v2093_v62  ;;  %2158 = vst [vmem:[%s4681_s21 + $0x28] sm:$0x7] %v2094_v16  ;;  %v2059_v43 = vld [vmem:[%s5073_s2 + $0xa0] sm:$0x7]  ;;  %v2122_v25 = vmul.f32 %v4367_v0, %v2057_v47  ;;  %v2123_v14 = vmul.f32 %v4367_v0, %v2058_v27 }
 0x28c   : > { %2159 = vst [vmem:[%s4681_s21 + $0x2c] sm:$0x7] %v2095_v61  ;;  %v2060_v20 = vld [vmem:[%s5073_s2 + $0xa4] sm:$0x7]  ;;  %v2061_v11 = vld [vmem:[%s5073_s2 + $0xa8] sm:$0x7]  ;;  %v2124_v52 = vmul.f32 %v4367_v0, %v2059_v43 }
 0x28d   : > { %2160 = vst [vmem:[%s4681_s21 + $0x30] sm:$0x7] %v2096_v23  ;;  %2161 = vst [vmem:[%s4681_s21 + $0x34] sm:$0x7] %v2097_v1  ;;  %v2062_v56 = vld [vmem:[%s5073_s2 + $0xac] sm:$0x7]  ;;  %v2125_v35 = vmul.f32 %v4367_v0, %v2060_v20  ;;  %v2126_v7 = vmul.f32 %v4367_v0, %v2061_v11 }
 0x28e   : > { %2162 = vst [vmem:[%s4681_s21 + $0x38] sm:$0x7] %v2098_v3  ;;  %2163 = vst [vmem:[%s4681_s21 + $0x3c] sm:$0x7] %v2099_v4  ;;  %v2063_v50 = vld [vmem:[%s5073_s2 + $0xb0] sm:$0x7]  ;;  %v2127_v30 = vmul.f32 %v4367_v0, %v2062_v56 }
 0x28f   : > { %v2064_v58 = vld [vmem:[%s5073_s2 + $0xb4] sm:$0x7]  ;;  %2164 = vst [vmem:[%s4681_s21 + $0x40] sm:$0x7] %v2100_v13  ;;  %2165 = vst [vmem:[%s4681_s21 + $0x44] sm:$0x7] %v2101_v5  ;;  %v2128_v16 = vmul.f32 %v4367_v0, %v2063_v50 }
 0x290   : > { %2166 = vst [vmem:[%s4681_s21 + $0x48] sm:$0x7] %v2102_v48  ;;  %2167 = vst [vmem:[%s4681_s21 + $0x4c] sm:$0x7] %v2103_v9  ;;  %v2065_v29 = vld [vmem:[%s5073_s2 + $0xb8] sm:$0x7]  ;;  %v2129_v61 = vmul.f32 %v4367_v0, %v2064_v58 }
 0x291   : > { %v2066_v41 = vld [vmem:[%s5073_s2 + $0xbc] sm:$0x7]  ;;  %v2067_v53 = vld [vmem:[%s5073_s2 + $0xc0] sm:$0x7]  ;;  %2168 = vst [vmem:[%s4681_s21 + $0x50] sm:$0x7] %v2104_v49  ;;  %v2130_v10 = vmul.f32 %v4367_v0, %v2065_v29 }
 0x292   : > { %2169 = vst [vmem:[%s4681_s21 + $0x54] sm:$0x7] %v2105_v55  ;;  %2170 = vst [vmem:[%s4681_s21 + $0x58] sm:$0x7] %v2106_v51  ;;  %v2068_v46 = vld [vmem:[%s5073_s2 + $0xc4] sm:$0x7]  ;;  %v2131_v45 = vmul.f32 %v4367_v0, %v2066_v41  ;;  %v2132_v1 = vmul.f32 %v4367_v0, %v2067_v53 }
 0x293   : > { %2171 = vst [vmem:[%s4681_s21 + $0x5c] sm:$0x7] %v2107_v28  ;;  %v2069_v33 = vld [vmem:[%s5073_s2 + $0xc8] sm:$0x7]  ;;  %v2070_v17 = vld [vmem:[%s5073_s2 + $0xcc] sm:$0x7]  ;;  %v2133_v3 = vmul.f32 %v4367_v0, %v2068_v46 }
 0x294   : > { %2172 = vst [vmem:[%s4681_s21 + $0x60] sm:$0x7] %v2108_v19  ;;  %2173 = vst [vmem:[%s4681_s21 + $0x64] sm:$0x7] %v2109_v8  ;;  %v2071_v2 = vld [vmem:[%s5073_s2 + $0xd0] sm:$0x7]  ;;  %v2134_v4 = vmul.f32 %v4367_v0, %v2069_v33  ;;  %v2135_v40 = vmul.f32 %v4367_v0, %v2070_v17 }
 0x295   : > { %2174 = vst [vmem:[%s4681_s21 + $0x68] sm:$0x7] %v2110_v60  ;;  %2175 = vst [vmem:[%s4681_s21 + $0x6c] sm:$0x7] %v2111_v39  ;;  %v2072_v32 = vld [vmem:[%s5073_s2 + $0xd4] sm:$0x7]  ;;  %v2136_v54 = vmul.f32 %v4367_v0, %v2071_v2 }
 0x296   : > { %v2073_v37 = vld [vmem:[%s5073_s2 + $0xd8] sm:$0x7]  ;;  %2176 = vst [vmem:[%s4681_s21 + $0x70] sm:$0x7] %v2112_v26  ;;  %2177 = vst [vmem:[%s4681_s21 + $0x74] sm:$0x7] %v2113_v6  ;;  %v2137_v47 = vmul.f32 %v4367_v0, %v2072_v32 }
 0x297   : > { %2178 = vst [vmem:[%s4681_s21 + $0x78] sm:$0x7] %v2114_v42  ;;  %2179 = vst [vmem:[%s4681_s21 + $0x7c] sm:$0x7] %v2115_v63  ;;  %v2074_v12 = vld [vmem:[%s5073_s2 + $0xdc] sm:$0x7]  ;;  %v2138_v27 = vmul.f32 %v4367_v0, %v2073_v37 }
 0x298   : > { %v2075_v34 = vld [vmem:[%s5073_s2 + $0xe0] sm:$0x7]  ;;  %v2076_v22 = vld [vmem:[%s5073_s2 + $0xe4] sm:$0x7]  ;;  %2180 = vst [vmem:[%s4681_s21 + $0x80] sm:$0x7] %v2116_v31  ;;  %v2139_v13 = vmul.f32 %v4367_v0, %v2074_v12 }
 0x299   : > { %2181 = vst [vmem:[%s4681_s21 + $0x84] sm:$0x7] %v2117_v36  ;;  %2182 = vst [vmem:[%s4681_s21 + $0x88] sm:$0x7] %v2118_v24  ;;  %v2077_v59 = vld [vmem:[%s5073_s2 + $0xe8] sm:$0x7]  ;;  %v2140_v5 = vmul.f32 %v4367_v0, %v2075_v34  ;;  %v2141_v48 = vmul.f32 %v4367_v0, %v2076_v22 }
 0x29a   : > { %2183 = vst [vmem:[%s4681_s21 + $0x8c] sm:$0x7] %v2119_v57  ;;  %v2078_v44 = vld [vmem:[%s5073_s2 + $0xec] sm:$0x7]  ;;  %v2079_v62 = vld [vmem:[%s5073_s2 + $0xf0] sm:$0x7]  ;;  %v2142_v9 = vmul.f32 %v4367_v0, %v2077_v59 }
 0x29b   : > { %2184 = vst [vmem:[%s4681_s21 + $0x90] sm:$0x7] %v2120_v21  ;;  %2185 = vst [vmem:[%s4681_s21 + $0x94] sm:$0x7] %v2121_v15  ;;  %v2080_v38 = vld [vmem:[%s5073_s2 + $0xf4] sm:$0x7]  ;;  %v2143_v43 = vmul.f32 %v4367_v0, %v2078_v44  ;;  %v2144_v20 = vmul.f32 %v4367_v0, %v2079_v62 }
 0x29c   : > { %2186 = vst [vmem:[%s4681_s21 + $0x98] sm:$0x7] %v2122_v25  ;;  %2187 = vst [vmem:[%s4681_s21 + $0x9c] sm:$0x7] %v2123_v14  ;;  %v2081_v18 = vld [vmem:[%s5073_s2 + $0xf8] sm:$0x7]  ;;  %v2145_v11 = vmul.f32 %v4367_v0, %v2080_v38 }
 0x29d   : > { %v2082_v23 = vld [vmem:[%s5073_s2 + $0xfc] sm:$0x7]  ;;  %2188 = vst [vmem:[%s4681_s21 + $0xa0] sm:$0x7] %v2124_v52  ;;  %2189 = vst [vmem:[%s4681_s21 + $0xa4] sm:$0x7] %v2125_v35  ;;  %v2146_v49 = vmul.f32 %v4367_v0, %v2081_v18 }
 0x29e   : > { %2190 = vst [vmem:[%s4681_s21 + $0xa8] sm:$0x7] %v2126_v7  ;;  %2191 = vst [vmem:[%s4681_s21 + $0xac] sm:$0x7] %v2127_v30  ;;  %v2147_v55 = vmul.f32 %v4367_v0, %v2082_v23 }
 0x29f   : > { %2192 = vst [vmem:[%s4681_s21 + $0xb0] sm:$0x7] %v2128_v16  ;;  %2193 = vst [vmem:[%s4681_s21 + $0xb4] sm:$0x7] %v2129_v61 }
 0x2a0   : > { %2194 = vst [vmem:[%s4681_s21 + $0xb8] sm:$0x7] %v2130_v10  ;;  %2195 = vst [vmem:[%s4681_s21 + $0xbc] sm:$0x7] %v2131_v45 }
 0x2a1   : > { %2196 = vst [vmem:[%s4681_s21 + $0xc0] sm:$0x7] %v2132_v1  ;;  %2197 = vst [vmem:[%s4681_s21 + $0xc4] sm:$0x7] %v2133_v3 }
 0x2a2   : > { %2198 = vst [vmem:[%s4681_s21 + $0xc8] sm:$0x7] %v2134_v4  ;;  %2199 = vst [vmem:[%s4681_s21 + $0xcc] sm:$0x7] %v2135_v40 }
 0x2a3   : > { %2200 = vst [vmem:[%s4681_s21 + $0xd0] sm:$0x7] %v2136_v54  ;;  %2201 = vst [vmem:[%s4681_s21 + $0xd4] sm:$0x7] %v2137_v47 }
 0x2a4   : > { %2202 = vst [vmem:[%s4681_s21 + $0xd8] sm:$0x7] %v2138_v27  ;;  %2203 = vst [vmem:[%s4681_s21 + $0xdc] sm:$0x7] %v2139_v13 }
 0x2a5   : > { %2204 = vst [vmem:[%s4681_s21 + $0xe0] sm:$0x7] %v2140_v5  ;;  %2205 = vst [vmem:[%s4681_s21 + $0xe4] sm:$0x7] %v2141_v48 }
 0x2a6   : > { %2206 = vst [vmem:[%s4681_s21 + $0xe8] sm:$0x7] %v2142_v9  ;;  %2207 = vst [vmem:[%s4681_s21 + $0xec] sm:$0x7] %v2143_v43 }
 0x2a7   : > { %2208 = vst [vmem:[%s4681_s21 + $0xf0] sm:$0x7] %v2144_v20  ;;  %2209 = vst [vmem:[%s4681_s21 + $0xf4] sm:$0x7] %v2145_v11 }
 0x2a8   : > { %2210 = vst [vmem:[%s4681_s21 + $0xf8] sm:$0x7] %v2146_v49  ;;  %2211 = vst [vmem:[%s4681_s21 + $0xfc] sm:$0x7] %v2147_v55 }
 0x2a9 PF: > { %s5075_s6 = sld [smem:[#allocation14_spill]] }
 0x2af   : > { %s27_s21 = sadd.s32 1, %s5075_s6  }
 0x2b0   : > { %p24_p2 = scmp.ge.s32.totalorder %s27_s21, 4  }
 0x2b2   :  { %26 = sbr.rel (!%p24_p2) target bundleno = 16 (0x10), region = 138 }
 0x2b9   :  { %2277 = vsyncpa [#allocation5], 1 }
 0x2ba   :  { %2279 = vsyncpa [#allocation5 + $0x1], 1 }
 0x2bb   :  { %2280 = vsyncpa [#allocation7], 1 }
 0x2bc   :  { %2281 = vsyncpa [#allocation10], 1 }

</bundles_post_ra>
